<compile_context>
chip_gen: v5e
topology: v5e:2x2
jax: 0.10.0
libtpu: 0.0.40
codegen_flags: <defaults>
</compile_context>

<pallas_src>
import jax
import jax.numpy as jnp
from jax import lax
from jax.experimental import pallas as pl
from jax.experimental.pallas import tpu as pltpu


def _round_up(x, m):
    return ((x + m - 1) // m) * m


def _vmem_capacity_bytes():
    """Per-core VMEM capacity; conservative fallback if the query fails."""
    try:
        return int(pltpu.get_tpu_info().vmem_capacity_bytes)
    except Exception:
        return 64 * 1024 * 1024  # v7x per-TensorCore VMEM (smallest current)


def _tile_rows(B, S, E, key_itemsize, vmem_cap_bytes):
    """Batch rows per grid step.

    Multiple of 128 (lane-dense transposed stores), large enough to amortize
    the ~0.35us per-grid-step overhead against HBM bandwidth, small enough
    that the double-buffered working set stays comfortably inside VMEM, and
    capped near B/2 so the 'parallel' batch axis keeps >= 2 steps (v7x has two
    TensorCores sharing the grid).
    """
    keys_row_bytes = max(1, S * E * key_itemsize)
    # ~8 MiB keys tile with 128 MiB VMEM (v5e/v6e), ~5 MiB with 64 MiB (v7x).
    target = 8 * 1024 * 1024 if vmem_cap_bytes >= 96 * 1024 * 1024 else 5 * 1024 * 1024
    max_rows = max(128, (target // keys_row_bytes) // 128 * 128)
    half = _round_up(max(1, (B + 1) // 2), 128)
    return max(128, min(max_rows, half))


def _vmem_bytes_estimate(tile_b, S, E, A, key_itemsize, q_itemsize):
    """Rough per-step VMEM working set (double-buffered I/O + f32 temps)."""
    dbuf = 2 * (tile_b * S * E * key_itemsize      # keys tile
                + tile_b * E * q_itemsize          # queries tile
                + tile_b * (E + S) * 4             # transposed outputs
                + tile_b * 4)                      # keys_length row
    temps = (2 * tile_b * S * A * 4                # kh / hidden
             + tile_b * (E + 4 * S + A + 8) * 4)   # out, scores/attn, misc
    return dbuf + temps


def din_attention_kernel(len_ref, q_ref, k_ref, wq_ref, wk_ref, wv_ref,
                         out_t_ref, attn_t_ref):
    # Per grid step (TB = tile_b):
    #   len_ref  [1, TB] int32   (keys_length, batch on lanes)
    #   q_ref    [TB, E]
    #   k_ref    [TB*S, E]       (keys pre-flattened in the wrapper)
    #   wq/wk    [E, A], wv [1, A]   (VMEM-resident across the grid)
    #   out_t    [E, TB]  f32    (transposed -> lane-dense store)
    #   attn_t   [S, TB]  f32    (transposed -> lane-dense store)
    q = q_ref[...]
    kflat = k_ref[...]
    wq = wq_ref[...]
    wk = wk_ref[...]
    wv_row = wv_ref[...]
    lens = len_ref[...]                         # [1, TB] int32

    TBS, E = kflat.shape
    TB = q.shape[0]
    S = TBS // TB
    A = wq.shape[1]

    # Projections: native dtype straight into the MXU, f32 accumulate.
    qh = jnp.dot(q, wq, preferred_element_type=jnp.float32)            # [TB, A]
    kh = jnp.dot(kflat, wk, preferred_element_type=jnp.float32)        # [TB*S, A]
    kh3 = kh.reshape(TB, S, A)          # leading-dim split: layout-preserving

    hidden = jnp.maximum(kh3 + qh[:, None, :], 0.0)                    # [TB, S, A]
    # w_value has output width 1: VPU multiply + 16-wide lane reduce (no N=1 MXU op).
    scores = jnp.sum(hidden * wv_row.reshape(1, 1, A).astype(jnp.float32),
                     axis=-1)                                           # [TB, S]

    # ---- mask + softmax in transposed [S, TB] layout (batch on lanes) ----
    scores_t = jnp.transpose(scores)                                    # [S, TB]
    pos_t = lax.broadcasted_iota(jnp.int32, (S, TB), 0)
    scores_t = jnp.where(pos_t < lens, scores_t, jnp.float32(-1000000000.0))
    m_t = jnp.max(scores_t, axis=0, keepdims=True)                      # [1, TB]
    e_t = jnp.exp(scores_t - m_t)                                       # [S, TB]
    denom_t = jnp.sum(e_t, axis=0, keepdims=True)                       # [1, TB]
    attn_t = e_t * pl.reciprocal(denom_t, approx=True)                  # [S, TB]
    attn_t_ref[...] = attn_t.astype(attn_t_ref.dtype)                   # lane-dense vst

    # ---- weighted key sum (batch back on sublanes to match the keys tile) ----
    attn2d = jnp.transpose(attn_t)                                      # [TB, S]
    keys3 = kflat.reshape(TB, S, E)     # leading-dim split: layout-preserving
    out = jnp.sum(attn2d[:, :, None] * keys3, axis=1)                   # [TB, E] f32
    out_t_ref[...] = jnp.transpose(out).astype(out_t_ref.dtype)         # [E, TB] lane-dense


def din_attention(queries, keys, keys_length, wq, wk, wv, *, tile_b=None):
    """queries [B,E], keys [B,S,E], keys_length [B] int; wq/wk [E,A], wv [A,1].

    Returns (output [B,E] f32, attention_weights [B,S] f32).
    """
    B, S, E = keys.shape
    A = wq.shape[1]

    vmem_cap = _vmem_capacity_bytes()
    if tile_b is None:
        tile_b = _tile_rows(B, S, E, keys.dtype.itemsize, vmem_cap)
    tile_b = max(128, _round_up(int(tile_b), 128))   # lane-dense transposed stores

    b_pad = _round_up(B, tile_b)
    if b_pad != B:
        pad = b_pad - B
        # Padded rows get zero keys and keys_length == 0; their softmax is a
        # fully-masked uniform row and is sliced off below.  Keep the padding
        # value 0 so nothing non-finite leaks into the kernel.
        queries = jnp.pad(queries, ((0, pad), (0, 0)))
        keys = jnp.pad(keys, ((0, pad), (0, 0), (0, 0)))
        keys_length = jnp.pad(keys_length, ((0, pad),))

    # Keys pre-flattened to [B*S, E]: the kernel's tall MXU matmul consumes it
    # directly and only ever does free leading-dim splits.
    keys_flat = keys.reshape(b_pad * S, E)
    lens_row = keys_length.reshape(1, b_pad).astype(jnp.int32)
    wv_row = wv.reshape(1, A)

    num_tiles = b_pad // tile_b
    grid = (num_tiles,)

    ws = _vmem_bytes_estimate(tile_b, S, E, A,
                              keys.dtype.itemsize, queries.dtype.itemsize)
    vmem_limit = max(32 * 1024 * 1024, int(ws * 1.5))
    vmem_limit = min(vmem_limit, max(32 * 1024 * 1024, int(vmem_cap * 0.75)))

    # Advisory cost: the call is HBM-bandwidth dominated by the keys read.
    flops = int(2 * b_pad * S * E * A + 2 * b_pad * E * A
                + 2 * b_pad * S * A + 2 * b_pad * S * E + 8 * b_pad * S)
    bytes_accessed = int(keys_flat.size * keys_flat.dtype.itemsize
                         + queries.size * queries.dtype.itemsize
                         + b_pad * (E + S + 1) * 4
                         + (wq.size + wk.size + wv.size) * 4)
    cost = pl.CostEstimate(flops=flops, transcendentals=int(b_pad * S),
                           bytes_accessed=bytes_accessed)

    out_t, attn_t = pl.pallas_call(
        din_attention_kernel,
        out_shape=(jax.ShapeDtypeStruct((E, b_pad), jnp.float32),
                   jax.ShapeDtypeStruct((S, b_pad), jnp.float32)),
        grid=grid,
        in_specs=[
            pl.BlockSpec((1, tile_b), lambda i: (0, i)),           # keys_length row
            pl.BlockSpec((tile_b, E), lambda i: (i, 0)),           # queries
            pl.BlockSpec((tile_b * S, E), lambda i: (i, 0)),       # keys (flat)
            pl.BlockSpec((E, A), lambda i: (0, 0)),                # w_query^T (resident)
            pl.BlockSpec((E, A), lambda i: (0, 0)),                # w_key^T   (resident)
            pl.BlockSpec((1, A), lambda i: (0, 0)),                # w_value row (resident)
        ],
        out_specs=(pl.BlockSpec((E, tile_b), lambda i: (0, i)),    # out^T  (lane-dense)
                   pl.BlockSpec((S, tile_b), lambda i: (0, i))),   # attn^T (lane-dense)
        compiler_params=pltpu.CompilerParams(
            dimension_semantics=("parallel",),
            vmem_limit_bytes=vmem_limit),
        cost_estimate=cost,
    )(lens_row, queries, keys_flat, wq, wk, wv_row)

    out = jnp.transpose(out_t)[:B]       # [B, E]
    attn = jnp.transpose(attn_t)[:B]     # [B, S]
    return out, attn


def din_attention_ref(queries, keys, keys_length, wq, wk, wv):
    """Pure-JAX reference mirroring the PyTorch forward."""
    B, S, E = keys.shape
    qh = queries @ wq                                    # [B, A]
    kh = jnp.einsum('bse,ea->bsa', keys, wk)             # [B, S, A]
    hidden = jax.nn.relu(qh[:, None, :] + kh)
    scores = jnp.einsum('bsa,ao->bso', hidden, wv)[..., 0]
    pos = jnp.arange(S)[None, :]
    mask = pos < keys_length[:, None]
    scores = jnp.where(mask, scores, -1000000000.0)
    attn = jax.nn.softmax(scores, axis=1)
    out = jnp.einsum('bs,bse->be', attn, keys)
    return out, attn


if __name__ == "__main__":
    # batch, max_seq_len, embedding_dim, attention_size.
    # B=200 with the minimum tile (128) exercises a 2-step grid plus the
    # batch-padding path while staying small.
    B, S, E, A = 200, 8, 32, 16

    key = jax.random.PRNGKey(0)
    k_q, k_k, k_len, k_wq, k_wk, k_wv = jax.random.split(key, 6)

    queries = jax.random.normal(k_q, (B, E), dtype=jnp.float32)
    keys = jax.random.normal(k_k, (B, S, E), dtype=jnp.float32)
    keys_length = jax.random.randint(k_len, (B,), 1, S + 1).astype(jnp.int32)

    # "Linear" weights (torch stores [out, in]; we keep [in, out]).
    wq = jax.random.normal(k_wq, (E, A), dtype=jnp.float32) * (1.0 / jnp.sqrt(E))
    wk = jax.random.normal(k_wk, (E, A), dtype=jnp.float32) * (1.0 / jnp.sqrt(E))
    wv = jax.random.normal(k_wv, (A, 1), dtype=jnp.float32) * (1.0 / jnp.sqrt(A))

    out, attn = din_attention(queries, keys, keys_length, wq, wk, wv)
    out = jax.block_until_ready(out)
    attn = jax.block_until_ready(attn)

    out_ref, attn_ref = din_attention_ref(queries, keys, keys_length, wq, wk, wv)

    # Tolerance slightly relaxed vs f32-exact: softmax normalization uses the
    # EUP approximate reciprocal (rows sum to 1 within ~1e-3).
    assert out.shape == (B, E) and attn.shape == (B, S)
    assert jnp.allclose(attn.sum(axis=1), 1.0, atol=5e-3)
    assert jnp.allclose(out, out_ref, atol=5e-3, rtol=5e-3)
    assert jnp.allclose(attn, attn_ref, atol=5e-3, rtol=5e-3)

    print("KERNEL_OK")
</pallas_src>

<mosaic_0001>
module attributes {stable_mosaic.version = 11 : i64} {
  func.func @din_attention_kernel(%arg0: i32, %arg1: memref<1x128xi32, #tpu.memory_space<vmem>>, %arg2: memref<128x32xf32, #tpu.memory_space<vmem>>, %arg3: memref<1024x32xf32, #tpu.memory_space<vmem>>, %arg4: memref<32x16xf32, #tpu.memory_space<vmem>>, %arg5: memref<32x16xf32, #tpu.memory_space<vmem>>, %arg6: memref<1x16xf32, #tpu.memory_space<vmem>>, %arg7: memref<32x128xf32, #tpu.memory_space<vmem>>, %arg8: memref<8x128xf32, #tpu.memory_space<vmem>>) attributes {dimension_semantics = [#tpu.dimension_semantics<parallel>], iteration_bounds = array<i64: 2>, scalar_prefetch = 0 : i64, scratch_operands = 0 : i64, tpu.core_type = #tpu.core_type<tc>, window_params = [{transform_indices = @transform_0, window_bounds = array<i64: 1, 128>}, {transform_indices = @transform_1, window_bounds = array<i64: 128, 32>}, {transform_indices = @transform_2, window_bounds = array<i64: 1024, 32>}, {pipeline_mode = #tpu.pipeline_mode<synchronous>, transform_indices = @transform_3, window_bounds = array<i64: 32, 16>}, {pipeline_mode = #tpu.pipeline_mode<synchronous>, transform_indices = @transform_4, window_bounds = array<i64: 32, 16>}, {pipeline_mode = #tpu.pipeline_mode<synchronous>, transform_indices = @transform_5, window_bounds = array<i64: 1, 16>}, {transform_indices = @transform_6, window_bounds = array<i64: 32, 128>}, {transform_indices = @transform_7, window_bounds = array<i64: 8, 128>}]} {
    %c0 = arith.constant 0 : index
    %c0_0 = arith.constant 0 : index
    %0 = vector.load %arg2[%c0, %c0_0] : memref<128x32xf32, #tpu.memory_space<vmem>>, vector<128x32xf32>
    %c0_1 = arith.constant 0 : index
    %c0_2 = arith.constant 0 : index
    %1 = vector.load %arg3[%c0_1, %c0_2] : memref<1024x32xf32, #tpu.memory_space<vmem>>, vector<1024x32xf32>
    %c0_3 = arith.constant 0 : index
    %c0_4 = arith.constant 0 : index
    %2 = vector.load %arg4[%c0_3, %c0_4] : memref<32x16xf32, #tpu.memory_space<vmem>>, vector<32x16xf32>
    %c0_5 = arith.constant 0 : index
    %c0_6 = arith.constant 0 : index
    %3 = vector.load %arg5[%c0_5, %c0_6] : memref<32x16xf32, #tpu.memory_space<vmem>>, vector<32x16xf32>
    %c0_7 = arith.constant 0 : index
    %c0_8 = arith.constant 0 : index
    %4 = vector.load %arg6[%c0_7, %c0_8] : memref<1x16xf32, #tpu.memory_space<vmem>>, vector<1x16xf32>
    %c0_9 = arith.constant 0 : index
    %c0_10 = arith.constant 0 : index
    %5 = vector.load %arg1[%c0_9, %c0_10] : memref<1x128xi32, #tpu.memory_space<vmem>>, vector<1x128xi32>
    %cst = arith.constant dense<0.000000e+00> : vector<128x16xf32>
    %6 = tpu.matmul %0, %2, %cst {dimension_numbers = #tpu.dot_dimension_numbers<[1], [0], [0], [1], [0, 0, 1, 1], [], []>} : vector<128x32xf32>, vector<32x16xf32>, vector<128x16xf32> -> vector<128x16xf32>
    %cst_11 = arith.constant dense<0.000000e+00> : vector<1024x16xf32>
    %7 = tpu.matmul %1, %3, %cst_11 {dimension_numbers = #tpu.dot_dimension_numbers<[1], [0], [0], [1], [0, 0, 1, 1], [], []>} : vector<1024x32xf32>, vector<32x16xf32>, vector<1024x16xf32> -> vector<1024x16xf32>
    %8 = vector.shape_cast %7 : vector<1024x16xf32> to vector<128x8x16xf32>
    %9 = vector.shape_cast %6 : vector<128x16xf32> to vector<128x1x16xf32>
    %10 = vector.broadcast %9 : vector<128x1x16xf32> to vector<128x8x16xf32>
    %11 = arith.addf %8, %10 : vector<128x8x16xf32>
    %cst_12 = arith.constant 0.000000e+00 : f32
    %12 = vector.broadcast %cst_12 : f32 to vector<128x8x16xf32>
    %13 = arith.maximumf %11, %12 : vector<128x8x16xf32>
    %14 = vector.shape_cast %4 : vector<1x16xf32> to vector<1x1x16xf32>
    %15 = vector.broadcast %14 : vector<1x1x16xf32> to vector<128x8x16xf32>
    %16 = arith.mulf %13, %15 : vector<128x8x16xf32>
    %cst_13 = arith.constant dense<0.000000e+00> : vector<128x8xf32>
    %17 = vector.multi_reduction <add>, %16, %cst_13 [2] : vector<128x8x16xf32> to vector<128x8xf32>
    %18 = tpu.transpose %17, [1, 0] : vector<128x8xf32> -> vector<8x128xf32>
    %19 = tpu.iota {dimensions = array<i32: 0>} : vector<8x128xi32>
    %20 = vector.broadcast %5 : vector<1x128xi32> to vector<8x128xi32>
    %21 = arith.cmpi slt, %19, %20 : vector<8x128xi32>
    %cst_14 = arith.constant -1.000000e+09 : f32
    %22 = vector.broadcast %cst_14 : f32 to vector<8x128xf32>
    %23 = arith.select %21, %18, %22 : vector<8x128xi1>, vector<8x128xf32>
    %cst_15 = arith.constant dense<0xFF800000> : vector<128xf32>
    %24 = vector.multi_reduction <maximumf>, %23, %cst_15 [0] : vector<8x128xf32> to vector<128xf32>
    %25 = vector.shape_cast %24 : vector<128xf32> to vector<1x128xf32>
    %26 = vector.broadcast %25 : vector<1x128xf32> to vector<8x128xf32>
    %27 = arith.subf %23, %26 : vector<8x128xf32>
    %28 = math.exp %27 : vector<8x128xf32>
    %cst_16 = arith.constant dense<0.000000e+00> : vector<128xf32>
    %29 = vector.multi_reduction <add>, %28, %cst_16 [0] : vector<8x128xf32> to vector<128xf32>
    %30 = vector.shape_cast %29 : vector<128xf32> to vector<1x128xf32>
    %31 = tpu.reciprocal %30 {approx = true} : vector<1x128xf32> -> vector<1x128xf32>
    %32 = vector.broadcast %31 : vector<1x128xf32> to vector<8x128xf32>
    %33 = arith.mulf %28, %32 : vector<8x128xf32>
    %c0_17 = arith.constant 0 : index
    %c0_18 = arith.constant 0 : index
    %34 = vector.load %arg8[%c0_17, %c0_18] : memref<8x128xf32, #tpu.memory_space<vmem>>, vector<8x128xf32>
    tpu.vector_store %arg8[%c0_17, %c0_18], %33 {strides = array<i32>} : memref<8x128xf32, #tpu.memory_space<vmem>>, vector<8x128xf32>,
    %35 = tpu.transpose %33, [1, 0] : vector<8x128xf32> -> vector<128x8xf32>
    %36 = vector.shape_cast %1 : vector<1024x32xf32> to vector<128x8x32xf32>
    %37 = vector.shape_cast %35 : vector<128x8xf32> to vector<128x8x1xf32>
    %38 = vector.broadcast %37 : vector<128x8x1xf32> to vector<128x8x32xf32>
    %39 = arith.mulf %38, %36 : vector<128x8x32xf32>
    %cst_19 = arith.constant dense<0.000000e+00> : vector<128x32xf32>
    %40 = vector.multi_reduction <add>, %39, %cst_19 [1] : vector<128x8x32xf32> to vector<128x32xf32>
    %41 = tpu.transpose %40, [1, 0] : vector<128x32xf32> -> vector<32x128xf32>
    %c0_20 = arith.constant 0 : index
    %c0_21 = arith.constant 0 : index
    %42 = vector.load %arg7[%c0_20, %c0_21] : memref<32x128xf32, #tpu.memory_space<vmem>>, vector<32x128xf32>
    tpu.vector_store %arg7[%c0_20, %c0_21], %41 {strides = array<i32>} : memref<32x128xf32, #tpu.memory_space<vmem>>, vector<32x128xf32>,
    return
  }
  func.func @transform_0(%arg0: i32) -> (i32, i32) {
    %c0_i32 = arith.constant 0 : i32
    %c0_i32_0 = arith.constant 0 : i32
    return %c0_i32, %arg0 : i32, i32
  }
  func.func @transform_1(%arg0: i32) -> (i32, i32) {
    %c0_i32 = arith.constant 0 : i32
    %c0_i32_0 = arith.constant 0 : i32
    return %arg0, %c0_i32 : i32, i32
  }
  func.func @transform_2(%arg0: i32) -> (i32, i32) {
    %c0_i32 = arith.constant 0 : i32
    %c0_i32_0 = arith.constant 0 : i32
    return %arg0, %c0_i32 : i32, i32
  }
  func.func @transform_3(%arg0: i32) -> (i32, i32) {
    %c0_i32 = arith.constant 0 : i32
    %c0_i32_0 = arith.constant 0 : i32
    %c0_i32_1 = arith.constant 0 : i32
    return %c0_i32, %c0_i32_0 : i32, i32
  }
  func.func @transform_4(%arg0: i32) -> (i32, i32) {
    %c0_i32 = arith.constant 0 : i32
    %c0_i32_0 = arith.constant 0 : i32
    %c0_i32_1 = arith.constant 0 : i32
    return %c0_i32, %c0_i32_0 : i32, i32
  }
  func.func @transform_5(%arg0: i32) -> (i32, i32) {
    %c0_i32 = arith.constant 0 : i32
    %c0_i32_0 = arith.constant 0 : i32
    %c0_i32_1 = arith.constant 0 : i32
    return %c0_i32, %c0_i32_0 : i32, i32
  }
  func.func @transform_6(%arg0: i32) -> (i32, i32) {
    %c0_i32 = arith.constant 0 : i32
    %c0_i32_0 = arith.constant 0 : i32
    return %c0_i32, %arg0 : i32, i32
  }
  func.func @transform_7(%arg0: i32) -> (i32, i32) {
    %c0_i32 = arith.constant 0 : i32
    %c0_i32_0 = arith.constant 0 : i32
    return %c0_i32, %arg0 : i32, i32
  }
}

</mosaic_0001>

<bundles_post_ra>
// kernel: tpu_custom_call.1
= control target key start
LH: loop header
LB: loop body
LE: loop exit
PB: predicated region body
PF: predicated region fallthrough
CT: control target
= control target key end

     0   :  { %13 = vsyncpa [#allocation3], 0  ;;  %s8074_s0 = inlined_call_operand.vmem [shape: s32[1,256], index: 0, kind: input, shape index: {}]   ;;  %s8075_s1 = inlined_call_operand.vmem [shape: f32[256,32], index: 1, kind: input, shape index: {}]   ;;  %s8076_s2 = inlined_call_operand.vmem [shape: f32[2048,32], index: 2, kind: input, shape index: {}]   ;;  %s8077_s3 = inlined_call_operand.vmem [shape: f32[32,16], index: 3, kind: input, shape index: {}]   ;;  %s8078_s4 = inlined_call_operand.vmem [shape: f32[32,16], index: 4, kind: input, shape index: {}]   ;;  %s8079_s5 = inlined_call_operand.vmem [shape: f32[1,16], index: 5, kind: input, shape index: {}]   ;;  %s8080_s6 = inlined_call_operand.hbm [shape: f32[32,256], index: 6, kind: output, shape index: {0}]   ;;  %s8081_s7 = inlined_call_operand.hbm [shape: f32[8,256], index: 7, kind: output, shape index: {1}]  }
   0x1   :  { %15 = vsyncpa [#allocation3 + $0x1], 0 }
   0x2   :  { %16 = vsyncpa [#allocation5], 0 }
   0x3   :  { %18 = vsyncpa [#allocation5 + $0x1], 0  ;;  %s5875_s24 = smov 0   ;;  %s5877_s25 = smov 0  }
   0x4   :  { %s5879_s26 = smov 0   ;;  %s5881_s27 = smov 0  }
   0x5 LB: > { %s5896_s28 = sadd.s32 4294967295, %s5830_s27   ;;  %s5377_s29 = sadd.s32 4294967294, %s5830_s27   ;;  %s5830_s27 = sphi %s5881_s27, %s8141_s27   ;;  %s5826_s26 = sphi %s5879_s26, %s8140_s26   ;;  %s5822_s25 = sphi %s5877_s25, %s8139_s25   ;;  %s5818_s24 = sphi %s5875_s24, %s8138_s24  }
   0x6   : > { %s5900_s30 = sadd.s32 1, %s5830_s27   ;;  %s172_s8 = sadd.s32 1, %s5826_s26 }
   0x7   : > { %s169_s9 = ssub.s32 %s5830_s27, %s5900_s30  ;;  %p182_p0 = scmp.ne.s32.totalorder %s5826_s26, %s5822_s25 }
   0x8   : > { %p170_p1 = scmp.eq.s32.totalorder %s169_s9, 0  ;;  %p183_p2 = scmp.eq.s32.totalorder %s5896_s28, 1 }
   0x9   : > { %p188_p3 = scmp.ne.s32.totalorder %s5822_s25, %s5818_s24  ;;  %p189_p4 = scmp.eq.s32.totalorder %s5377_s29, 1 }
   0xa   : > { %s5911_s10 = scalar_select %p170_p1, %s5826_s26, %s172_s8  }
   0xb   : > { %p5913_p5 = por %p183_p2, %p182_p0  ;;  %p5917_p6 = por %p189_p4, %p188_p3 }
   0xc   : > { %p5380_p7 = scmp.ge.s32.totalorder %s5830_s27, 1  ;;  %p266_p8 = scmp.lt.s32.totalorder %s5830_s27, 3 }
   0xe   : > { %p267_p9 = pnand %p5380_p7, %p266_p8 }
  0x10   : > { %270 = sbr.rel (%p267_p9) target bundleno = 1683 (0x693), region = 44 }
  0x15   : > { %v473_v0 = vld [vmem:[%s8077_s3 + $0x18] sm:$0xff]  ;;  %v472_v2 = vld [vmem:[%s8077_s3 + $0x10] sm:$0xff]  ;;  %s5383_s19 = sshll.u32 %s5896_s28, 4  ;;  %s5385_s20 = sshll.u32 %s5896_s28, 7  ;;  %v471_v4 = vld [vmem:[%s8077_s3 + $0x8] sm:$0xff]  ;;  %vm480_vm0 = vcmask 261120  }
  0x16   : > { %v477_v1 = vld [vmem:[%s8078_s4 + $0x18] sm:$0xff]  ;;  %541 = vmatpush.msra.mxu0 %v473_v0  ;;  %v476_v3 = vld [vmem:[%s8078_s4 + $0x10] sm:$0xff]  ;;  %p315_p10 = scmp.lt.s32.totalorder %s5383_s19, 31  ;;  %p321_p11 = scmp.lt.s32.totalorder %s5385_s20, 255  ;;  %v475_v5 = vld [vmem:[%s8078_s4 + $0x8] sm:$0xff]  ;;  %vm2150_vm1 = vcmask 130048  }
  0x17   : > { %5537 = vmatpush.msra.mxu1 %v477_v1  ;;  %5538 = vmatpush.msra.mxu2 %v477_v1  ;;  %v470_v6 = vld [vmem:[%s8077_s3] sm:$0xff]  ;;  %vm2793_vm2 = vcmask 1041409   ;;  %vm2795_vm3 = vcmask 1042434   ;;  %vm2797_vm4 = vcmask 1043459   ;;  %vm2799_vm5 = vcmask 1044484   ;;  %p311_p12 = scmp.lt.s32.totalorder %s5896_s28, 1 }
  0x18   : > { %5539 = vmatpush.msra.mxu3 %v477_v1  ;;  %542 = vmatpush.msra.mxu0 %v472_v2  ;;  %s8143_s19 = smov (!%p315_p10, %s5383_s19), 31  ;;  %v474_v7 = vld [vmem:[%s8078_s4] sm:$0xff]  ;;  %s8145_s20 = smov (!%p321_p11, %s5385_s20), 255  ;;  %vm2801_vm6 = vcmask 1045509   ;;  %vm2803_vm7 = vcmask 1046534   ;;  %vm2805_vm8 = vcmask 1047559  }
  0x19   : > { %5540 = vmatpush.msra.mxu1 %v476_v3  ;;  %5541 = vmatpush.msra.mxu2 %v476_v3  ;;  %s5384_s17 = sshll.u32 %s8143_s19, 3  ;;  %s5386_s23 = sshll.u32 %s8145_s20, 3 }
  0x1a   : > { %5542 = vmatpush.msra.mxu3 %v476_v3  ;;  %543 = vmatpush.msra.mxu0 %v471_v4  ;;  %s5952_s22 = scalar_lea.vmem %s8075_s1, %s5384_s17  ;;  %s5958_s9 = scalar_lea.vmem %s8076_s2, %s5386_s23 }
  0x1b   : > { %5543 = vmatpush.msra.mxu1 %v475_v5  ;;  %5544 = vmatpush.msra.mxu2 %v475_v5  ;;  %v326_v8 = vld [vmem:[%s5952_s22] sm:$0xff]  ;;  %v327_v12 = vld [vmem:[%s5952_s22 + $0x8] sm:$0xff]  ;;  %v328_v16 = vld [vmem:[%s5952_s22 + $0x10] sm:$0xff]  ;;  %s7088_s17 = scalar_select %p311_p12, %s5896_s28, 1 }
  0x1c   : > { %5545 = vmatpush.msra.mxu3 %v475_v5  ;;  %544 = vmatpush.msra.mxu0 %v470_v6  ;;  %v362_v9 = vld [vmem:[%s5958_s9 + $0xa0] sm:$0xff]  ;;  %v363_v13 = vld [vmem:[%s5958_s9 + $0xa8] sm:$0xff]  ;;  %v364_v17 = vld [vmem:[%s5958_s9 + $0xb0] sm:$0xff]  ;;  %s7267_s8 = sand.u32 1, %s5822_s25   ;;  %s5533_s13 = sshll.u32 %s5896_s28, 3 }
  0x1d   : > { %5546 = vmatpush.msra.mxu1 %v474_v7  ;;  %5547 = vmatpush.msra.mxu2 %v474_v7  ;;  %v398_v10 = vld [vmem:[%s5958_s9 + $0x1c0] sm:$0xff]  ;;  %v399_v14 = vld [vmem:[%s5958_s9 + $0x1c8] sm:$0xff]  ;;  %v400_v18 = vld [vmem:[%s5958_s9 + $0x1d0] sm:$0xff]  ;;  %s5382_s19 = sshll.u32 %s7267_s8, 3  ;;  %s5259_s16 = scalar_lea.hbm %s8081_s7, %s5533_s13 }
  0x1e   : > { %5548 = vmatpush.msra.mxu3 %v474_v7  ;;  %v434_v11 = vld [vmem:[%s5958_s9 + $0x2e0] sm:$0xff]  ;;  %5387 = vmatmul.msk.f32.vlgmr.msra.gmra.mxu0 %vm480_vm0, %v326_v8  ;;  %v435_v15 = vld [vmem:[%s5958_s9 + $0x2e8] sm:$0xff]  ;;  %v436_v19 = vld [vmem:[%s5958_s9 + $0x2f0] sm:$0xff]  ;;  %s7270_s20 = scalar_lea.vmem [#allocation4], %s5382_s19  ;;  %s5263_s18 = sshll.u32 %s5259_s16, 4  ;;  %s5264_s18 = int_to_ptr.hbm [resolvable:$true] %s5263_s18 }
  0x1f   : > { %5423 = vmatmul.msk.f32.vlgmr.msra.gmra.mxu1 %vm480_vm0, %v362_v9  ;;  %5459 = vmatmul.msk.f32.vlgmr.msra.gmra.mxu2 %vm480_vm0, %v398_v10  ;;  %v329_v20 = vld [vmem:[%s5952_s22 + $0x18] sm:$0xff]  ;;  %v330_v24 = vld [vmem:[%s5952_s22 + $0x20] sm:$0xff]  ;;  %v331_v28 = vld [vmem:[%s5952_s22 + $0x28] sm:$0xff]  ;;  %s5233_s21 = scalar_lea.sflag [#allocation5], %s7267_s8 }
  0x20   : > { %5495 = vmatmul.msk.f32.vlgmr.msra.gmra.mxu3 %vm480_vm0, %v434_v11  ;;  %990 = vmatpush.msrb.mxu0 %v477_v1  ;;  %v365_v21 = vld [vmem:[%s5958_s9 + $0xb8] sm:$0xff]  ;;  %v366_v25 = vld [vmem:[%s5958_s9 + $0xc0] sm:$0xff]  ;;  %v367_v29 = vld [vmem:[%s5958_s9 + $0xc8] sm:$0xff] }
  0x21   : > { %v401_v22 = vld [vmem:[%s5958_s9 + $0x1d8] sm:$0xff]  ;;  %v402_v26 = vld [vmem:[%s5958_s9 + $0x1e0] sm:$0xff]  ;;  %v403_v30 = vld [vmem:[%s5958_s9 + $0x1e8] sm:$0xff] }
  0x22   : > { %991 = vmatpush.msrb.mxu0 %v476_v3  ;;  %v437_v23 = vld [vmem:[%s5958_s9 + $0x2f8] sm:$0xff]  ;;  %v438_v27 = vld [vmem:[%s5958_s9 + $0x300] sm:$0xff]  ;;  %v439_v31 = vld [vmem:[%s5958_s9 + $0x308] sm:$0xff] }
  0x23   : > { %v332_v32 = vld [vmem:[%s5952_s22 + $0x30] sm:$0xff]  ;;  %v333_v36 = vld [vmem:[%s5952_s22 + $0x38] sm:$0xff]  ;;  %v334_v40 = vld [vmem:[%s5952_s22 + $0x40] sm:$0xff] }
  0x24   : > { %992 = vmatpush.msrb.mxu0 %v475_v5  ;;  %v368_v33 = vld [vmem:[%s5958_s9 + $0xd0] sm:$0xff]  ;;  %v369_v37 = vld [vmem:[%s5958_s9 + $0xd8] sm:$0xff]  ;;  %v370_v41 = vld [vmem:[%s5958_s9 + $0xe0] sm:$0xff] }
  0x25   : > { %v404_v34 = vld [vmem:[%s5958_s9 + $0x1f0] sm:$0xff]  ;;  %v405_v38 = vld [vmem:[%s5958_s9 + $0x1f8] sm:$0xff]  ;;  %v406_v42 = vld [vmem:[%s5958_s9 + $0x200] sm:$0xff] }
  0x26   : > { %5388 = vmatmul.msk.f32.gmra.mxu0 %vm480_vm0, %v327_v12  ;;  %v440_v35 = vld [vmem:[%s5958_s9 + $0x310] sm:$0xff]  ;;  %v441_v39 = vld [vmem:[%s5958_s9 + $0x318] sm:$0xff]  ;;  %v442_v43 = vld [vmem:[%s5958_s9 + $0x320] sm:$0xff] }
  0x27   : > { %5424 = vmatmul.msk.f32.gmra.mxu1 %vm480_vm0, %v363_v13  ;;  %5460 = vmatmul.msk.f32.gmra.mxu2 %vm480_vm0, %v399_v14  ;;  %v335_v44 = vld [vmem:[%s5952_s22 + $0x48] sm:$0xff]  ;;  %v336_v48 = vld [vmem:[%s5952_s22 + $0x50] sm:$0xff]  ;;  %v337_v52 = vld [vmem:[%s5952_s22 + $0x58] sm:$0xff] }
  0x28   : > { %5496 = vmatmul.msk.f32.gmra.mxu3 %vm480_vm0, %v435_v15  ;;  %993 = vmatpush.msrb.mxu0 %v474_v7  ;;  %v371_v45 = vld [vmem:[%s5958_s9 + $0xe8] sm:$0xff]  ;;  %v372_v49 = vld [vmem:[%s5958_s9 + $0xf0] sm:$0xff]  ;;  %v373_v53 = vld [vmem:[%s5958_s9 + $0xf8] sm:$0xff] }
  0x29   : > { %v407_v46 = vld [vmem:[%s5958_s9 + $0x208] sm:$0xff]  ;;  %v408_v50 = vld [vmem:[%s5958_s9 + $0x210] sm:$0xff]  ;;  %v409_v54 = vld [vmem:[%s5958_s9 + $0x218] sm:$0xff] }
  0x2a   : > { %v443_v47 = vld [vmem:[%s5958_s9 + $0x328] sm:$0xff]  ;;  %v444_v51 = vld [vmem:[%s5958_s9 + $0x330] sm:$0xff]  ;;  %v445_v55 = vld [vmem:[%s5958_s9 + $0x338] sm:$0xff] }
  0x2b   : > { %v338_v56 = vld [vmem:[%s5952_s22 + $0x60] sm:$0xff]  ;;  %v339_v60 = vld [vmem:[%s5952_s22 + $0x68] sm:$0xff]  ;;  %v340_v0 = vld [vmem:[%s5952_s22 + $0x70] sm:$0xff] }
  0x2c   : > { %v374_v57 = vld [vmem:[%s5958_s9 + $0x100] sm:$0xff]  ;;  %v375_v61 = vld [vmem:[%s5958_s9 + $0x108] sm:$0xff]  ;;  %v376_v1 = vld [vmem:[%s5958_s9 + $0x110] sm:$0xff] }
  0x2d   : > { %v410_v58 = vld [vmem:[%s5958_s9 + $0x220] sm:$0xff]  ;;  %v411_v62 = vld [vmem:[%s5958_s9 + $0x228] sm:$0xff]  ;;  %v412_v2 = vld [vmem:[%s5958_s9 + $0x230] sm:$0xff] }
  0x2e   : > { %5389 = vmatmul.msk.f32.gmra.mxu0 %vm480_vm0, %v328_v16  ;;  %v446_v59 = vld [vmem:[%s5958_s9 + $0x340] sm:$0xff]  ;;  %v447_v63 = vld [vmem:[%s5958_s9 + $0x348] sm:$0xff]  ;;  %v448_v3 = vld [vmem:[%s5958_s9 + $0x350] sm:$0xff] }
  0x2f   : > { %5425 = vmatmul.msk.f32.gmra.mxu1 %vm480_vm0, %v364_v17  ;;  %5461 = vmatmul.msk.f32.gmra.mxu2 %vm480_vm0, %v400_v18  ;;  %v341_v4 = vld [vmem:[%s5952_s22 + $0x78] sm:$0xff]  ;;  %v342_v10 = vld [vmem:[%s5958_s9] sm:$0xff]  ;;  %v343_v18 = vld [vmem:[%s5958_s9 + $0x8] sm:$0xff]  ;;  %s313_s22 = scalar_lea.vmem %s8074_s0, %s7088_s17  ;;  %s5261_s17 = sshll.u32 %s7270_s20, 4  ;;  %s5262_s17 = int_to_ptr.vmem [resolvable:$true] %s5261_s17 }
  0x30   : > { %5497 = vmatmul.msk.f32.gmra.mxu3 %vm480_vm0, %v436_v19  ;;  %v377_v5 = vld [vmem:[%s5958_s9 + $0x118] sm:$0xff]  ;;  %v378_v11 = vld [vmem:[%s5958_s9 + $0x120] sm:$0xff]  ;;  %v379_v19 = vld [vmem:[%s5958_s9 + $0x128] sm:$0xff] }
  0x31   : > { %v413_v6 = vld [vmem:[%s5958_s9 + $0x238] sm:$0xff]  ;;  %v414_v12 = vld [vmem:[%s5958_s9 + $0x240] sm:$0xff] }
  0x32   : > { %v449_v7 = vld [vmem:[%s5958_s9 + $0x358] sm:$0xff]  ;;  %v450_v13 = vld [vmem:[%s5958_s9 + $0x360] sm:$0xff] }
  0x36   : > { %5390 = vmatmul.msk.f32.gmra.mxu0 %vm480_vm0, %v329_v20  ;;  %v415_v20 = vld [vmem:[%s5958_s9 + $0x248] sm:$0xff] }
  0x37   : > { %5426 = vmatmul.msk.f32.gmra.mxu1 %vm480_vm0, %v365_v21  ;;  %5462 = vmatmul.msk.f32.gmra.mxu2 %vm480_vm0, %v401_v22  ;;  %v451_v21 = vld [vmem:[%s5958_s9 + $0x368] sm:$0xff] }
  0x38   : > { %5498 = vmatmul.msk.f32.gmra.mxu3 %vm480_vm0, %v437_v23 }
  0x3e   : > { %5391 = vmatmul.msk.f32.gmra.mxu0 %vm480_vm0, %v330_v24 }
  0x3f   : > { %5427 = vmatmul.msk.f32.gmra.mxu1 %vm480_vm0, %v366_v25  ;;  %5463 = vmatmul.msk.f32.gmra.mxu2 %vm480_vm0, %v402_v26  ;;  %v344_v26 = vld [vmem:[%s5958_s9 + $0x10] sm:$0xff] }
  0x40   : > { %5499 = vmatmul.msk.f32.gmra.mxu3 %vm480_vm0, %v438_v27  ;;  %v380_v27 = vld [vmem:[%s5958_s9 + $0x130] sm:$0xff] }
  0x46   : > { %5392 = vmatmul.msk.f32.gmra.mxu0 %vm480_vm0, %v331_v28 }
  0x47   : > { %5428 = vmatmul.msk.f32.gmra.mxu1 %vm480_vm0, %v367_v29  ;;  %5464 = vmatmul.msk.f32.gmra.mxu2 %vm480_vm0, %v403_v30  ;;  %v416_v29 = vld [vmem:[%s5958_s9 + $0x250] sm:$0xff] }
  0x48   : > { %5500 = vmatmul.msk.f32.gmra.mxu3 %vm480_vm0, %v439_v31  ;;  %v452_v30 = vld [vmem:[%s5958_s9 + $0x370] sm:$0xff] }
  0x4e   : > { %5393 = vmatmul.msk.f32.gmra.mxu0 %vm480_vm0, %v332_v32 }
  0x4f   : > { %5429 = vmatmul.msk.f32.gmra.mxu1 %vm480_vm0, %v368_v33  ;;  %5465 = vmatmul.msk.f32.gmra.mxu2 %vm480_vm0, %v404_v34 }
  0x50   : > { %5501 = vmatmul.msk.f32.gmra.mxu3 %vm480_vm0, %v440_v35 }
  0x56   : > { %5394 = vmatmul.msk.f32.gmra.mxu0 %vm480_vm0, %v333_v36 }
  0x57   : > { %5430 = vmatmul.msk.f32.gmra.mxu1 %vm480_vm0, %v369_v37  ;;  %5466 = vmatmul.msk.f32.gmra.mxu2 %vm480_vm0, %v405_v38  ;;  %v6132_v38 = vld [vmem:[%s8079_s5] ss:$0 sm:$0xff] }
  0x58   : > { %5502 = vmatmul.msk.f32.gmra.mxu3 %vm480_vm0, %v441_v39 }
  0x5e   : > { %5395 = vmatmul.msk.f32.gmra.mxu0 %vm480_vm0, %v334_v40 }
  0x5f   : > { %5431 = vmatmul.msk.f32.gmra.mxu1 %vm480_vm0, %v370_v41  ;;  %5467 = vmatmul.msk.f32.gmra.mxu2 %vm480_vm0, %v406_v42 }
  0x60   : > { %5503 = vmatmul.msk.f32.gmra.mxu3 %vm480_vm0, %v442_v43 }
  0x66   : > { %5396 = vmatmul.msk.f32.gmra.mxu0 %vm480_vm0, %v335_v44 }
  0x67   : > { %5432 = vmatmul.msk.f32.gmra.mxu1 %vm480_vm0, %v371_v45  ;;  %5468 = vmatmul.msk.f32.gmra.mxu2 %vm480_vm0, %v407_v46 }
  0x68   : > { %5504 = vmatmul.msk.f32.gmra.mxu3 %vm480_vm0, %v443_v47 }
  0x6e   : > { %5397 = vmatmul.msk.f32.gmra.mxu0 %vm480_vm0, %v336_v48 }
  0x6f   : > { %5433 = vmatmul.msk.f32.gmra.mxu1 %vm480_vm0, %v372_v49  ;;  %5469 = vmatmul.msk.f32.gmra.mxu2 %vm480_vm0, %v408_v50  ;;  %v345_v49 = vld [vmem:[%s5958_s9 + $0x18] sm:$0xff] }
  0x70   : > { %5505 = vmatmul.msk.f32.gmra.mxu3 %vm480_vm0, %v444_v51  ;;  %v381_v50 = vld [vmem:[%s5958_s9 + $0x138] sm:$0xff] }
  0x76   : > { %5398 = vmatmul.msk.f32.gmra.mxu0 %vm480_vm0, %v337_v52  ;;  %v417_v52 = vld [vmem:[%s5958_s9 + $0x258] sm:$0xff] }
  0x77   : > { %5434 = vmatmul.msk.f32.gmra.mxu1 %vm480_vm0, %v373_v53  ;;  %5470 = vmatmul.msk.f32.gmra.mxu2 %vm480_vm0, %v409_v54  ;;  %v453_v53 = vld [vmem:[%s5958_s9 + $0x378] sm:$0xff] }
  0x78   : > { %5506 = vmatmul.msk.f32.gmra.mxu3 %vm480_vm0, %v445_v55 }
  0x7e   : > { %5399 = vmatmul.msk.f32.gmra.mxu0 %vm480_vm0, %v338_v56 }
  0x7f   : > { %5435 = vmatmul.msk.f32.gmra.mxu1 %vm480_vm0, %v374_v57  ;;  %5471 = vmatmul.msk.f32.gmra.mxu2 %vm480_vm0, %v410_v58 }
  0x80   : > { %5507 = vmatmul.msk.f32.gmra.mxu3 %vm480_vm0, %v446_v59 }
  0x86   : > { %5400 = vmatmul.msk.f32.gmra.mxu0 %vm480_vm0, %v339_v60 }
  0x87   : > { %5436 = vmatmul.msk.f32.gmra.mxu1 %vm480_vm0, %v375_v61  ;;  %5472 = vmatmul.msk.f32.gmra.mxu2 %vm480_vm0, %v411_v62 }
  0x88   : > { %5508 = vmatmul.msk.f32.gmra.mxu3 %vm480_vm0, %v447_v63 }
  0x8e   : > { %5401 = vmatmul.msk.f32.gmra.mxu0 %vm480_vm0, %v340_v0 }
  0x8f   : > { %5437 = vmatmul.msk.f32.gmra.mxu1 %vm480_vm0, %v376_v1  ;;  %5473 = vmatmul.msk.f32.gmra.mxu2 %vm480_vm0, %v412_v2  ;;  %v346_v2 = vld [vmem:[%s5958_s9 + $0x20] sm:$0xff] }
  0x90   : > { %5509 = vmatmul.msk.f32.gmra.mxu3 %vm480_vm0, %v448_v3  ;;  %v382_v3 = vld [vmem:[%s5958_s9 + $0x140] sm:$0xff] }
  0x96   : > { %5402 = vmatmul.msk.f32.gmra.mxu0 %vm480_vm0, %v341_v4 }
  0x97   : > { %5438 = vmatmul.msk.f32.gmra.mxu1 %vm480_vm0, %v377_v5  ;;  %5474 = vmatmul.msk.f32.gmra.mxu2 %vm480_vm0, %v413_v6  ;;  %v418_v5 = vld [vmem:[%s5958_s9 + $0x260] sm:$0xff] }
  0x98   : > { %5510 = vmatmul.msk.f32.gmra.mxu3 %vm480_vm0, %v449_v7  ;;  %v454_v6 = vld [vmem:[%s5958_s9 + $0x380] sm:$0xff] }
  0x9b   : > { %v6087_v8 = vpop.f32.mrf.mxu0 }
  0x9c   : > { %v1055_v9 = vpop.f32.mrf.mxu1 }
  0x9e   : > { %5403 = vmatmul.msk.f32.vlgmr.msrb.gmra.mxu0 %vm480_vm0, %v342_v10 }
  0x9f   : > { %5439 = vmatmul.msk.f32.gmra.mxu1 %vm480_vm0, %v378_v11  ;;  %5475 = vmatmul.msk.f32.gmra.mxu2 %vm480_vm0, %v414_v12 }
  0xa0   : > { %5511 = vmatmul.msk.f32.gmra.mxu3 %vm480_vm0, %v450_v13 }
  0xa2   : > { %v6097_v14 = vpop.f32.mrf.mxu2 }
  0xa3   : > { %v6099_v15 = vpop.f32.mrf.mxu3  ;;  %v6101_v16 = vpop.f32.mrf.mxu0 }
  0xa4   : > { %v1058_v17 = vpop.f32.mrf.mxu1 }
  0xa6   : > { %5404 = vmatmul.msk.f32.gmra.mxu0 %vm480_vm0, %v343_v18 }
  0xa7   : > { %5440 = vmatmul.msk.f32.gmra.mxu1 %vm480_vm0, %v379_v19  ;;  %5476 = vmatmul.msk.f32.gmra.mxu2 %vm480_vm0, %v415_v20 }
  0xa8   : > { %5512 = vmatmul.msk.f32.gmra.mxu3 %vm480_vm0, %v451_v21  ;;  %v347_v21 = vld [vmem:[%s5958_s9 + $0x28] sm:$0xff] }
  0xaa   : > { %v6111_v22 = vpop.f32.mrf.mxu2 }
  0xab   : > { %v6113_v23 = vpop.f32.mrf.mxu3  ;;  %v6115_v24 = vpop.f32.mrf.mxu0 }
  0xac   : > { %v1061_v25 = vpop.f32.mrf.mxu1  ;;  %v1414_v28 = vrot.slane %v6115_v24, 6  ;;  %v1413_v31 = vrot.slane %v6115_v24, 5  ;;  %v1412_v32 = vrot.slane %v6115_v24, 4  ;;  %v1415_v34 = vrot.slane %v6115_v24, 7 }
  0xae   : > { %v1529_v33 = vperm.slane %v1414_v28, 0  ;;  %5405 = vmatmul.msk.f32.gmra.mxu0 %vm480_vm0, %v344_v26  ;;  %v1528_v35 = vperm.slane %v1413_v31, 0  ;;  %v1527_v36 = vperm.slane %v1412_v32, 0  ;;  %v1530_v44 = vperm.slane %v1415_v34, 0  ;;  %v419_v28 = vld [vmem:[%s5958_s9 + $0x268] sm:$0xff] }
  0xaf   : > { %5441 = vmatmul.msk.f32.gmra.mxu1 %vm480_vm0, %v380_v27  ;;  %5477 = vmatmul.msk.f32.gmra.mxu2 %vm480_vm0, %v416_v29  ;;  %v455_v29 = vld [vmem:[%s5958_s9 + $0x388] sm:$0xff] }
  0xb0   : > { %5513 = vmatmul.msk.f32.gmra.mxu3 %vm480_vm0, %v452_v30  ;;  %v1785_v37 = vadd.f32 %v1529_v33, %v1061_v25  ;;  %v1784_v39 = vadd.f32 %v1528_v35, %v1058_v17  ;;  %v1783_v40 = vadd.f32 %v1527_v36, %v1055_v9  ;;  %v383_v25 = vld [vmem:[%s5958_s9 + $0x148] sm:$0xff] }
  0xb2   : > { %v1913_v41 = vmax.f32 %v1785_v37, 0.0  ;;  %v6134_v42 = vpop.f32.mrf.mxu2  ;;  %v1912_v45 = vmax.f32 %v1784_v39, 0.0  ;;  %v1911_v46 = vmax.f32 %v1783_v40, 0.0  ;;  %v348_v39 = vld [vmem:[%s5958_s9 + $0x30] sm:$0xff] }
  0xb3   : > { %v6136_v43 = vpop.f32.mrf.mxu3  ;;  %v6138_v47 = vpop.f32.mrf.mxu0  ;;  %v384_v40 = vld [vmem:[%s5958_s9 + $0x150] sm:$0xff] }
  0xb4   : > { %v1064_v48 = vpop.f32.mrf.mxu1  ;;  %v2044_v54 = vmul.f32 %v6132_v38, %v1913_v41  ;;  %v2043_v55 = vmul.f32 %v6132_v38, %v1912_v45  ;;  %v2042_v56 = vmul.f32 %v6132_v38, %v1911_v46  ;;  %v1531_v63 = vperm.slane %v6138_v47, 0  ;;  %v456_v45 = vld [vmem:[%s5958_s9 + $0x390] sm:$0xff] }
  0xb5   : > { %v1786_v51 = vadd.f32 %v1530_v44, %v1064_v48  ;;  %v1416_v10 = vrot.slane %v6138_v47, 1  ;;  %v1417_v31 = vrot.slane %v6138_v47, 2  ;;  %v420_v44 = vld [vmem:[%s5958_s9 + $0x270] sm:$0xff] }
  0xb6   : > { %5406 = vmatmul.msk.f32.gmra.mxu0 %vm480_vm0, %v345_v49  ;;  %v2217_v57 = vsel %vm2150_vm1, %v2044_v54, 0.0  ;;  %v2214_v58 = vsel %vm2150_vm1, %v2043_v55, 0.0  ;;  %v2211_v59 = vsel %vm2150_vm1, %v2042_v56, 0.0  ;;  %v1418_v49 = vrot.slane %v6138_v47, 3  ;;  %v349_v56 = vld [vmem:[%s5958_s9 + $0x38] sm:$0xff] }
  0xb7   : > { %5442 = vmatmul.msk.f32.gmra.mxu1 %vm480_vm0, %v381_v50  ;;  %5478 = vmatmul.msk.f32.gmra.mxu2 %vm480_vm0, %v417_v52  ;;  %v1914_v60 = vmax.f32 %v1786_v51, 0.0  ;;  %v1532_v17 = vperm.slane %v1416_v10, 0  ;;  %v1533_v34 = vperm.slane %v1417_v31, 0 }
  0xb8   : > { %5514 = vmatmul.msk.f32.gmra.mxu3 %vm480_vm0, %v453_v53  ;;  %2218 = vadd.xlane.f32.xlu1 %v2217_v57  ;;  %v1534_v52 = vperm.slane %v1418_v49, 0  ;;  %v385_v57 = vld [vmem:[%s5958_s9 + $0x158] sm:$0xff]  ;;  %v1419_v49 = vrot.slane %v6138_v47, 4 }
  0xb9   : > { %2215 = vadd.xlane.f32.xlu0 %v2214_v58  ;;  %2212 = vadd.xlane.f32.xlu2 %v2211_v59  ;;  %v2045_v7 = vmul.f32 %v6132_v38, %v1914_v60  ;;  %v421_v59 = vld [vmem:[%s5958_s9 + $0x278] sm:$0xff] }
  0xba   : > { %v6154_v61 = vpop.f32.mrf.mxu2  ;;  %v457_v60 = vld [vmem:[%s5958_s9 + $0x398] sm:$0xff] }
  0xbb   : > { %v6156_v62 = vpop.f32.mrf.mxu3  ;;  %v6159_v0 = vpop.f32.mrf.mxu0  ;;  %v2220_v11 = vsel %vm2150_vm1, %v2045_v7, 0.0 }
  0xbc   : > { %v1067_v1 = vpop.f32.mrf.mxu1 }
  0xbd   : > { %v1787_v4 = vadd.f32 %v1531_v63, %v1067_v1 }
  0xbe   : > { %5407 = vmatmul.msk.f32.gmra.mxu0 %vm480_vm0, %v346_v2 }
  0xbf   : > { %v1915_v9 = vmax.f32 %v1787_v4, 0.0  ;;  %5443 = vmatmul.msk.f32.gmra.mxu1 %vm480_vm0, %v382_v3  ;;  %5479 = vmatmul.msk.f32.gmra.mxu2 %vm480_vm0, %v418_v5 }
  0xc0   : > { %5515 = vmatmul.msk.f32.gmra.mxu3 %vm480_vm0, %v454_v6 }
  0xc1   : > { %v2046_v12 = vmul.f32 %v6132_v38, %v1915_v9  ;;  %2221 = vadd.xlane.f32.xlu2 %v2220_v11 }
  0xc2   : > { %v6173_v13 = vpop.f32.mrf.mxu2 }
  0xc3   : > { %v2223_v18 = vsel %vm2150_vm1, %v2046_v12, 0.0  ;;  %v6176_v20 = vpop.f32.mrf.mxu0  ;;  %v6180_v26 = vpop.f32.mrf.mxu3 }
  0xc4   : > { %v1070_v19 = vpop.f32.mrf.mxu1  ;;  %2224 = vadd.xlane.f32.xlu0 %v2223_v18 }
  0xc5   : > { %v1788_v27 = vadd.f32 %v1532_v17, %v1070_v19 }
  0xc6   : > { %5408 = vmatmul.msk.f32.gmra.mxu0 %vm480_vm0, %v347_v21 }
  0xc7   : > { %v1916_v30 = vmax.f32 %v1788_v27, 0.0  ;;  %5444 = vmatmul.msk.f32.gmra.mxu1 %vm480_vm0, %v383_v25  ;;  %5480 = vmatmul.msk.f32.gmra.mxu2 %vm480_vm0, %v419_v28 }
  0xc8   : > { %5516 = vmatmul.msk.f32.gmra.mxu3 %vm480_vm0, %v455_v29 }
  0xc9   : > { %v2047_v32 = vmul.f32 %v6132_v38, %v1916_v30 }
  0xca   : > { %v6190_v33 = vpop.f32.mrf.mxu2 }
  0xcb   : > { %v2226_v35 = vsel %vm2150_vm1, %v2047_v32, 0.0  ;;  %v6193_v37 = vpop.f32.mrf.mxu0  ;;  %v6199_v46 = vpop.f32.mrf.mxu3 }
  0xcc   : > { %v1073_v36 = vpop.f32.mrf.mxu1  ;;  %2227 = vadd.xlane.f32.xlu1 %v2226_v35 }
  0xcd   : > { %v1789_v41 = vadd.f32 %v1533_v34, %v1073_v36  ;;  %v386_v36 = vld [vmem:[%s5958_s9 + $0x160] sm:$0xff] }
  0xce   : > { %5409 = vmatmul.msk.f32.gmra.mxu0 %vm480_vm0, %v348_v39 }
  0xcf   : > { %v1917_v48 = vmax.f32 %v1789_v41, 0.0  ;;  %5445 = vmatmul.msk.f32.gmra.mxu1 %vm480_vm0, %v384_v40  ;;  %5481 = vmatmul.msk.f32.gmra.mxu2 %vm480_vm0, %v420_v44  ;;  %v422_v41 = vld [vmem:[%s5958_s9 + $0x280] sm:$0xff] }
  0xd0   : > { %5517 = vmatmul.msk.f32.gmra.mxu3 %vm480_vm0, %v456_v45 }
  0xd1   : > { %v2048_v50 = vmul.f32 %v6132_v38, %v1917_v48 }
  0xd2   : > { %v6207_v51 = vpop.f32.mrf.mxu2 }
  0xd3   : > { %v2229_v53 = vsel %vm2150_vm1, %v2048_v50, 0.0  ;;  %v6210_v55 = vpop.f32.mrf.mxu0  ;;  %v6227_v17 = vpop.f32.mrf.mxu3 }
  0xd4   : > { %v1076_v54 = vpop.f32.mrf.mxu1  ;;  %2230 = vadd.xlane.f32.xlu2 %v2229_v53  ;;  %v1563_v63 = vperm.slane %v6210_v55, 0  ;;  %v1445_v1 = vrot.slane %v6210_v55, 2  ;;  %v1444_v2 = vrot.slane %v6210_v55, 1  ;;  %v1446_v3 = vrot.slane %v6210_v55, 3 }
  0xd5   : > { %v1790_v58 = vadd.f32 %v1534_v52, %v1076_v54  ;;  %v1448_v4 = vrot.slane %v6210_v55, 5  ;;  %v1447_v9 = vrot.slane %v6210_v55, 4  ;;  %v1450_v54 = vrot.slane %v6210_v55, 7 }
  0xd6   : > { %5410 = vmatmul.msk.f32.gmra.mxu0 %vm480_vm0, %v349_v56  ;;  %v1819_v6 = vadd.f32 %v1563_v63, %v6097_v14  ;;  %v1565_v7 = vperm.slane %v1445_v1, 0  ;;  %v1564_v10 = vperm.slane %v1444_v2, 0  ;;  %v1566_v11 = vperm.slane %v1446_v3, 0 }
  0xd7   : > { %v1918_v5 = vmax.f32 %v1790_v58, 0.0  ;;  %5446 = vmatmul.msk.f32.gmra.mxu1 %vm480_vm0, %v385_v57  ;;  %5482 = vmatmul.msk.f32.gmra.mxu2 %vm480_vm0, %v421_v59  ;;  %v1568_v12 = vperm.slane %v1448_v4, 0  ;;  %v1449_v14 = vrot.slane %v6210_v55, 6  ;;  %v1567_v32 = vperm.slane %v1447_v9, 0  ;;  %v351_v4 = vld [vmem:[%s5958_s9 + $0x48] sm:$0xff] }
  0xd8   : > { %5518 = vmatmul.msk.f32.gmra.mxu3 %vm480_vm0, %v457_v60  ;;  %v1947_v19 = vmax.f32 %v1819_v6, 0.0  ;;  %v1821_v21 = vadd.f32 %v1565_v7, %v6134_v42  ;;  %v1820_v25 = vadd.f32 %v1564_v10, %v6111_v22  ;;  %v1822_v27 = vadd.f32 %v1566_v11, %v6154_v61  ;;  %v350_v42 = vld [vmem:[%s5958_s9 + $0x40] sm:$0xff]  ;;  %v423_v9 = vld [vmem:[%s5958_s9 + $0x288] sm:$0xff] }
  0xd9   : > { %v2049_v18 = vmul.f32 %v6132_v38, %v1918_v5  ;;  %v1824_v40 = vadd.f32 %v1568_v12, %v6190_v33  ;;  %v458_v61 = vld [vmem:[%s5958_s9 + $0x3a0] sm:$0xff]  ;;  %v1569_v48 = vperm.slane %v1449_v14, 0  ;;  %v1823_v33 = vadd.f32 %v1567_v32, %v6173_v13  ;;  %v387_v5 = vld [vmem:[%s5958_s9 + $0x168] sm:$0xff] }
  0xda   : > { %v1184_v28 = vpop.f32.mrf.mxu2  ;;  %v2078_v30 = vmul.f32 %v6132_v38, %v1947_v19  ;;  %v1949_v31 = vmax.f32 %v1821_v21, 0.0  ;;  %v1948_v39 = vmax.f32 %v1820_v25, 0.0  ;;  %v1950_v45 = vmax.f32 %v1822_v27, 0.0  ;;  %v459_v10 = vld [vmem:[%s5958_s9 + $0x3a8] sm:$0xff] }
  0xdb   : > { %v2232_v29 = vsel %vm2150_vm1, %v2049_v18, 0.0  ;;  %v6236_v35 = vpop.f32.mrf.mxu0  ;;  %v1952_v53 = vmax.f32 %v1824_v40, 0.0  ;;  %v1825_v57 = vadd.f32 %v1569_v48, %v6207_v51  ;;  %v1535_v58 = vperm.slane %v1419_v49, 0  ;;  %v6257_v13 = vpop.f32.mrf.mxu3  ;;  %v424_v48 = vld [vmem:[%s5958_s9 + $0x290] sm:$0xff] }
  0xdc   : > { %v1079_v34 = vpop.f32.mrf.mxu1  ;;  %2233 = vadd.xlane.f32.xlu0 %v2232_v29  ;;  %v2319_v22 = vsel %vm2150_vm1, %v2078_v30, 0.0  ;;  %v2080_v44 = vmul.f32 %v6132_v38, %v1949_v31  ;;  %v2079_v52 = vmul.f32 %v6132_v38, %v1948_v39  ;;  %v2081_v56 = vmul.f32 %v6132_v38, %v1950_v45  ;;  %v460_v49 = vld [vmem:[%s5958_s9 + $0x3b0] sm:$0xff] }
  0xdd   : > { %2320 = vadd.xlane.f32.xlu2 %v2319_v22  ;;  %v1420_v59 = vrot.slane %v6138_v47, 5  ;;  %v1951_v1 = vmax.f32 %v1823_v33, 0.0  ;;  %v1791_v2 = vadd.f32 %v1535_v58, %v1079_v34  ;;  %v2083_v51 = vmul.f32 %v6132_v38, %v1952_v53  ;;  %v352_v22 = vld [vmem:[%s5958_s9 + $0x50] sm:$0xff] }
  0xde   : > { %5411 = vmatmul.msk.f32.gmra.mxu0 %vm480_vm0, %v350_v42  ;;  %v2325_v50 = vsel %vm2150_vm1, %v2080_v44, 0.0  ;;  %v2322_v63 = vsel %vm2150_vm1, %v2079_v52, 0.0  ;;  %v1570_v6 = vperm.slane %v1450_v54, 0  ;;  %v2328_v7 = vsel %vm2150_vm1, %v2081_v56, 0.0 }
  0xdf   : > { %5447 = vmatmul.msk.f32.gmra.mxu1 %vm480_vm0, %v386_v36  ;;  %5483 = vmatmul.msk.f32.gmra.mxu2 %vm480_vm0, %v422_v41  ;;  %v1953_v11 = vmax.f32 %v1825_v57, 0.0  ;;  %v1536_v12 = vperm.slane %v1420_v59, 0  ;;  %v2082_v19 = vmul.f32 %v6132_v38, %v1951_v1  ;;  %v1919_v21 = vmax.f32 %v1791_v2, 0.0  ;;  %v388_v41 = vld [vmem:[%s5958_s9 + $0x170] sm:$0xff] }
  0xe0   : > { %5519 = vmatmul.msk.f32.gmra.mxu3 %vm480_vm0, %v458_v61  ;;  %2326 = vadd.xlane.f32.xlu1 %v2325_v50  ;;  %v1826_v18 = vadd.f32 %v1570_v6, %v1184_v28  ;;  %v1571_v14 = vperm.slane %v6236_v35, 0  ;;  %v2334_v27 = vsel %vm2150_vm1, %v2083_v51, 0.0  ;;  %v1421_v28 = vrot.slane %v6138_v47, 6  ;;  %v353_v6 = vld [vmem:[%s5958_s9 + $0x58] sm:$0xff] }
  0xe1   : > { %v2084_v29 = vmul.f32 %v6132_v38, %v1953_v11  ;;  %v1451_v32 = vrot.slane %v6236_v35, 1  ;;  %v2331_v34 = vsel %vm2150_vm1, %v2082_v19, 0.0  ;;  %v2050_v61 = vmul.f32 %v6132_v38, %v1919_v21 }
  0xe2   : > { %v1187_v60 = vpop.f32.mrf.mxu2  ;;  %v1954_v30 = vmax.f32 %v1826_v18, 0.0  ;;  %v1537_v44 = vperm.slane %v1421_v28, 0  ;;  %v1422_v53 = vrot.slane %v6138_v47, 7  ;;  %v1452_v58 = vrot.slane %v6236_v35, 2  ;;  %v461_v18 = vld [vmem:[%s5958_s9 + $0x3b8] sm:$0xff] }
  0xe3   : > { %v6260_v55 = vpop.f32.mrf.mxu0  ;;  %v1827_v42 = vadd.f32 %v1571_v14, %v1187_v60  ;;  %v2337_v45 = vsel %vm2150_vm1, %v2084_v29, 0.0  ;;  %v6287_v50 = vpop.f32.mrf.mxu3  ;;  %v1572_v52 = vperm.slane %v1451_v32, 0  ;;  %v2235_v57 = vsel %vm2150_vm1, %v2050_v61, 0.0  ;;  %v354_v61 = vld [vmem:[%s5958_s9 + $0x60] sm:$0xff] }
  0xe4   : > { %v1082_v3 = vpop.f32.mrf.mxu1  ;;  %2323 = vadd.xlane.f32.xlu0 %v2322_v63  ;;  %v2085_v54 = vmul.f32 %v6132_v38, %v1954_v30  ;;  %v1538_v1 = vperm.slane %v1422_v53, 0 }
  0xe5   : > { %2329 = vadd.xlane.f32.xlu2 %v2328_v7  ;;  %v1792_v25 = vadd.f32 %v1536_v12, %v1082_v3  ;;  %v1955_v56 = vmax.f32 %v1827_v42, 0.0  ;;  %v1573_v3 = vperm.slane %v1452_v58, 0  ;;  %v389_v7 = vld [vmem:[%s5958_s9 + $0x178] sm:$0xff] }
  0xe6   : > { %5412 = vmatmul.msk.f32.gmra.mxu0 %vm480_vm0, %v351_v4  ;;  %v2340_v2 = vsel %vm2150_vm1, %v2085_v54, 0.0  ;;  %v425_v12 = vld [vmem:[%s5958_s9 + $0x298] sm:$0xff] }
  0xe7   : > { %5448 = vmatmul.msk.f32.gmra.mxu1 %vm480_vm0, %v387_v5  ;;  %5484 = vmatmul.msk.f32.gmra.mxu2 %vm480_vm0, %v423_v9  ;;  %v1920_v36 = vmax.f32 %v1792_v25, 0.0  ;;  %v2086_v9 = vmul.f32 %v6132_v38, %v1955_v56 }
  0xe8   : > { %5520 = vmatmul.msk.f32.gmra.mxu3 %vm480_vm0, %v459_v10  ;;  %2335 = vadd.xlane.f32.xlu1 %v2334_v27 }
  0xe9   : > { %v2051_v59 = vmul.f32 %v6132_v38, %v1920_v36 }
  0xea   : > { %v1190_v31 = vpop.f32.mrf.mxu2 }
  0xeb   : > { %v6279_v40 = vpop.f32.mrf.mxu0  ;;  %v1828_v60 = vadd.f32 %v1572_v52, %v1190_v31  ;;  %v2238_v51 = vsel %vm2150_vm1, %v2051_v59, 0.0  ;;  %v6313_v29 = vpop.f32.mrf.mxu3  ;;  %v2343_v31 = vsel %vm2150_vm1, %v2086_v9, 0.0  ;;  %v426_v52 = vld [vmem:[%s5958_s9 + $0x2a0] sm:$0xff] }
  0xec   : > { %v1085_v39 = vpop.f32.mrf.mxu1  ;;  %2332 = vadd.xlane.f32.xlu0 %v2331_v34 }
  0xed   : > { %2338 = vadd.xlane.f32.xlu2 %v2337_v45  ;;  %v1793_v33 = vadd.f32 %v1537_v44, %v1085_v39  ;;  %v1956_v10 = vmax.f32 %v1828_v60, 0.0  ;;  %v390_v44 = vld [vmem:[%s5958_s9 + $0x180] sm:$0xff] }
  0xee   : > { %5413 = vmatmul.msk.f32.gmra.mxu0 %vm480_vm0, %v352_v22 }
  0xef   : > { %5449 = vmatmul.msk.f32.gmra.mxu1 %vm480_vm0, %v388_v41  ;;  %5485 = vmatmul.msk.f32.gmra.mxu2 %vm480_vm0, %v424_v48  ;;  %v1921_v47 = vmax.f32 %v1793_v33, 0.0  ;;  %v2087_v34 = vmul.f32 %v6132_v38, %v1956_v10  ;;  %v462_v33 = vld [vmem:[%s5958_s9 + $0x3c0] sm:$0xff] }
  0xf0   : > { %5521 = vmatmul.msk.f32.gmra.mxu3 %vm480_vm0, %v460_v49  ;;  %2236 = vadd.xlane.f32.xlu1 %v2235_v57 }
  0xf1   : > { %v2052_v25 = vmul.f32 %v6132_v38, %v1921_v47  ;;  %v2346_v49 = vsel %vm2150_vm1, %v2087_v34, 0.0 }
  0xf2   : > { %v1193_v63 = vpop.f32.mrf.mxu2 }
  0xf3   : > { %v6299_v5 = vpop.f32.mrf.mxu0  ;;  %v1829_v14 = vadd.f32 %v1573_v3, %v1193_v63  ;;  %v2241_v22 = vsel %vm2150_vm1, %v2052_v25, 0.0 }
  0xf4   : > { %v1088_v4 = vpop.f32.mrf.mxu1  ;;  %2341 = vadd.xlane.f32.xlu0 %v2340_v2  ;;  %v1475_v19 = vrot.slane %v6299_v5, 4  ;;  %v1477_v21 = vrot.slane %v6299_v5, 6  ;;  %v1476_v28 = vrot.slane %v6299_v5, 5  ;;  %v1478_v36 = vrot.slane %v6299_v5, 7 }
  0xf5   : > { %v1794_v11 = vadd.f32 %v1538_v1, %v1088_v4  ;;  %2239 = vadd.xlane.f32.xlu2 %v2238_v51  ;;  %v1957_v39 = vmax.f32 %v1829_v14, 0.0 }
  0xf6   : > { %5414 = vmatmul.msk.f32.gmra.mxu0 %vm480_vm0, %v353_v6  ;;  %v1599_v27 = vperm.slane %v1475_v19, 0  ;;  %v1601_v32 = vperm.slane %v1477_v21, 0  ;;  %v1600_v41 = vperm.slane %v1476_v28, 0  ;;  %v1602_v54 = vperm.slane %v1478_v36, 0  ;;  %v355_v6 = vld [vmem:[%s5958_s9 + $0x68] sm:$0xff] }
  0xf7   : > { %5450 = vmatmul.msk.f32.gmra.mxu1 %vm480_vm0, %v389_v7  ;;  %v1922_v30 = vmax.f32 %v1794_v11, 0.0  ;;  %5486 = vmatmul.msk.f32.gmra.mxu2 %vm480_vm0, %v425_v12  ;;  %v2088_v56 = vmul.f32 %v6132_v38, %v1957_v39  ;;  %v391_v7 = vld [vmem:[%s5958_s9 + $0x188] sm:$0xff]  ;;  %v1539_v21 = vperm.slane %v6159_v0, 0 }
  0xf8   : > { %5522 = vmatmul.msk.f32.gmra.mxu3 %vm480_vm0, %v461_v18  ;;  %2344 = vadd.xlane.f32.xlu1 %v2343_v31  ;;  %v1855_v42 = vadd.f32 %v1599_v27, %v6099_v15  ;;  %v1857_v48 = vadd.f32 %v1601_v32, %v6136_v43  ;;  %v1453_v15 = vrot.slane %v6236_v35, 3  ;;  %v1856_v57 = vadd.f32 %v1600_v41, %v6113_v23  ;;  %v6341_v23 = vpop.f32.mrf.mxu3  ;;  %v427_v12 = vld [vmem:[%s5958_s9 + $0x2a8] sm:$0xff]  ;;  %v356_v41 = vld [vmem:[%s5958_s9 + $0x70] sm:$0xff] }
  0xf9   : > { %v2053_v45 = vmul.f32 %v6132_v38, %v1922_v30  ;;  %v1858_v63 = vadd.f32 %v1602_v54, %v6156_v62  ;;  %v2349_v2 = vsel %vm2150_vm1, %v2088_v56, 0.0  ;;  %v463_v62 = vld [vmem:[%s5958_s9 + $0x3c8] sm:$0xff] }
  0xfa   : > { %v1983_v53 = vmax.f32 %v1855_v42, 0.0  ;;  %v1985_v59 = vmax.f32 %v1857_v48, 0.0  ;;  %v1196_v60 = vpop.f32.mrf.mxu2  ;;  %v1574_v1 = vperm.slane %v1453_v15, 0  ;;  %v1984_v3 = vmax.f32 %v1856_v57, 0.0 }
  0xfb   : > { %v6334_v58 = vpop.f32.mrf.mxu0  ;;  %v2244_v43 = vsel %vm2150_vm1, %v2053_v45, 0.0  ;;  %v1986_v18 = vmax.f32 %v1858_v63, 0.0 }
  0xfc   : > { %2242 = vadd.xlane.f32.xlu0 %v2241_v22  ;;  %v2114_v47 = vmul.f32 %v6132_v38, %v1983_v53  ;;  %v1603_v4 = vperm.slane %v6334_v58, 0  ;;  %v1830_v51 = vadd.f32 %v1574_v1, %v1196_v60  ;;  %v2116_v9 = vmul.f32 %v6132_v38, %v1985_v59  ;;  %v1091_v19 = vpop.f32.mrf.mxu1  ;;  %v464_v53 = vld [vmem:[%s5958_s9 + $0x3d0] sm:$0xff] }
  0xfd   : > { %2347 = vadd.xlane.f32.xlu2 %v2346_v49  ;;  %v1479_v10 = vrot.slane %v6334_v58, 1  ;;  %v2115_v14 = vmul.f32 %v6132_v38, %v1984_v3  ;;  %v1481_v27 = vrot.slane %v6334_v58, 3  ;;  %v1795_v32 = vadd.f32 %v1539_v21, %v1091_v19 }
  0xfe   : > { %5415 = vmatmul.msk.f32.gmra.mxu0 %vm480_vm0, %v354_v61  ;;  %v2427_v11 = vsel %vm2150_vm1, %v2114_v47, 0.0  ;;  %v1859_v25 = vadd.f32 %v1603_v4, %v6180_v26  ;;  %v1958_v28 = vmax.f32 %v1830_v51, 0.0  ;;  %v2433_v30 = vsel %vm2150_vm1, %v2116_v9, 0.0  ;;  %v392_v61 = vld [vmem:[%s5958_s9 + $0x190] sm:$0xff]  ;;  %v357_v51 = vld [vmem:[%s5958_s9 + $0x78] sm:$0xff] }
  0xff   : > { %5451 = vmatmul.msk.f32.gmra.mxu1 %vm480_vm0, %v390_v44  ;;  %5487 = vmatmul.msk.f32.gmra.mxu2 %vm480_vm0, %v426_v52  ;;  %v1604_v31 = vperm.slane %v1479_v10, 0  ;;  %v2117_v34 = vmul.f32 %v6132_v38, %v1986_v18  ;;  %v1480_v26 = vrot.slane %v6334_v58, 2  ;;  %v2430_v42 = vsel %vm2150_vm1, %v2115_v14, 0.0 }
 0x100   : > { %5523 = vmatmul.msk.f32.gmra.mxu3 %vm480_vm0, %v462_v33  ;;  %2245 = vadd.xlane.f32.xlu1 %v2244_v43  ;;  %v1987_v36 = vmax.f32 %v1859_v25, 0.0  ;;  %v1606_v39 = vperm.slane %v1481_v27, 0  ;;  %v6364_v22 = vpop.f32.mrf.mxu3  ;;  %v2089_v44 = vmul.f32 %v6132_v38, %v1958_v28  ;;  %v1482_v48 = vrot.slane %v6334_v58, 4  ;;  %v428_v33 = vld [vmem:[%s5958_s9 + $0x2b0] sm:$0xff] }
 0x101   : > { %v1860_v45 = vadd.f32 %v1604_v31, %v6199_v46  ;;  %v1923_v49 = vmax.f32 %v1795_v32, 0.0  ;;  %v2436_v52 = vsel %vm2150_vm1, %v2117_v34, 0.0  ;;  %v1605_v54 = vperm.slane %v1480_v26, 0 }
 0x102   : > { %v6374_v15 = vpop.f32.mrf.mxu2  ;;  %v2118_v56 = vmul.f32 %v6132_v38, %v1987_v36  ;;  %v1862_v57 = vadd.f32 %v1606_v39, %v6257_v13  ;;  %v1484_v46 = vrot.slane %v6334_v58, 6  ;;  %v2352_v43 = vsel %vm2150_vm1, %v2089_v44, 0.0  ;;  %v358_v36 = vld [vmem:[%s5958_s9 + $0x80] sm:$0xff] }
 0x103   : > { %v1988_v59 = vmax.f32 %v1860_v45, 0.0  ;;  %v1607_v60 = vperm.slane %v1482_v48, 0  ;;  %v2054_v63 = vmul.f32 %v6132_v38, %v1923_v49  ;;  %v1861_v13 = vadd.f32 %v1605_v54, %v6227_v17  ;;  %v429_v17 = vld [vmem:[%s5958_s9 + $0x2b8] sm:$0xff]  ;;  %v394_v39 = vld [vmem:[%s5958_s9 + $0x1a0] sm:$0xff] }
 0x104   : > { %2350 = vadd.xlane.f32.xlu0 %v2349_v2  ;;  %v1094_v47 = vpop.f32.mrf.mxu1  ;;  %v1483_v1 = vrot.slane %v6334_v58, 5  ;;  %v2439_v2 = vsel %vm2150_vm1, %v2118_v56, 0.0  ;;  %v1990_v3 = vmax.f32 %v1862_v57, 0.0  ;;  %v1609_v4 = vperm.slane %v1484_v46, 0  ;;  %v430_v48 = vld [vmem:[%s5958_s9 + $0x2c0] sm:$0xff] }
 0x105   : > { %2428 = vadd.xlane.f32.xlu2 %v2427_v11  ;;  %v1863_v9 = vadd.f32 %v1607_v60, %v6287_v50  ;;  %v1485_v10 = vrot.slane %v6334_v58, 7  ;;  %v6393_v11 = vpop.f32.mrf.mxu0  ;;  %v1989_v18 = vmax.f32 %v1861_v13, 0.0  ;;  %v1454_v32 = vrot.slane %v6236_v35, 4  ;;  %v466_v49 = vld [vmem:[%s5958_s9 + $0x3e0] sm:$0xff] }
 0x106   : > { %5416 = vmatmul.msk.f32.gmra.mxu0 %vm480_vm0, %v355_v6  ;;  %v393_v6 = vld [vmem:[%s5958_s9 + $0x198] sm:$0xff]  ;;  %v1608_v19 = vperm.slane %v1483_v1, 0  ;;  %v2121_v14 = vmul.f32 %v6132_v38, %v1990_v3  ;;  %v1865_v50 = vadd.f32 %v1609_v4, %v6341_v23  ;;  %v359_v3 = vld [vmem:[%s5958_s9 + $0x88] sm:$0xff] }
 0x107   : > { %5452 = vmatmul.msk.f32.gmra.mxu1 %vm480_vm0, %v391_v7  ;;  %5488 = vmatmul.msk.f32.gmra.mxu2 %vm480_vm0, %v427_v12  ;;  %v2119_v7 = vmul.f32 %v6132_v38, %v1988_v59  ;;  %v2247_v12 = vsel %vm2150_vm1, %v2054_v63, 0.0  ;;  %v1991_v27 = vmax.f32 %v1863_v9, 0.0  ;;  %v1610_v28 = vperm.slane %v1485_v10, 0  ;;  %v395_v4 = vld [vmem:[%s5958_s9 + $0x1a8] sm:$0xff] }
 0x108   : > { %5524 = vmatmul.msk.f32.gmra.mxu3 %vm480_vm0, %v463_v62  ;;  %2434 = vadd.xlane.f32.xlu1 %v2433_v30  ;;  %v465_v62 = vld [vmem:[%s5958_s9 + $0x3d8] sm:$0xff]  ;;  %v6398_v21 = vpop.f32.mrf.mxu3  ;;  %v1423_v30 = vrot.slane %v6159_v0, 1  ;;  %v2120_v31 = vmul.f32 %v6132_v38, %v1989_v18  ;;  %v1864_v23 = vadd.f32 %v1608_v19, %v6313_v29  ;;  %v2448_v26 = vsel %vm2150_vm1, %v2121_v14, 0.0  ;;  %v431_v10 = vld [vmem:[%s5958_s9 + $0x2c8] sm:$0xff] }
 0x109   : > { %v2442_v25 = vsel %vm2150_vm1, %v2119_v7, 0.0  ;;  %v1424_v29 = vrot.slane %v6159_v0, 2  ;;  %v1455_v59 = vrot.slane %v6236_v35, 5  ;;  %v1486_v19 = vrot.slane %v6393_v11, 1 }
 0x10a   : > { %v1202_v58 = vpop.f32.mrf.mxu2  ;;  %v1540_v44 = vperm.slane %v1423_v30, 0  ;;  %v2445_v45 = vsel %vm2150_vm1, %v2120_v31, 0.0 }
 0x10c   : > { %2431 = vadd.xlane.f32.xlu0 %v2430_v42  ;;  %v1097_v34 = vpop.f32.mrf.mxu1  ;;  %v1993_v42 = vmax.f32 %v1865_v50, 0.0 }
 0x10d   : > { %2437 = vadd.xlane.f32.xlu2 %v2436_v52  ;;  %v1992_v52 = vmax.f32 %v1864_v23, 0.0  ;;  %v6420_v54 = vpop.f32.mrf.mxu0 }
 0x10e   : > { %5417 = vmatmul.msk.f32.gmra.mxu0 %vm480_vm0, %v356_v41  ;;  %v2122_v41 = vmul.f32 %v6132_v38, %v1991_v27  ;;  %v2124_v56 = vmul.f32 %v6132_v38, %v1993_v42 }
 0x10f   : > { %5453 = vmatmul.msk.f32.gmra.mxu1 %vm480_vm0, %v392_v61  ;;  %5489 = vmatmul.msk.f32.gmra.mxu2 %vm480_vm0, %v428_v33  ;;  %v1866_v61 = vadd.f32 %v1610_v28, %v6364_v22  ;;  %v1575_v33 = vperm.slane %v1454_v32, 0  ;;  %v2123_v60 = vmul.f32 %v6132_v38, %v1992_v52  ;;  %v1612_v32 = vperm.slane %v1486_v19, 0 }
 0x110   : > { %5525 = vmatmul.msk.f32.gmra.mxu3 %vm480_vm0, %v464_v53  ;;  %2353 = vadd.xlane.f32.xlu1 %v2352_v43  ;;  %v1796_v53 = vadd.f32 %v1540_v44, %v1094_v47  ;;  %v1310_v22 = vpop.f32.mrf.mxu3  ;;  %v2451_v57 = vsel %vm2150_vm1, %v2122_v41, 0.0  ;;  %v1541_v47 = vperm.slane %v1424_v29, 0  ;;  %v2457_v1 = vsel %vm2150_vm1, %v2124_v56, 0.0  ;;  %v360_v41 = vld [vmem:[%s5958_s9 + $0x90] sm:$0xff] }
 0x111   : > { %v1994_v46 = vmax.f32 %v1866_v61, 0.0  ;;  %v1831_v43 = vadd.f32 %v1575_v33, %v6374_v15  ;;  %v1576_v15 = vperm.slane %v1455_v59, 0  ;;  %v2454_v9 = vsel %vm2150_vm1, %v2123_v60, 0.0  ;;  %v396_v61 = vld [vmem:[%s5958_s9 + $0x1b0] sm:$0xff] }
 0x112   : > { %v1205_v63 = vpop.f32.mrf.mxu2  ;;  %v1924_v13 = vmax.f32 %v1796_v53, 0.0  ;;  %v1868_v52 = vadd.f32 %v1612_v32, %v1310_v22  ;;  %v1457_v60 = vrot.slane %v6236_v35, 7 }
 0x113   : > { %v1832_v18 = vadd.f32 %v1576_v15, %v1202_v58 }
 0x114   : > { %2440 = vadd.xlane.f32.xlu0 %v2439_v2  ;;  %v1797_v2 = vadd.f32 %v1541_v47, %v1097_v34  ;;  %v1100_v7 = vpop.f32.mrf.mxu1  ;;  %v2055_v14 = vmul.f32 %v6132_v38, %v1924_v13  ;;  %v1425_v34 = vrot.slane %v6159_v0, 3  ;;  %v1996_v59 = vmax.f32 %v1868_v52, 0.0 }
 0x115   : > { %2248 = vadd.xlane.f32.xlu2 %v2247_v12  ;;  %v467_v12 = vld [vmem:[%s5958_s9 + $0x3e8] sm:$0xff]  ;;  %v6447_v27 = vpop.f32.mrf.mxu0  ;;  %v1960_v23 = vmax.f32 %v1832_v18, 0.0 }
 0x116   : > { %5418 = vmatmul.msk.f32.gmra.mxu0 %vm480_vm0, %v357_v51  ;;  %v2125_v51 = vmul.f32 %v6132_v38, %v1994_v46  ;;  %v1925_v50 = vmax.f32 %v1797_v2, 0.0  ;;  %v1542_v29 = vperm.slane %v1425_v34, 0  ;;  %v397_v2 = vld [vmem:[%s5958_s9 + $0x1b8] sm:$0xff]  ;;  %v2127_v18 = vmul.f32 %v6132_v38, %v1996_v59 }
 0x117   : > { %5454 = vmatmul.msk.f32.gmra.mxu1 %vm480_vm0, %v393_v6  ;;  %5490 = vmatmul.msk.f32.gmra.mxu2 %vm480_vm0, %v429_v17  ;;  %v1959_v6 = vmax.f32 %v1831_v43, 0.0  ;;  %v1611_v17 = vperm.slane %v6393_v11, 0  ;;  %v2091_v53 = vmul.f32 %v6132_v38, %v1960_v23  ;;  %v1428_v59 = vrot.slane %v6159_v0, 6 }
 0x118   : > { %5526 = vmatmul.msk.f32.gmra.mxu3 %vm480_vm0, %v465_v62  ;;  %2443 = vadd.xlane.f32.xlu1 %v2442_v25  ;;  %v1456_v62 = vrot.slane %v6236_v35, 6  ;;  %v2460_v25 = vsel %vm2150_vm1, %v2125_v51, 0.0  ;;  %v1313_v31 = vpop.f32.mrf.mxu3  ;;  %v2056_v44 = vmul.f32 %v6132_v38, %v1925_v50  ;;  %v1798_v43 = vadd.f32 %v1542_v29, %v1100_v7  ;;  %v433_v7 = vld [vmem:[%s5958_s9 + $0x2d8] sm:$0xff] }
 0x119   : > { %v2090_v58 = vmul.f32 %v6132_v38, %v1959_v6  ;;  %v1867_v28 = vadd.f32 %v1611_v17, %v6398_v21  ;;  %v1507_v6 = vperm.slane %v6087_v8, 0  ;;  %v1427_v35 = vrot.slane %v6159_v0, 5 }
 0x11a   : > { %v1577_v30 = vperm.slane %v1456_v62, 0  ;;  %v2253_v46 = vsel %vm2150_vm1, %v2056_v44, 0.0  ;;  %v1926_v51 = vmax.f32 %v1798_v43, 0.0  ;;  %v2466_v32 = vsel %vm2150_vm1, %v2127_v18, 0.0 }
 0x11b   : > { %v2355_v21 = vsel %vm2150_vm1, %v2090_v58, 0.0  ;;  %v1426_v58 = vrot.slane %v6159_v0, 4 }
 0x11c   : > { %2449 = vadd.xlane.f32.xlu0 %v2448_v26  ;;  %v2250_v26 = vsel %vm2150_vm1, %v2055_v14, 0.0  ;;  %v1833_v42 = vadd.f32 %v1577_v30, %v1205_v63  ;;  %v1103_v33 = vpop.f32.mrf.mxu1  ;;  %v2358_v63 = vsel %vm2150_vm1, %v2091_v53, 0.0  ;;  %v2057_v30 = vmul.f32 %v6132_v38, %v1926_v51 }
 0x11d   : > { %2446 = vadd.xlane.f32.xlu2 %v2445_v45  ;;  %v432_v45 = vld [vmem:[%s5958_s9 + $0x2d0] sm:$0xff]  ;;  %v995_v47 = vpop.f32.mrf.mxu0 }
 0x11e   : > { %5419 = vmatmul.msk.f32.gmra.mxu0 %vm480_vm0, %v358_v36  ;;  %v1487_v36 = vrot.slane %v6393_v11, 2  ;;  %v1961_v56 = vmax.f32 %v1833_v42, 0.0  ;;  %v1763_v17 = vadd.f32 %v1507_v6, %v995_v47 }
 0x11f   : > { %5455 = vmatmul.msk.f32.gmra.mxu1 %vm480_vm0, %v394_v39  ;;  %5491 = vmatmul.msk.f32.gmra.mxu2 %vm480_vm0, %v430_v48  ;;  %v1208_v39 = vpop.f32.mrf.mxu2  ;;  %v468_v48 = vld [vmem:[%s5958_s9 + $0x3f0] sm:$0xff] }
 0x120   : > { %5527 = vmatmul.msk.f32.gmra.mxu3 %vm480_vm0, %v466_v49  ;;  %2452 = vadd.xlane.f32.xlu1 %v2451_v57  ;;  %v1995_v49 = vmax.f32 %v1867_v28, 0.0  ;;  %v1613_v57 = vperm.slane %v1487_v36, 0  ;;  %v1891_v23 = vmax.f32 %v1763_v17, 0.0 }
 0x122   : > { %v2126_v22 = vmul.f32 %v6132_v38, %v1995_v49  ;;  %v1869_v13 = vadd.f32 %v1613_v57, %v1313_v31  ;;  %v1544_v31 = vperm.slane %v1427_v35, 0  ;;  %v6499_v49 = vld [vmem:[%s8079_s5] ss:$0 sm:$0xff] }
 0x124   : > { %2458 = vadd.xlane.f32.xlu0 %v2457_v1  ;;  %v1316_v1 = vpop.f32.mrf.mxu3  ;;  %v2463_v15 = vsel %vm2150_vm1, %v2126_v22, 0.0  ;;  %v1997_v19 = vmax.f32 %v1869_v13, 0.0  ;;  %v1106_v28 = vpop.f32.mrf.mxu1 }
 0x125   : > { %2455 = vadd.xlane.f32.xlu2 %v2454_v9  ;;  %v469_v9 = vld [vmem:[%s5958_s9 + $0x3f8] sm:$0xff]  ;;  %v1800_v34 = vadd.f32 %v1544_v31, %v1106_v28 }
 0x126   : > { %5420 = vmatmul.msk.f32.gmra.mxu0 %vm480_vm0, %v359_v3  ;;  %v361_v3 = vld [vmem:[%s5958_s9 + $0x98] sm:$0xff] }
 0x127   : > { %5456 = vmatmul.msk.f32.gmra.mxu1 %vm480_vm0, %v395_v4  ;;  %5492 = vmatmul.msk.f32.gmra.mxu2 %vm480_vm0, %v431_v10  ;;  %v2092_v4 = vmul.f32 %v6132_v38, %v1961_v56  ;;  %v1211_v10 = vpop.f32.mrf.mxu2  ;;  %v1928_v52 = vmax.f32 %v1800_v34, 0.0 }
 0x128   : > { %5528 = vmatmul.msk.f32.gmra.mxu3 %vm480_vm0, %v467_v12  ;;  %2461 = vadd.xlane.f32.xlu1 %v2460_v25  ;;  %v1578_v12 = vperm.slane %v1457_v60, 0  ;;  %v1488_v25 = vrot.slane %v6393_v11, 3 }
 0x129   : > { %v2361_v14 = vsel %vm2150_vm1, %v2092_v4, 0.0  ;;  %v2059_v13 = vmul.f32 %v6499_v49, %v1928_v52  ;;  %v8082_v4 = vlaneseq }
 0x12a   : > { %v1834_v50 = vadd.f32 %v1578_v12, %v1208_v39  ;;  %v1614_v36 = vperm.slane %v1488_v25, 0  ;;  %v6490_v39 = vpop.f32.mrf.mxu0 }
 0x12b   : > { %v6503_v57 = vpop.xlane.xlu1 %2218 }
 0x12c   : > { %2251 = vadd.xlane.f32.xlu0 %v2250_v26  ;;  %v6477_v62 = vpop.xlane.xlu2 %2212  ;;  %v2128_v26 = vmul.f32 %v6132_v38, %v1997_v19  ;;  %v1962_v42 = vmax.f32 %v1834_v50, 0.0  ;;  %v1319_v44 = vpop.f32.mrf.mxu3  ;;  %v2022_v38 = vmul.f32 %v6499_v49, %v1891_v23  ;;  %v1870_v56 = vadd.f32 %v1614_v36, %v1316_v1 }
 0x12d   : > { %2356 = vadd.xlane.f32.xlu2 %v2355_v21  ;;  %v1458_v21 = vrot.slane %v6260_v55, 1  ;;  %v1109_v51 = vpop.f32.mrf.mxu1  ;;  %v1459_v23 = vrot.slane %v6260_v55, 2 }
 0x12e   : > { %5421 = vmatmul.msk.f32.gmra.mxu0 %vm480_vm0, %v360_v41  ;;  %v1543_v41 = vperm.slane %v1426_v58, 0  ;;  %v2469_v53 = vsel %vm2150_vm1, %v2128_v26, 0.0  ;;  %v2151_v60 = vsel %vm2150_vm1, %v2022_v38, 0.0  ;;  %v1998_v1 = vmax.f32 %v1870_v56, 0.0 }
 0x12f   : > { %5457 = vmatmul.msk.f32.gmra.mxu1 %vm480_vm0, %v396_v61  ;;  %5493 = vmatmul.msk.f32.gmra.mxu2 %vm480_vm0, %v432_v45  ;;  %v2256_v61 = vsel %vm2150_vm1, %v2057_v30, 0.0  ;;  %v1214_v29 = vpop.f32.mrf.mxu2  ;;  %v1580_v43 = vperm.slane %v1458_v21, 0  ;;  %v1396_v21 = vrot.slane %v6087_v8, 2 }
 0x130   : > { %5529 = vmatmul.msk.f32.gmra.mxu3 %vm480_vm0, %v468_v48  ;;  %2254 = vadd.xlane.f32.xlu1 %v2253_v46  ;;  %v1799_v45 = vadd.f32 %v1543_v41, %v1103_v33  ;;  %v6494_v48 = vpop.xlane.xlu0 %2215  ;;  %v2093_v33 = vmul.f32 %v6499_v49, %v1962_v42  ;;  %v2129_v28 = vmul.f32 %v6499_v49, %v1998_v1 }
 0x131   : > { %v1836_v47 = vadd.f32 %v1580_v43, %v1214_v29  ;;  %v1581_v29 = vperm.slane %v1459_v23, 0 }
 0x132   : > { %v1927_v22 = vmax.f32 %v1799_v45, 0.0 }
 0x133   : > { %v1964_v17 = vmax.f32 %v1836_v47, 0.0 }
 0x134   : > { %2359 = vadd.xlane.f32.xlu0 %v2358_v63  ;;  %v6505_v46 = vpop.xlane.xlu2 %2221  ;;  %v1490_v63 = vrot.slane %v6393_v11, 5  ;;  %v2058_v12 = vmul.f32 %v6499_v49, %v1927_v22  ;;  %v1322_v18 = vpop.f32.mrf.mxu3 }
 0x135   : > { %2464 = vadd.xlane.f32.xlu2 %v2463_v15  ;;  %v1489_v15 = vrot.slane %v6393_v11, 4  ;;  %v2095_v42 = vmul.f32 %v6499_v49, %v1964_v17 }
 0x136   : > { %5422 = vmatmul.msk.f32.gmra.mxu0 %vm480_vm0, %v361_v3  ;;  %v2364_v3 = vsel %vm2150_vm1, %v2093_v33, 0.0  ;;  %v1616_v19 = vperm.slane %v1490_v63, 0 }
 0x137   : > { %5458 = vmatmul.msk.f32.gmra.mxu1 %vm480_vm0, %v397_v2  ;;  %5494 = vmatmul.msk.f32.gmra.mxu2 %vm480_vm0, %v433_v7  ;;  %v1579_v2 = vperm.slane %v6260_v55, 0  ;;  %v1545_v7 = vperm.slane %v1428_v59, 0  ;;  %v1615_v31 = vperm.slane %v1489_v15, 0  ;;  %v1217_v45 = vpop.f32.mrf.mxu2  ;;  %v2370_v59 = vsel %vm2150_vm1, %v2095_v42, 0.0 }
 0x138   : > { %5530 = vmatmul.msk.f32.gmra.mxu3 %vm480_vm0, %v469_v9  ;;  %2362 = vadd.xlane.f32.xlu1 %v2361_v14  ;;  %v1001_v9 = vpop.f32.mrf.mxu0  ;;  %v2225_v35 = vpop.xlane.xlu0 %2224  ;;  %v2262_v14 = vsel %vm2150_vm1, %v2059_v13, 0.0  ;;  %v1872_v34 = vadd.f32 %v1616_v19, %v1322_v18  ;;  %v1837_v47 = vadd.f32 %v1581_v29, %v1217_v45  ;;  %v1398_v45 = vrot.slane %v6087_v8, 4 }
 0x139   : > { %v1835_v6 = vadd.f32 %v1579_v2, %v1211_v10  ;;  %v1801_v50 = vadd.f32 %v1545_v7, %v1109_v51  ;;  %v6519_v10 = vand.u32 127, %v8082_v4  ;;  %v1871_v52 = vadd.f32 %v1615_v31, %v1319_v44 }
 0x13a   : > { %v2000_v33 = vmax.f32 %v1872_v34, 0.0  ;;  %v1509_v2 = vperm.slane %v1396_v21, 0  ;;  %v1965_v18 = vmax.f32 %v1837_v47, 0.0 }
 0x13b   : > { %v1963_v30 = vmax.f32 %v1835_v6, 0.0  ;;  %v1929_v36 = vmax.f32 %v1801_v50, 0.0  ;;  %v2689_v38 = vperm.slane %v2225_v35, %v6519_v10  ;;  %v1999_v51 = vmax.f32 %v1871_v52, 0.0 }
 0x13c   : > { %2467 = vadd.xlane.f32.xlu0 %v2466_v32  ;;  %v2259_v32 = vsel %vm2150_vm1, %v2058_v12, 0.0  ;;  %v1491_v6 = vrot.slane %v6393_v11, 6  ;;  %v1765_v7 = vadd.f32 %v1509_v2, %v1001_v9  ;;  %v2131_v12 = vmul.f32 %v6499_v49, %v2000_v33 }
 0x13d   : > { %2257 = vadd.xlane.f32.xlu2 %v2256_v61  ;;  %v2472_v61 = vsel %vm2150_vm1, %v2129_v28, 0.0  ;;  %v2094_v56 = vmul.f32 %v6499_v49, %v1963_v30  ;;  %v2060_v1 = vmul.f32 %v6499_v49, %v1929_v36  ;;  %v1397_v50 = vrot.slane %v6087_v8, 3  ;;  %v1112_v28 = vpop.f32.mrf.mxu1 }
 0x13e   : > { %v2130_v31 = vmul.f32 %v6499_v49, %v1999_v51  ;;  %v1893_v9 = vmax.f32 %v1765_v7, 0.0 }
 0x13f   : > { %v2228_v25 = vpop.xlane.xlu1 %2227  ;;  %v2367_v15 = vsel %vm2150_vm1, %v2094_v56, 0.0  ;;  %v2265_v19 = vsel %vm2150_vm1, %v2060_v1, 0.0 }
 0x140   : > { %2470 = vadd.xlane.f32.xlu1 %v2469_v53  ;;  %v2690_v26 = vperm.slane %v2228_v25, %v6519_v10  ;;  %v1004_v63 = vpop.f32.mrf.mxu0  ;;  %v2475_v52 = vsel %vm2150_vm1, %v2130_v31, 0.0 }
 0x142   : > { %v2821_v43 = vsel %vm2793_vm2, %v2690_v26, %v2689_v38  ;;  %v1429_v26 = vrot.slane %v6159_v0, 7  ;;  %v2024_v0 = vmul.f32 %v6499_v49, %v1893_v9 }
 0x144   : > { %2152 = vadd.xlane.f32.xlu0 %v2151_v60  ;;  %v1395_v60 = vrot.slane %v6087_v8, 1 }
 0x145   : > { %2365 = vadd.xlane.f32.xlu2 %v2364_v3  ;;  %v1115_v7 = vpop.f32.mrf.mxu1 }
 0x146   : > { %v1508_v17 = vperm.slane %v1395_v60, 0 }
 0x147   : > { %v2231_v58 = vpop.xlane.xlu2 %2230 }
 0x148   : > { %2263 = vadd.xlane.f32.xlu1 %v2262_v14  ;;  %v2691_v41 = vperm.slane %v2231_v58, %v6519_v10  ;;  %v1325_v14 = vpop.f32.mrf.mxu3  ;;  %v1764_v25 = vadd.f32 %v1508_v17, %v6490_v39  ;;  %v1617_v58 = vperm.slane %v1491_v6, 0  ;;  %v1510_v39 = vperm.slane %v1397_v50, 0  ;;  %v1007_v21 = vpop.f32.mrf.mxu0 }
 0x149   : > { %v2157_v6 = vsel %vm2150_vm1, %v2024_v0, 0.0 }
 0x14a   : > { %v2822_v13 = vsel %vm2795_vm3, %v2691_v41, %v2821_v43  ;;  %v1873_v34 = vadd.f32 %v1617_v58, %v1325_v14  ;;  %v2096_v41 = vmul.f32 %v6499_v49, %v1965_v18  ;;  %v1766_v29 = vadd.f32 %v1510_v39, %v1004_v63 }
 0x14b   : > { %v1546_v43 = vperm.slane %v1429_v26, 0  ;;  %v1399_v14 = vrot.slane %v6087_v8, 5 }
 0x14c   : > { %2260 = vadd.xlane.f32.xlu0 %v2259_v32  ;;  %v2478_v32 = vsel %vm2150_vm1, %v2131_v12, 0.0  ;;  %v2001_v33 = vmax.f32 %v1873_v34, 0.0  ;;  %v1894_v2 = vmax.f32 %v1766_v29, 0.0 }
 0x14d   : > { %2473 = vadd.xlane.f32.xlu2 %v2472_v61  ;;  %v1892_v61 = vmax.f32 %v1764_v25, 0.0  ;;  %v1802_v47 = vadd.f32 %v1546_v43, %v1112_v28 }
 0x14e   : > { %v2132_v18 = vmul.f32 %v6499_v49, %v2001_v33  ;;  %v2025_v31 = vmul.f32 %v6499_v49, %v1894_v2 }
 0x14f   : > { %v2234_v53 = vpop.xlane.xlu0 %2233  ;;  %v2023_v1 = vmul.f32 %v6499_v49, %v1892_v61  ;;  %v1930_v25 = vmax.f32 %v1802_v47, 0.0 }
 0x150   : > { %v2692_v22 = vperm.slane %v2234_v53, %v6519_v10  ;;  %2371 = vadd.xlane.f32.xlu1 %v2370_v59  ;;  %v2321_v44 = vpop.xlane.xlu2 %2320  ;;  %v2373_v59 = vsel %vm2150_vm1, %v2096_v41, 0.0  ;;  %v2481_v26 = vsel %vm2150_vm1, %v2132_v18, 0.0  ;;  %v1328_v61 = vpop.f32.mrf.mxu3 }
 0x151   : > { %v2721_v42 = vperm.slane %v2321_v44, %v6519_v10  ;;  %v1511_v44 = vperm.slane %v1398_v45, 0  ;;  %v2154_v58 = vsel %vm2150_vm1, %v2023_v1, 0.0  ;;  %v2061_v45 = vmul.f32 %v6499_v49, %v1930_v25 }
 0x152   : > { %v6537_v3 = vsel %vm2797_vm4, %v2692_v22, %v2822_v13  ;;  %v1220_v13 = vpop.f32.mrf.mxu2 }
 0x153   : > { %v2327_v35 = vpop.xlane.xlu1 %2326 }
 0x154   : > { %2368 = vadd.xlane.f32.xlu0 %v2367_v15  ;;  %v2723_v53 = vperm.slane %v2327_v35, %v6519_v10  ;;  %v1460_v15 = vrot.slane %v6260_v55, 3  ;;  %v1767_v35 = vadd.f32 %v1511_v44, %v1007_v21  ;;  %v2268_v44 = vsel %vm2150_vm1, %v2061_v45, 0.0 }
 0x155   : > { %2266 = vadd.xlane.f32.xlu2 %v2265_v19  ;;  %v1547_v19 = vperm.slane %v6176_v20, 0 }
 0x156   : > { %v1582_v9 = vperm.slane %v1460_v15, 0 }
 0x157   : > { %v2324_v30 = vpop.xlane.xlu0 %2323  ;;  %v1803_v28 = vadd.f32 %v1547_v19, %v1115_v7 }
 0x158   : > { %v2722_v23 = vperm.slane %v2324_v30, %v6519_v10  ;;  %2479 = vadd.xlane.f32.xlu1 %v2478_v32  ;;  %v2330_v36 = vpop.xlane.xlu2 %2329  ;;  %v1010_v32 = vpop.f32.mrf.mxu0  ;;  %v1838_v39 = vadd.f32 %v1582_v9, %v1220_v13  ;;  %v1430_v13 = vrot.slane %v6176_v20, 1 }
 0x159   : > { %v2724_v22 = vperm.slane %v2330_v36, %v6519_v10  ;;  %v1512_v36 = vperm.slane %v1399_v14, 0 }
 0x15a   : > { %v2849_v38 = vsel %vm2793_vm2, %v2722_v23, %v2721_v42  ;;  %v1895_v23 = vmax.f32 %v1767_v35, 0.0  ;;  %v1461_v42 = vrot.slane %v6260_v55, 4  ;;  %v1223_v0 = vpop.f32.mrf.mxu2  ;;  %v1966_v47 = vmax.f32 %v1838_v39, 0.0 }
 0x15b   : > { %v2336_v56 = vpop.xlane.xlu1 %2335  ;;  %v2850_v60 = vsel %vm2795_vm3, %v2723_v53, %v2849_v38  ;;  %v2160_v53 = vsel %vm2150_vm1, %v2025_v31, 0.0  ;;  %v1768_v33 = vadd.f32 %v1512_v36, %v1010_v32  ;;  %v1548_v18 = vperm.slane %v1430_v13, 0  ;;  %v1331_v31 = vpop.f32.mrf.mxu3 }
 0x15c   : > { %2476 = vadd.xlane.f32.xlu0 %v2475_v52  ;;  %v2851_v12 = vsel %vm2797_vm4, %v2724_v22, %v2850_v60  ;;  %v2726_v34 = vperm.slane %v2336_v56, %v6519_v10  ;;  %v1931_v52 = vmax.f32 %v1803_v28, 0.0  ;;  %v1492_v56 = vrot.slane %v6393_v11, 7 }
 0x15d   : > { %2374 = vadd.xlane.f32.xlu2 %v2373_v59  ;;  %v2026_v22 = vmul.f32 %v6499_v49, %v1895_v23  ;;  %v1583_v59 = vperm.slane %v1461_v42, 0  ;;  %v1896_v15 = vmax.f32 %v1768_v33, 0.0 }
 0x15e   : > { %v2062_v11 = vmul.f32 %v6499_v49, %v1931_v52 }
 0x15f   : > { %v2333_v63 = vpop.xlane.xlu0 %2332  ;;  %v1839_v1 = vadd.f32 %v1583_v59, %v1223_v0  ;;  %v2163_v35 = vsel %vm2150_vm1, %v2026_v22, 0.0 }
 0x160   : > { %v2725_v51 = vperm.slane %v2333_v63, %v6519_v10  ;;  %2158 = vadd.xlane.f32.xlu1 %v2157_v6  ;;  %v2339_v17 = vpop.xlane.xlu2 %2338  ;;  %v1118_v6 = vpop.f32.mrf.mxu1  ;;  %v2271_v28 = vsel %vm2150_vm1, %v2062_v11, 0.0 }
 0x161   : > { %v2727_v41 = vperm.slane %v2339_v17, %v6519_v10  ;;  %v1013_v19 = vpop.f32.mrf.mxu0  ;;  %v1967_v25 = vmax.f32 %v1839_v1, 0.0  ;;  %v1804_v9 = vadd.f32 %v1548_v18, %v1118_v6  ;;  %v1493_v6 = vrot.slane %v6420_v54, 1 }
 0x162   : > { %v2852_v50 = vsel %vm2799_vm5, %v2725_v51, %v2851_v12  ;;  %v1618_v51 = vperm.slane %v1492_v56, 0  ;;  %v1226_v52 = vpop.f32.mrf.mxu2  ;;  %v1401_v56 = vrot.slane %v6087_v8, 7 }
 0x163   : > { %v2237_v30 = vpop.xlane.xlu1 %2236  ;;  %v2853_v38 = vsel %vm2801_vm6, %v2726_v34, %v2852_v50  ;;  %v2097_v50 = vmul.f32 %v6499_v49, %v1966_v47  ;;  %v2027_v34 = vmul.f32 %v6499_v49, %v1896_v15 }
 0x164   : > { %2155 = vadd.xlane.f32.xlu0 %v2154_v58  ;;  %v2854_v60 = vsel %vm2803_vm7, %v2727_v41, %v2853_v38  ;;  %v2693_v7 = vperm.slane %v2237_v30, %v6519_v10  ;;  %v1874_v17 = vadd.f32 %v1618_v51, %v1328_v61  ;;  %v1400_v30 = vrot.slane %v6087_v8, 6 }
 0x165   : > { %2482 = vadd.xlane.f32.xlu2 %v2481_v26  ;;  %v1619_v26 = vperm.slane %v6420_v54, 0  ;;  %v1462_v41 = vrot.slane %v6260_v55, 5  ;;  %v2376_v39 = vsel %vm2150_vm1, %v2097_v50, 0.0  ;;  %v1932_v38 = vmax.f32 %v1804_v9, 0.0 }
 0x166   : > { %v2824_v23 = vsel %vm2799_vm5, %v2693_v7, %v6537_v3  ;;  %v2002_v36 = vmax.f32 %v1874_v17, 0.0  ;;  %v2098_v3 = vmul.f32 %v6499_v49, %v1967_v25  ;;  %v1514_v51 = vperm.slane %v1401_v56, 0 }
 0x167   : > { %v2342_v21 = vpop.xlane.xlu0 %2341  ;;  %v1584_v0 = vperm.slane %v1462_v41, 0  ;;  %v2063_v8 = vmul.f32 %v6499_v49, %v1932_v38  ;;  %v1432_v25 = vrot.slane %v6176_v20, 3 }
 0x168   : > { %v2728_v29 = vperm.slane %v2342_v21, %v6519_v10  ;;  %2161 = vadd.xlane.f32.xlu1 %v2160_v53  ;;  %v2240_v43 = vpop.xlane.xlu2 %2239  ;;  %v1875_v21 = vadd.f32 %v1619_v26, %v1331_v31  ;;  %v2166_v53 = vsel %vm2150_vm1, %v2027_v34, 0.0  ;;  %v1121_v33 = vpop.f32.mrf.mxu1  ;;  %v2133_v59 = vmul.f32 %v6499_v49, %v2002_v36 }
 0x169   : > { %v2694_v12 = vperm.slane %v2240_v43, %v6519_v10  ;;  %v2379_v47 = vsel %vm2150_vm1, %v2098_v3, 0.0  ;;  %v1840_v13 = vadd.f32 %v1584_v0, %v1226_v52  ;;  %v1016_v1 = vpop.f32.mrf.mxu0  ;;  %v2274_v50 = vsel %vm2150_vm1, %v2063_v8, 0.0 }
 0x16a   : > { %v6584_v63 = vsel %vm2805_vm8, %v2728_v29, %v2854_v60  ;;  %v1513_v29 = vperm.slane %v1400_v30, 0  ;;  %v2003_v60 = vmax.f32 %v1875_v21, 0.0  ;;  %v2484_v7 = vsel %vm2150_vm1, %v2133_v59, 0.0  ;;  %v1229_v31 = vpop.f32.mrf.mxu2 }
 0x16b   : > { %v6586_v2 = vpop.xlane.xlu1 %2344  ;;  %v2825_v42 = vsel %vm2801_vm6, %v2694_v12, %v2824_v23  ;;  %v1968_v18 = vmax.f32 %v1840_v13, 0.0  ;;  %v1550_v21 = vperm.slane %v1432_v25, 0  ;;  %v1464_v59 = vrot.slane %v6260_v55, 7 }
 0x16c   : > { %2269 = vadd.xlane.f32.xlu0 %v2268_v44  ;;  %v1769_v43 = vadd.f32 %v1513_v29, %v1013_v19  ;;  %v1431_v44 = vrot.slane %v6176_v20, 2  ;;  %v2134_v17 = vmul.f32 %v6499_v49, %v2003_v60  ;;  %v1334_v19 = vpop.f32.mrf.mxu3  ;;  %v1515_v13 = vperm.slane %v6101_v16, 0 }
 0x16d   : > { %2164 = vadd.xlane.f32.xlu2 %v2163_v35  ;;  %v1770_v35 = vadd.f32 %v1514_v51, %v1016_v1 }
 0x16e   : > { %v1897_v15 = vmax.f32 %v1769_v43, 0.0  ;;  %v2487_v34 = vsel %vm2150_vm1, %v2134_v17, 0.0  ;;  %v1586_v17 = vperm.slane %v1464_v59, 0 }
 0x16f   : > { %v2243_v14 = vpop.xlane.xlu0 %2242  ;;  %v1898_v23 = vmax.f32 %v1770_v35, 0.0 }
 0x170   : > { %v2695_v58 = vperm.slane %v2243_v14, %v6519_v10  ;;  %2272 = vadd.xlane.f32.xlu1 %v2271_v28  ;;  %v6598_v32 = vpop.xlane.xlu2 %2347  ;;  %v1549_v14 = vperm.slane %v1431_v44, 0  ;;  %v2028_v30 = vmul.f32 %v6499_v49, %v1897_v15  ;;  %v1124_v36 = vpop.f32.mrf.mxu1 }
 0x171   : > { %v1806_v52 = vadd.f32 %v1550_v21, %v1124_v36 }
 0x172   : > { %v6606_v61 = vsel %vm2803_vm7, %v2695_v58, %v2825_v42  ;;  %v1620_v58 = vperm.slane %v1493_v6, 0  ;;  %v1805_v28 = vadd.f32 %v1549_v14, %v1121_v33  ;;  %v1463_v42 = vrot.slane %v6260_v55, 6  ;;  %v1019_v33 = vpop.f32.mrf.mxu0  ;;  %v1232_v15 = vpop.f32.mrf.mxu2 }
 0x173   : > { %v6608_v45 = vpop.xlane.xlu1 %2245  ;;  %v2169_v38 = vsel %vm2150_vm1, %v2028_v30, 0.0  ;;  %v1934_v8 = vmax.f32 %v1806_v52, 0.0  ;;  %v1494_v6 = vrot.slane %v6420_v54, 2 }
 0x174   : > { %2377 = vadd.xlane.f32.xlu0 %v2376_v39  ;;  %v1876_v26 = vadd.f32 %v1620_v58, %v1334_v19  ;;  %v2099_v39 = vmul.f32 %v6499_v49, %v1968_v18  ;;  %v1933_v3 = vmax.f32 %v1805_v28, 0.0  ;;  %v1585_v0 = vperm.slane %v1463_v42, 0 }
 0x175   : > { %2167 = vadd.xlane.f32.xlu2 %v2166_v53  ;;  %v2029_v53 = vmul.f32 %v6499_v49, %v1898_v23  ;;  %v1433_v19 = vrot.slane %v6176_v20, 4  ;;  %v2065_v58 = vmul.f32 %v6499_v49, %v1934_v8  ;;  %v1621_v28 = vperm.slane %v1494_v6, 0 }
 0x176   : > { %v2004_v56 = vmax.f32 %v1876_v26, 0.0  ;;  %v2382_v43 = vsel %vm2150_vm1, %v2099_v39, 0.0  ;;  %v1841_v60 = vadd.f32 %v1585_v0, %v1229_v31  ;;  %v2064_v1 = vmul.f32 %v6499_v49, %v1933_v3 }
 0x177   : > { %v6613_v22 = vpop.xlane.xlu0 %2350  ;;  %v2172_v51 = vsel %vm2150_vm1, %v2029_v53, 0.0  ;;  %v1551_v42 = vperm.slane %v1433_v19, 0 }
 0x178   : > { %2380 = vadd.xlane.f32.xlu1 %v2379_v47  ;;  %v6618_v11 = vpop.xlane.xlu2 %2428  ;;  %v1337_v47 = vpop.f32.mrf.mxu3  ;;  %v2135_v55 = vmul.f32 %v6499_v49, %v2004_v56  ;;  %v1969_v18 = vmax.f32 %v1841_v60, 0.0  ;;  %v2277_v14 = vsel %vm2150_vm1, %v2064_v1, 0.0  ;;  %v1402_v56 = vrot.slane %v6101_v16, 1 }
 0x179   : > { %8087 = vst [vmem:[#allocation8_spill] sm:$0xff] %v6618_v11  ;;  %v1127_v31 = vpop.f32.mrf.mxu1  ;;  %v1877_v26 = vadd.f32 %v1621_v28, %v1337_v47  ;;  %v1411_v11 = vrot.slane %v6115_v24, 3 }
 0x17a   : > { %v2490_v23 = vsel %vm2150_vm1, %v2135_v55, 0.0  ;;  %v1022_v36 = vpop.f32.mrf.mxu0  ;;  %v2100_v21 = vmul.f32 %v6499_v49, %v1969_v18  ;;  %v1807_v53 = vadd.f32 %v1551_v42, %v1127_v31  ;;  %v1516_v6 = vperm.slane %v1402_v56, 0 }
 0x17b   : > { %v6623_v12 = vpop.xlane.xlu1 %2434  ;;  %v2005_v59 = vmax.f32 %v1877_v26, 0.0  ;;  %v1587_v55 = vperm.slane %v6279_v40, 0  ;;  %v1434_v31 = vrot.slane %v6176_v20, 5  ;;  %v1496_v42 = vrot.slane %v6420_v54, 4 }
 0x17c   : > { %8088 = vst [vmem:[#allocation9_spill] sm:$0xff] %v6623_v12  ;;  %2485 = vadd.xlane.f32.xlu0 %v2484_v7  ;;  %v1771_v7 = vadd.f32 %v1515_v13, %v1019_v33  ;;  %v2385_v60 = vsel %vm2150_vm1, %v2100_v21, 0.0  ;;  %v1935_v8 = vmax.f32 %v1807_v53, 0.0  ;;  %v1772_v18 = vadd.f32 %v1516_v6, %v1022_v36 }
 0x17d   : > { %2275 = vadd.xlane.f32.xlu2 %v2274_v50  ;;  %v1842_v50 = vadd.f32 %v1586_v17, %v1232_v15 }
 0x17e   : > { %v1899_v30 = vmax.f32 %v1771_v7, 0.0  ;;  %v1403_v7 = vrot.slane %v6101_v16, 2  ;;  %v1900_v36 = vmax.f32 %v1772_v18, 0.0 }
 0x17f   : > { %v6628_v9 = vpop.xlane.xlu0 %2431  ;;  %v1970_v3 = vmax.f32 %v1842_v50, 0.0 }
 0x180   : > { %8089 = vst [vmem:[#allocation10_spill] sm:$0xff] %v6628_v9  ;;  %2488 = vadd.xlane.f32.xlu1 %v2487_v34  ;;  %v6633_v41 = vpop.xlane.xlu2 %2437  ;;  %v1495_v34 = vrot.slane %v6420_v54, 3  ;;  %v1340_v52 = vpop.f32.mrf.mxu3  ;;  %v2030_v33 = vmul.f32 %v6499_v49, %v1899_v30  ;;  %v1517_v26 = vperm.slane %v1403_v7, 0 }
 0x181   : > { %8090 = vst [vmem:[#allocation11_spill] sm:$0xff] %v6633_v41  ;;  %v2101_v1 = vmul.f32 %v6499_v49, %v1970_v3  ;;  %v1130_v17 = vpop.f32.mrf.mxu1 }
 0x182   : > { %v2175_v15 = vsel %vm2150_vm1, %v2030_v33, 0.0  ;;  %v1025_v30 = vpop.f32.mrf.mxu0  ;;  %v1552_v33 = vperm.slane %v1434_v31, 0 }
 0x183   : > { %v6637_v29 = vpop.xlane.xlu1 %2353  ;;  %v1773_v3 = vadd.f32 %v1517_v26, %v1025_v30 }
 0x184   : > { %2170 = vadd.xlane.f32.xlu0 %v2169_v38  ;;  %v2280_v38 = vsel %vm2150_vm1, %v2065_v58, 0.0  ;;  %v2388_v58 = vsel %vm2150_vm1, %v2101_v1, 0.0 }
 0x185   : > { %2383 = vadd.xlane.f32.xlu2 %v2382_v43  ;;  %v1622_v43 = vperm.slane %v1495_v34, 0  ;;  %v2066_v34 = vmul.f32 %v6499_v49, %v1935_v8  ;;  %v1901_v6 = vmax.f32 %v1773_v3, 0.0 }
 0x187   : > { %v6643_v44 = vpop.xlane.xlu0 %2440  ;;  %v1878_v47 = vadd.f32 %v1622_v43, %v1340_v52  ;;  %v2283_v43 = vsel %vm2150_vm1, %v2066_v34, 0.0  ;;  %v2032_v26 = vmul.f32 %v6499_v49, %v1901_v6 }
 0x188   : > { %8091 = vst [vmem:[#allocation12_spill] sm:$0xff] %v6643_v44  ;;  %2173 = vadd.xlane.f32.xlu1 %v2172_v51  ;;  %v6648_v35 = vpop.xlane.xlu2 %2248  ;;  %v1235_v51 = vpop.f32.mrf.mxu2 }
 0x189   : > { %v2006_v50 = vmax.f32 %v1878_v47, 0.0  ;;  %v1843_v28 = vadd.f32 %v1587_v55, %v1235_v51  ;;  %v1343_v56 = vpop.f32.mrf.mxu3  ;;  %v1808_v47 = vadd.f32 %v1552_v33, %v1130_v17  ;;  %v2031_v51 = vmul.f32 %v6499_v49, %v1900_v36  ;;  %v1133_v18 = vpop.f32.mrf.mxu1 }
 0x18a   : > { %v1465_v55 = vrot.slane %v6279_v40, 1  ;;  %v1404_v17 = vrot.slane %v6101_v16, 3 }
 0x18b   : > { %v6653_v25 = vpop.xlane.xlu1 %2443  ;;  %v2137_v52 = vmul.f32 %v6499_v49, %v2006_v50  ;;  %v1971_v53 = vmax.f32 %v1843_v28, 0.0  ;;  %v1936_v28 = vmax.f32 %v1808_v47, 0.0  ;;  %v2178_v31 = vsel %vm2150_vm1, %v2031_v51, 0.0 }
 0x18c   : > { %8092 = vst [vmem:[#allocation13_spill] sm:$0xff] %v6653_v25  ;;  %2278 = vadd.xlane.f32.xlu0 %v2277_v14  ;;  %v2136_v14 = vmul.f32 %v6499_v49, %v2005_v59  ;;  %v1435_v59 = vrot.slane %v6176_v20, 6  ;;  %v1588_v36 = vperm.slane %v1465_v55, 0  ;;  %v1518_v33 = vperm.slane %v1404_v17, 0 }
 0x18d   : > { %2491 = vadd.xlane.f32.xlu2 %v2490_v23  ;;  %v2102_v50 = vmul.f32 %v6499_v49, %v1971_v53  ;;  %v2181_v47 = vsel %vm2150_vm1, %v2032_v26, 0.0  ;;  %v1497_v51 = vrot.slane %v6420_v54, 5 }
 0x18e   : > { %v2493_v21 = vsel %vm2150_vm1, %v2136_v14, 0.0 }
 0x18f   : > { %v6658_v39 = vpop.xlane.xlu0 %2449  ;;  %v2391_v3 = vsel %vm2150_vm1, %v2102_v50, 0.0  ;;  %v1436_v50 = vrot.slane %v6176_v20, 7 }
 0x190   : > { %8093 = vst [vmem:[#allocation14_spill] sm:$0xff] %v6658_v39  ;;  %2281 = vadd.xlane.f32.xlu1 %v2280_v38  ;;  %v6663_v0 = vpop.xlane.xlu2 %2446  ;;  %v1238_v1 = vpop.f32.mrf.mxu2 }
 0x191   : > { %8094 = vst [vmem:[#allocation15_spill] sm:$0xff] %v6663_v0  ;;  %v1844_v53 = vadd.f32 %v1588_v36, %v1238_v1  ;;  %v1136_v26 = vpop.f32.mrf.mxu1 }
 0x193   : > { %v6667_v13 = vpop.xlane.xlu1 %2452  ;;  %v1972_v1 = vmax.f32 %v1844_v53, 0.0 }
 0x194   : > { %8095 = vst [vmem:[#allocation16_spill] sm:$0xff] %v6667_v13  ;;  %2386 = vadd.xlane.f32.xlu0 %v2385_v60  ;;  %v1623_v60 = vperm.slane %v1496_v42, 0 }
 0x195   : > { %2176 = vadd.xlane.f32.xlu2 %v2175_v15  ;;  %v2496_v15 = vsel %vm2150_vm1, %v2137_v52, 0.0  ;;  %v1466_v52 = vrot.slane %v6279_v40, 2 }
 0x196   : > { %v1879_v7 = vadd.f32 %v1623_v60, %v1343_v56  ;;  %v1346_v56 = vpop.f32.mrf.mxu3 }
 0x197   : > { %v6673_v19 = vpop.xlane.xlu0 %2458 }
 0x198   : > { %8096 = vst [vmem:[#allocation17_spill] sm:$0xff] %v6673_v19  ;;  %2389 = vadd.xlane.f32.xlu1 %v2388_v58  ;;  %v6678_v23 = vpop.xlane.xlu2 %2455  ;;  %v1553_v58 = vperm.slane %v1435_v59, 0  ;;  %v2007_v42 = vmax.f32 %v1879_v7, 0.0  ;;  %v2067_v59 = vmul.f32 %v6499_v49, %v1936_v28  ;;  %v1241_v6 = vpop.f32.mrf.mxu2 }
 0x199   : > { %8097 = vst [vmem:[#allocation18_spill] sm:$0xff] %v6678_v23 }
 0x19a   : > { %v1809_v30 = vadd.f32 %v1553_v58, %v1133_v18  ;;  %v2138_v55 = vmul.f32 %v6499_v49, %v2007_v42  ;;  %v1589_v18 = vperm.slane %v1466_v52, 0  ;;  %v2286_v58 = vsel %vm2150_vm1, %v2067_v59, 0.0 }
 0x19b   : > { %v6683_v38 = vpop.xlane.xlu1 %2461  ;;  %v1554_v52 = vperm.slane %v1436_v50, 0  ;;  %v1467_v50 = vrot.slane %v6279_v40, 3 }
 0x19c   : > { %8098 = vst [vmem:[#allocation19_spill] sm:$0xff] %v6683_v38  ;;  %2494 = vadd.xlane.f32.xlu0 %v2493_v21  ;;  %v1028_v21 = vpop.f32.mrf.mxu0  ;;  %v1937_v60 = vmax.f32 %v1809_v30, 0.0  ;;  %v1845_v17 = vadd.f32 %v1589_v18, %v1241_v6  ;;  %v1624_v30 = vperm.slane %v1497_v51, 0  ;;  %v1405_v51 = vrot.slane %v6101_v16, 4 }
 0x19d   : > { %2284 = vadd.xlane.f32.xlu2 %v2283_v43 }
 0x19e   : > { %v1880_v42 = vadd.f32 %v1624_v30, %v1346_v56  ;;  %v1973_v59 = vmax.f32 %v1845_v17, 0.0  ;;  %v1349_v6 = vpop.f32.mrf.mxu3 }
 0x19f   : > { %v6688_v8 = vpop.xlane.xlu0 %2251 }
 0x1a0   : > { %2497 = vadd.xlane.f32.xlu1 %v2496_v15  ;;  %v6693_v14 = vpop.xlane.xlu2 %2356  ;;  %v1774_v15 = vadd.f32 %v1518_v33, %v1028_v21  ;;  %v2499_v21 = vsel %vm2150_vm1, %v2138_v55, 0.0  ;;  %v2103_v33 = vmul.f32 %v6499_v49, %v1972_v1  ;;  %v2008_v56 = vmax.f32 %v1880_v42, 0.0 }
 0x1a1   : > { %v2104_v17 = vmul.f32 %v6499_v49, %v1973_v59 }
 0x1a2   : > { %v1902_v36 = vmax.f32 %v1774_v15, 0.0 }
 0x1a3   : > { %v6698_v34 = vpop.xlane.xlu1 %2254 }
 0x1a4   : > { %2179 = vadd.xlane.f32.xlu0 %v2178_v31  ;;  %v2068_v31 = vmul.f32 %v6499_v49, %v1937_v60  ;;  %v1031_v53 = vpop.f32.mrf.mxu0  ;;  %v1810_v60 = vadd.f32 %v1554_v52, %v1136_v26  ;;  %v2033_v55 = vmul.f32 %v6499_v49, %v1902_v36  ;;  %v1244_v26 = vpop.f32.mrf.mxu2  ;;  %v1590_v36 = vperm.slane %v1467_v50, 0 }
 0x1a5   : > { %2392 = vadd.xlane.f32.xlu2 %v2391_v3  ;;  %v1498_v3 = vrot.slane %v6420_v54, 6 }
 0x1a6   : > { %v2184_v52 = vsel %vm2150_vm1, %v2033_v55, 0.0 }
 0x1a7   : > { %v6703_v43 = vpop.xlane.xlu0 %2359  ;;  %v1625_v18 = vperm.slane %v1498_v3, 0  ;;  %v1139_v3 = vpop.f32.mrf.mxu1 }
 0x1a8   : > { %2182 = vadd.xlane.f32.xlu1 %v2181_v47  ;;  %v6708_v7 = vpop.xlane.xlu2 %2464  ;;  %v2289_v47 = vsel %vm2150_vm1, %v2068_v31, 0.0  ;;  %v1938_v31 = vmax.f32 %v1810_v60, 0.0 }
 0x1a9   : > { %8099 = vst [vmem:[#allocation20_spill] sm:$0xff] %v6708_v7  ;;  %v1881_v30 = vadd.f32 %v1625_v18, %v1349_v6  ;;  %v2397_v18 = vsel %vm2150_vm1, %v2104_v17, 0.0  ;;  %v1352_v17 = vpop.f32.mrf.mxu3 }
 0x1ab   : > { %v6713_v28 = vpop.xlane.xlu1 %2362  ;;  %v2009_v6 = vmax.f32 %v1881_v30, 0.0 }
 0x1ac   : > { %2287 = vadd.xlane.f32.xlu0 %v2286_v58  ;;  %v2394_v58 = vsel %vm2150_vm1, %v2103_v33, 0.0  ;;  %v2139_v33 = vmul.f32 %v6499_v49, %v2008_v56  ;;  %v1034_v59 = vpop.f32.mrf.mxu0 }
 0x1ad   : > { %2500 = vadd.xlane.f32.xlu2 %v2499_v21  ;;  %v1519_v21 = vperm.slane %v1405_v51, 0  ;;  %v2069_v51 = vmul.f32 %v6499_v49, %v1938_v31  ;;  %v2140_v56 = vmul.f32 %v6499_v49, %v2009_v6  ;;  %v1437_v31 = vrot.slane %v6193_v37, 1 }
 0x1af   : > { %v6718_v20 = vpop.xlane.xlu0 %2467  ;;  %v1775_v42 = vadd.f32 %v1519_v21, %v1031_v53  ;;  %v2502_v53 = vsel %vm2150_vm1, %v2139_v33, 0.0 }
 0x1b0   : > { %8100 = vst [vmem:[#allocation21_spill] sm:$0xff] %v6718_v20  ;;  %2290 = vadd.xlane.f32.xlu1 %v2289_v47  ;;  %v6723_v15 = vpop.xlane.xlu2 %2257  ;;  %v1406_v47 = vrot.slane %v6101_v16, 5 }
 0x1b1   : > { %v1903_v50 = vmax.f32 %v1775_v42, 0.0  ;;  %v1247_v42 = vpop.f32.mrf.mxu2 }
 0x1b2   : > { %v1520_v55 = vperm.slane %v1406_v47, 0 }
 0x1b3   : > { %v6728_v1 = vpop.xlane.xlu1 %2470  ;;  %v2034_v33 = vmul.f32 %v6499_v49, %v1903_v50 }
 0x1b4   : > { %8101 = vst [vmem:[#allocation22_spill] sm:$0xff] %v6728_v1  ;;  %2395 = vadd.xlane.f32.xlu0 %v2394_v58  ;;  %v1846_v58 = vadd.f32 %v1590_v36, %v1244_v26  ;;  %v1776_v21 = vadd.f32 %v1520_v55, %v1034_v59  ;;  %v1555_v26 = vperm.slane %v6193_v37, 0  ;;  %v2292_v36 = vsel %vm2150_vm1, %v2069_v51, 0.0 }
 0x1b5   : > { %2185 = vadd.xlane.f32.xlu2 %v2184_v52  ;;  %v1499_v52 = vrot.slane %v6420_v54, 7  ;;  %v2505_v55 = vsel %vm2150_vm1, %v2140_v56, 0.0 }
 0x1b6   : > { %v1974_v30 = vmax.f32 %v1846_v58, 0.0  ;;  %v1811_v54 = vadd.f32 %v1555_v26, %v1139_v3  ;;  %v1904_v59 = vmax.f32 %v1776_v21, 0.0  ;;  %v1468_v58 = vrot.slane %v6279_v40, 4 }
 0x1b7   : > { %v6733_v4 = vpop.xlane.xlu0 %2152  ;;  %v1626_v47 = vperm.slane %v1499_v52, 0  ;;  %v1407_v3 = vrot.slane %v6101_v16, 6  ;;  %v2187_v26 = vsel %vm2150_vm1, %v2034_v33, 0.0 }
 0x1b8   : > { %2398 = vadd.xlane.f32.xlu1 %v2397_v18  ;;  %v6737_v60 = vpop.xlane.xlu2 %2365  ;;  %v2105_v51 = vmul.f32 %v6499_v49, %v1974_v30  ;;  %v1939_v52 = vmax.f32 %v1811_v54, 0.0  ;;  %v2035_v21 = vmul.f32 %v6499_v49, %v1904_v59 }
 0x1b9   : > { %v1882_v6 = vadd.f32 %v1626_v47, %v1352_v17  ;;  %v1591_v17 = vperm.slane %v1468_v58, 0  ;;  %v1037_v47 = vpop.f32.mrf.mxu0  ;;  %v1521_v54 = vperm.slane %v1407_v3, 0 }
 0x1ba   : > { %v2070_v33 = vmul.f32 %v6499_v49, %v1939_v52  ;;  %v1627_v52 = vperm.slane %v6447_v27, 0 }
 0x1bb   : > { %v6742_v7 = vpop.xlane.xlu1 %2263  ;;  %v2010_v56 = vmax.f32 %v1882_v6, 0.0  ;;  %v1847_v30 = vadd.f32 %v1591_v17, %v1247_v42  ;;  %v1777_v59 = vadd.f32 %v1521_v54, %v1037_v47  ;;  %v1438_v42 = vrot.slane %v6193_v37, 2 }
 0x1bc   : > { %2503 = vadd.xlane.f32.xlu0 %v2502_v53  ;;  %v1142_v53 = vpop.f32.mrf.mxu1  ;;  %v2295_v3 = vsel %vm2150_vm1, %v2070_v33, 0.0  ;;  %v6783_v33 = vld [vmem:[%s8079_s5] ss:$0 sm:$0xff] }
 0x1bd   : > { %2293 = vadd.xlane.f32.xlu2 %v2292_v36  ;;  %v1556_v36 = vperm.slane %v1437_v31, 0  ;;  %v1355_v31 = vpop.f32.mrf.mxu3  ;;  %v2141_v58 = vmul.f32 %v6499_v49, %v2010_v56  ;;  %v1975_v19 = vmax.f32 %v1847_v30, 0.0  ;;  %v1905_v47 = vmax.f32 %v1777_v59, 0.0 }
 0x1be   : > { %v1500_v56 = vrot.slane %v6447_v27, 1  ;;  %v1557_v30 = vperm.slane %v1438_v42, 0 }
 0x1bf   : > { %v6748_v18 = vpop.xlane.xlu0 %2260  ;;  %v1812_v20 = vadd.f32 %v1556_v36, %v1142_v53  ;;  %v2190_v36 = vsel %vm2150_vm1, %v2035_v21, 0.0  ;;  %v2508_v54 = vsel %vm2150_vm1, %v2141_v58, 0.0  ;;  %v2036_v42 = vmul.f32 %v6783_v33, %v1905_v47 }
 0x1c0   : > { %2506 = vadd.xlane.f32.xlu1 %v2505_v55  ;;  %v6753_v1 = vpop.xlane.xlu2 %2473  ;;  %v2400_v55 = vsel %vm2150_vm1, %v2105_v51, 0.0 }
 0x1c1   : > { %8102 = vst [vmem:[#allocation23_spill] sm:$0xff] %v6753_v1  ;;  %v1469_v1 = vrot.slane %v6279_v40, 5  ;;  %v1940_v53 = vmax.f32 %v1812_v20, 0.0 }
 0x1c3   : > { %v6758_v50 = vpop.xlane.xlu1 %2371  ;;  %v1592_v51 = vperm.slane %v1469_v1, 0  ;;  %v2071_v20 = vmul.f32 %v6499_v49, %v1940_v53  ;;  %v1883_v1 = vadd.f32 %v1627_v52, %v1355_v31  ;;  %v2106_v49 = vmul.f32 %v6783_v33, %v1975_v19 }
 0x1c4   : > { %8103 = vst [vmem:[#allocation24_spill] sm:$0xff] %v6758_v50  ;;  %2188 = vadd.xlane.f32.xlu0 %v2187_v26  ;;  %v1250_v26 = vpop.f32.mrf.mxu2  ;;  %v1145_v21 = vpop.f32.mrf.mxu1 }
 0x1c5   : > { %2401 = vadd.xlane.f32.xlu2 %v2400_v55  ;;  %v1848_v17 = vadd.f32 %v1592_v51, %v1250_v26  ;;  %v2298_v26 = vsel %vm2150_vm1, %v2071_v20, 0.0  ;;  %v1358_v59 = vpop.f32.mrf.mxu3  ;;  %v1813_v58 = vadd.f32 %v1557_v30, %v1145_v21  ;;  %v1408_v51 = vrot.slane %v6101_v16, 7 }
 0x1c6   : > { %v2011_v52 = vmax.f32 %v1883_v1, 0.0  ;;  %v2193_v30 = vsel %vm2150_vm1, %v2036_v42, 0.0  ;;  %v1523_v42 = vperm.slane %v6115_v24, 0 }
 0x1c7   : > { %v6763_v38 = vpop.xlane.xlu0 %2368  ;;  %v1976_v53 = vmax.f32 %v1848_v17, 0.0  ;;  %v1941_v20 = vmax.f32 %v1813_v58, 0.0  ;;  %v1522_v16 = vperm.slane %v1408_v51, 0 }
 0x1c8   : > { %2191 = vadd.xlane.f32.xlu1 %v2190_v36  ;;  %v6767_v6 = vpop.xlane.xlu2 %2266  ;;  %v1040_v36 = vpop.f32.mrf.mxu0  ;;  %v2142_v41 = vmul.f32 %v6783_v33, %v2011_v52 }
 0x1c9   : > { %v2107_v17 = vmul.f32 %v6783_v33, %v1976_v53  ;;  %v2072_v51 = vmul.f32 %v6783_v33, %v1941_v20  ;;  %v1440_v20 = vrot.slane %v6193_v37, 4 }
 0x1cb   : > { %v6772_v55 = vpop.xlane.xlu1 %2479 }
 0x1cc   : > { %8104 = vst [vmem:[#allocation25_spill] sm:$0xff] %v6772_v55  ;;  %2296 = vadd.xlane.f32.xlu0 %v2295_v3  ;;  %v1628_v3 = vperm.slane %v1500_v56, 0  ;;  %v2403_v55 = vsel %vm2150_vm1, %v2106_v49, 0.0  ;;  %v1253_v21 = vpop.f32.mrf.mxu2  ;;  %v1148_v47 = vpop.f32.mrf.mxu1  ;;  %v1778_v56 = vadd.f32 %v1522_v16, %v1040_v36  ;;  %v1501_v36 = vrot.slane %v6447_v27, 2 }
 0x1cd   : > { %2509 = vadd.xlane.f32.xlu2 %v2508_v54  ;;  %v1470_v54 = vrot.slane %v6279_v40, 6  ;;  %v2511_v16 = vsel %vm2150_vm1, %v2142_v41, 0.0 }
 0x1cf   : > { %v6778_v23 = vpop.xlane.xlu0 %2476 }
 0x1d0   : > { %8105 = vst [vmem:[#allocation26_spill] sm:$0xff] %v6778_v23  ;;  %2299 = vadd.xlane.f32.xlu1 %v2298_v26  ;;  %v6788_v31 = vpop.xlane.xlu2 %2374  ;;  %v1884_v23 = vadd.f32 %v1628_v3, %v1358_v59  ;;  %v1593_v26 = vperm.slane %v1470_v54, 0  ;;  %v2406_v59 = vsel %vm2150_vm1, %v2107_v17, 0.0  ;;  %v1043_v53 = vpop.f32.mrf.mxu0  ;;  %v1906_v54 = vmax.f32 %v1778_v56, 0.0 }
 0x1d1   : > { %v1779_v52 = vadd.f32 %v1523_v42, %v1043_v53 }
 0x1d2   : > { %v2012_v49 = vmax.f32 %v1884_v23, 0.0  ;;  %v1849_v3 = vadd.f32 %v1593_v26, %v1253_v21  ;;  %v2037_v41 = vmul.f32 %v6783_v33, %v1906_v54 }
 0x1d3   : > { %v6793_v19 = vpop.xlane.xlu1 %2158  ;;  %v1907_v53 = vmax.f32 %v1779_v52, 0.0 }
 0x1d4   : > { %2404 = vadd.xlane.f32.xlu0 %v2403_v55  ;;  %v1439_v55 = vrot.slane %v6193_v37, 3  ;;  %v2143_v17 = vmul.f32 %v6783_v33, %v2012_v49  ;;  %v1977_v21 = vmax.f32 %v1849_v3, 0.0  ;;  %v1256_v39 = vpop.f32.mrf.mxu2  ;;  %v1471_v49 = vrot.slane %v6279_v40, 7  ;;  %v1151_v3 = vpop.f32.mrf.mxu1 }
 0x1d5   : > { %2194 = vadd.xlane.f32.xlu2 %v2193_v30  ;;  %v1361_v30 = vpop.f32.mrf.mxu3 }
 0x1d6   : > { %v1558_v26 = vperm.slane %v1439_v55, 0  ;;  %v2514_v42 = vsel %vm2150_vm1, %v2143_v17, 0.0  ;;  %v1594_v40 = vperm.slane %v1471_v49, 0 }
 0x1d7   : > { %v6797_v1 = vpop.xlane.xlu0 %2155 }
 0x1d8   : > { %2407 = vadd.xlane.f32.xlu1 %v2406_v59  ;;  %v6802_v58 = vpop.xlane.xlu2 %2482  ;;  %v2301_v59 = vsel %vm2150_vm1, %v2072_v51, 0.0  ;;  %v1814_v13 = vadd.f32 %v1558_v26, %v1148_v47  ;;  %v2108_v51 = vmul.f32 %v6783_v33, %v1977_v21  ;;  %v1409_v47 = vrot.slane %v6115_v24, 1  ;;  %v1046_v17 = vpop.f32.mrf.mxu0 }
 0x1d9   : > { %8106 = vst [vmem:[#allocation27_spill] sm:$0xff] %v6802_v58  ;;  %v1629_v58 = vperm.slane %v1501_v36, 0  ;;  %v2196_v26 = vsel %vm2150_vm1, %v2037_v41, 0.0 }
 0x1da   : > { %v1942_v36 = vmax.f32 %v1814_v13, 0.0 }
 0x1db   : > { %v6808_v23 = vpop.xlane.xlu1 %2161 }
 0x1dc   : > { %2512 = vadd.xlane.f32.xlu0 %v2511_v16  ;;  %v1885_v16 = vadd.f32 %v1629_v58, %v1361_v30  ;;  %v2038_v58 = vmul.f32 %v6783_v33, %v1907_v53  ;;  %v2409_v30 = vsel %vm2150_vm1, %v2108_v51, 0.0  ;;  %v2073_v44 = vmul.f32 %v6783_v33, %v1942_v36 }
 0x1dd   : > { %2302 = vadd.xlane.f32.xlu2 %v2301_v59  ;;  %v1559_v59 = vperm.slane %v1440_v20, 0  ;;  %v1364_v21 = vpop.f32.mrf.mxu3  ;;  %v1524_v20 = vperm.slane %v1409_v47, 0  ;;  %v1441_v47 = vrot.slane %v6193_v37, 5 }
 0x1de   : > { %v2013_v52 = vmax.f32 %v1885_v16, 0.0 }
 0x1df   : > { %v6813_v56 = vpop.xlane.xlu0 %2269  ;;  %v1815_v12 = vadd.f32 %v1559_v59, %v1151_v3  ;;  %v2199_v3 = vsel %vm2150_vm1, %v2038_v58, 0.0  ;;  %v1502_v59 = vrot.slane %v6447_v27, 3  ;;  %v1780_v53 = vadd.f32 %v1524_v20, %v1046_v17  ;;  %v1154_v17 = vpop.f32.mrf.mxu1 }
 0x1e0   : > { %2515 = vadd.xlane.f32.xlu1 %v2514_v42  ;;  %v6818_v55 = vpop.xlane.xlu2 %2164  ;;  %v1850_v42 = vadd.f32 %v1594_v40, %v1256_v39  ;;  %v2144_v49 = vmul.f32 %v6783_v33, %v2013_v52  ;;  %v1595_v39 = vperm.slane %v6299_v5, 0  ;;  %v2304_v40 = vsel %vm2150_vm1, %v2073_v44, 0.0  ;;  %v1049_v0 = vpop.f32.mrf.mxu0 }
 0x1e1   : > { %v1943_v41 = vmax.f32 %v1815_v12, 0.0  ;;  %v1908_v20 = vmax.f32 %v1780_v53, 0.0  ;;  %v1503_v52 = vrot.slane %v6447_v27, 4 }
 0x1e2   : > { %v1978_v51 = vmax.f32 %v1850_v42, 0.0  ;;  %v1560_v42 = vperm.slane %v1441_v47, 0  ;;  %v1472_v47 = vrot.slane %v6299_v5, 1 }
 0x1e3   : > { %v6823_v54 = vpop.xlane.xlu1 %2272  ;;  %v2074_v58 = vmul.f32 %v6783_v33, %v1943_v41 }
 0x1e4   : > { %2197 = vadd.xlane.f32.xlu0 %v2196_v26  ;;  %v1259_v26 = vpop.f32.mrf.mxu2  ;;  %v2109_v44 = vmul.f32 %v6783_v33, %v1978_v51  ;;  %v1816_v41 = vadd.f32 %v1560_v42, %v1154_v17 }
 0x1e5   : > { %2410 = vadd.xlane.f32.xlu2 %v2409_v30  ;;  %v1851_v36 = vadd.f32 %v1595_v39, %v1259_v26  ;;  %v1630_v30 = vperm.slane %v1502_v59, 0  ;;  %v2307_v39 = vsel %vm2150_vm1, %v2074_v58, 0.0  ;;  %v1410_v59 = vrot.slane %v6115_v24, 2 }
 0x1e6   : > { %v1944_v58 = vmax.f32 %v1816_v41, 0.0 }
 0x1e7   : > { %v6827_v13 = vpop.xlane.xlu0 %2377  ;;  %v1886_v9 = vadd.f32 %v1630_v30, %v1364_v21  ;;  %v1979_v26 = vmax.f32 %v1851_v36, 0.0  ;;  %v2412_v30 = vsel %vm2150_vm1, %v2109_v44, 0.0  ;;  %v1525_v42 = vperm.slane %v1410_v59, 0 }
 0x1e8   : > { %8107 = vst [vmem:[#allocation28_spill] sm:$0xff] %v6827_v13  ;;  %2200 = vadd.xlane.f32.xlu1 %v2199_v3  ;;  %v6832_v16 = vpop.xlane.xlu2 %2167  ;;  %v2517_v3 = vsel %vm2150_vm1, %v2144_v49, 0.0  ;;  %v2039_v49 = vmul.f32 %v6783_v33, %v1908_v20  ;;  %v1596_v20 = vperm.slane %v1472_v47, 0  ;;  %v1052_v41 = vpop.f32.mrf.mxu0  ;;  %v2075_v24 = vmul.f32 %v6783_v33, %v1944_v58 }
 0x1e9   : > { %v2014_v21 = vmax.f32 %v1886_v9, 0.0  ;;  %v2110_v36 = vmul.f32 %v6783_v33, %v1979_v26  ;;  %v1157_v9 = vpop.f32.mrf.mxu1  ;;  %v1442_v26 = vrot.slane %v6193_v37, 6  ;;  %v1504_v47 = vrot.slane %v6447_v27, 5 }
 0x1eb   : > { %v6838_v12 = vpop.xlane.xlu1 %2380  ;;  %v2145_v44 = vmul.f32 %v6783_v33, %v2014_v21 }
 0x1ec   : > { %8108 = vst [vmem:[#allocation29_spill] sm:$0xff] %v6838_v12  ;;  %2305 = vadd.xlane.f32.xlu0 %v2304_v40  ;;  %v1367_v40 = vpop.f32.mrf.mxu3  ;;  %v1262_v17 = vpop.f32.mrf.mxu2 }
 0x1ed   : > { %2518 = vadd.xlane.f32.xlu2 %v2517_v3  ;;  %v1631_v3 = vperm.slane %v1503_v52, 0  ;;  %v1781_v52 = vadd.f32 %v1525_v42, %v1049_v0  ;;  %v2520_v42 = vsel %vm2150_vm1, %v2145_v44, 0.0 }
 0x1ef   : > { %v6843_v25 = vpop.xlane.xlu0 %2485  ;;  %v1909_v0 = vmax.f32 %v1781_v52, 0.0 }
 0x1f0   : > { %8109 = vst [vmem:[#allocation30_spill] sm:$0xff] %v6843_v25  ;;  %2308 = vadd.xlane.f32.xlu1 %v2307_v39  ;;  %v6848_v53 = vpop.xlane.xlu2 %2275  ;;  %v1887_v25 = vadd.f32 %v1631_v3, %v1367_v40  ;;  %v2202_v39 = vsel %vm2150_vm1, %v2039_v49, 0.0  ;;  %v2415_v3 = vsel %vm2150_vm1, %v2110_v36, 0.0  ;;  %v1526_v49 = vperm.slane %v1411_v11, 0 }
 0x1f1   : > { %v1632_v11 = vperm.slane %v1504_v47, 0  ;;  %v2040_v44 = vmul.f32 %v6783_v33, %v1909_v0 }
 0x1f2   : > { %v2015_v40 = vmax.f32 %v1887_v25, 0.0 }
 0x1f3   : > { %v6853_v51 = vpop.xlane.xlu1 %2488 }
 0x1f4   : > { %2413 = vadd.xlane.f32.xlu0 %v2412_v30  ;;  %v1852_v30 = vadd.f32 %v1596_v20, %v1262_v17  ;;  %v2146_v25 = vmul.f32 %v6783_v33, %v2015_v40  ;;  %v1370_v17 = vpop.f32.mrf.mxu3  ;;  %v1561_v20 = vperm.slane %v1442_v26, 0  ;;  %v1265_v13 = vpop.f32.mrf.mxu2  ;;  %v1473_v40 = vrot.slane %v6299_v5, 2 }
 0x1f5   : > { %2203 = vadd.xlane.f32.xlu2 %v2202_v39  ;;  %v1782_v39 = vadd.f32 %v1526_v49, %v1052_v41 }
 0x1f6   : > { %v1980_v36 = vmax.f32 %v1852_v30, 0.0  ;;  %v1817_v58 = vadd.f32 %v1561_v20, %v1157_v9  ;;  %v2523_v49 = vsel %vm2150_vm1, %v2146_v25, 0.0  ;;  %v1160_v30 = vpop.f32.mrf.mxu1  ;;  %v2205_v9 = vsel %vm2150_vm1, %v2040_v44, 0.0 }
 0x1f7   : > { %v6858_v12 = vpop.xlane.xlu0 %2170  ;;  %v1910_v41 = vmax.f32 %v1782_v39, 0.0  ;;  %v1597_v25 = vperm.slane %v1473_v40, 0 }
 0x1f8   : > { %2416 = vadd.xlane.f32.xlu1 %v2415_v3  ;;  %v6863_v59 = vpop.xlane.xlu2 %2383  ;;  %v2310_v3 = vsel %vm2150_vm1, %v2075_v24, 0.0  ;;  %v1945_v47 = vmax.f32 %v1817_v58, 0.0 }
 0x1f9   : > { %8110 = vst [vmem:[#allocation31_spill] sm:$0xff] %v6863_v59  ;;  %v1443_v59 = vrot.slane %v6193_v37, 7  ;;  %v2111_v37 = vmul.f32 %v6783_v33, %v1980_v36  ;;  %v2041_v0 = vmul.f32 %v6783_v33, %v1910_v41 }
 0x1fb   : > { %v6868_v21 = vpop.xlane.xlu1 %2173  ;;  %v1562_v24 = vperm.slane %v1443_v59, 0  ;;  %v2076_v59 = vmul.f32 %v6783_v33, %v1945_v47  ;;  %v2208_v44 = vsel %vm2150_vm1, %v2041_v0, 0.0 }
 0x1fc   : > { %2521 = vadd.xlane.f32.xlu0 %v2520_v42  ;;  %v1888_v42 = vadd.f32 %v1632_v11, %v1370_v17  ;;  %v2418_v17 = vsel %vm2150_vm1, %v2111_v37, 0.0  ;;  %v1474_v11 = vrot.slane %v6299_v5, 3  ;;  %v1373_v50 = vpop.f32.mrf.mxu3 }
 0x1fd   : > { %2311 = vadd.xlane.f32.xlu2 %v2310_v3  ;;  %v1818_v20 = vadd.f32 %v1562_v24, %v1160_v30  ;;  %v1505_v30 = vrot.slane %v6447_v27, 6  ;;  %v1268_v24 = vpop.f32.mrf.mxu2 }
 0x1fe   : > { %v2016_v39 = vmax.f32 %v1888_v42, 0.0  ;;  %v1598_v40 = vperm.slane %v1474_v11, 0 }
 0x1ff   : > { %v6873_v52 = vpop.xlane.xlu0 %2278  ;;  %v1946_v58 = vmax.f32 %v1818_v20, 0.0  ;;  %v1633_v20 = vperm.slane %v1505_v30, 0 }
 0x200   : > { %2524 = vadd.xlane.f32.xlu1 %v2523_v49  ;;  %v6878_v26 = vpop.xlane.xlu2 %2491  ;;  %v1853_v49 = vadd.f32 %v1597_v25, %v1265_v13  ;;  %v2147_v42 = vmul.f32 %v6783_v33, %v2016_v39  ;;  %v2313_v13 = vsel %vm2150_vm1, %v2076_v59, 0.0  ;;  %v1854_v37 = vadd.f32 %v1598_v40, %v1268_v24 }
 0x201   : > { %v2077_v47 = vmul.f32 %v6783_v33, %v1946_v58  ;;  %v1506_v25 = vrot.slane %v6447_v27, 7 }
 0x202   : > { %v1981_v5 = vmax.f32 %v1853_v49, 0.0  ;;  %v2526_v0 = vsel %vm2150_vm1, %v2147_v42, 0.0  ;;  %v1982_v11 = vmax.f32 %v1854_v37, 0.0 }
 0x203   : > { %v6882_v3 = vpop.xlane.xlu1 %2281  ;;  %v2316_v49 = vsel %vm2150_vm1, %v2077_v47, 0.0  ;;  %v1634_v40 = vperm.slane %v1506_v25, 0 }
 0x204   : > { %2206 = vadd.xlane.f32.xlu0 %v2205_v9  ;;  %v2112_v39 = vmul.f32 %v6783_v33, %v1981_v5  ;;  %v1376_v59 = vpop.f32.mrf.mxu3  ;;  %v2113_v27 = vmul.f32 %v6783_v33, %v1982_v11 }
 0x205   : > { %2419 = vadd.xlane.f32.xlu2 %v2418_v17  ;;  %v1889_v17 = vadd.f32 %v1633_v20, %v1373_v50  ;;  %v1890_v30 = vadd.f32 %v1634_v40, %v1376_v59 }
 0x206   : > { %v2421_v58 = vsel %vm2150_vm1, %v2112_v39, 0.0  ;;  %v2424_v47 = vsel %vm2150_vm1, %v2113_v27, 0.0  ;;  %v2707_v27 = vperm.slane %v6873_v52, %v6519_v10 }
 0x207   : > { %v6887_v36 = vpop.xlane.xlu0 %2386  ;;  %v2018_v37 = vmax.f32 %v1890_v30, 0.0  ;;  %v2706_v30 = vperm.slane %v6848_v53, %v6519_v10  ;;  %v2668_v53 = vperm.slane %v6808_v23, %v6519_v10 }
 0x208   : > { %2209 = vadd.xlane.f32.xlu1 %v2208_v44  ;;  %v6892_v41 = vpop.xlane.xlu2 %2176 }
 0x20b   : > { %v6896_v9 = vpop.xlane.xlu1 %2389 }
 0x20c   : > { %2314 = vadd.xlane.f32.xlu0 %v2313_v13  ;;  %v2017_v13 = vmax.f32 %v1889_v17, 0.0  ;;  %v2149_v17 = vmul.f32 %v6783_v33, %v2018_v37  ;;  %v2708_v37 = vperm.slane %v6882_v3, %v6519_v10 }
 0x20d   : > { %2527 = vadd.xlane.f32.xlu2 %v2526_v0 }
 0x20e   : > { %v2148_v5 = vmul.f32 %v6783_v33, %v2017_v13  ;;  %v2665_v33 = vperm.slane %v6733_v4, %v6519_v10  ;;  %v2667_v4 = vperm.slane %v6793_v19, %v6519_v10 }
 0x20f   : > { %v6901_v44 = vpop.xlane.xlu0 %2494 }
 0x210   : > { %2317 = vadd.xlane.f32.xlu1 %v2316_v49  ;;  %v2285_v24 = vpop.xlane.xlu2 %2284  ;;  %v2529_v0 = vsel %vm2150_vm1, %v2148_v5, 0.0  ;;  %v2532_v49 = vsel %vm2150_vm1, %v2149_v17, 0.0  ;;  %v2705_v5 = vperm.slane %v6823_v54, %v6519_v10  ;;  %v2669_v54 = vperm.slane %v6818_v55, %v6519_v10 }
 0x212   : > { %v2835_v17 = vsel %vm2793_vm2, %v2706_v30, %v2705_v5 }
 0x213   : > { %v6906_v42 = vpop.xlane.xlu1 %2497  ;;  %v2836_v3 = vsel %vm2795_vm3, %v2707_v27, %v2835_v17  ;;  %v2672_v27 = vperm.slane %v6868_v21, %v6519_v10 }
 0x214   : > { %2422 = vadd.xlane.f32.xlu0 %v2421_v58  ;;  %v2666_v58 = vperm.slane %v6797_v1, %v6519_v10  ;;  %v2837_v23 = vsel %vm2797_vm4, %v2708_v37, %v2836_v3 }
 0x216   : > { %v2794_v1 = vsel %vm2793_vm2, %v2666_v58, %v2665_v33  ;;  %v2670_v58 = vperm.slane %v6832_v16, %v6519_v10 }
 0x217   : > { %v6909_v50 = vpop.xlane.xlu0 %2179  ;;  %v2796_v30 = vsel %vm2795_vm3, %v2667_v4, %v2794_v1 }
 0x218   : > { %2425 = vadd.xlane.f32.xlu1 %v2424_v47  ;;  %v2393_v20 = vpop.xlane.xlu2 %2392  ;;  %v2798_v55 = vsel %vm2797_vm4, %v2668_v53, %v2796_v30  ;;  %v2779_v30 = vperm.slane %v6901_v44, %v6519_v10 }
 0x219   : > { %v2800_v16 = vsel %vm2799_vm5, %v2669_v54, %v2798_v55 }
 0x21a   : > { %v2802_v17 = vsel %vm2801_vm6, %v2670_v58, %v2800_v16 }
 0x21b   : > { %v6914_v25 = vpop.xlane.xlu1 %2182 }
 0x21c   : > { %2530 = vadd.xlane.f32.xlu0 %v2529_v0  ;;  %v2709_v0 = vperm.slane %v2285_v24, %v6519_v10 }
 0x21e   : > { %v2838_v19 = vsel %vm2799_vm5, %v2709_v0, %v2837_v23 }
 0x21f   : > { %v2288_v39 = vpop.xlane.xlu0 %2287 }
 0x220   : > { %2533 = vadd.xlane.f32.xlu1 %v2532_v49  ;;  %v2501_v11 = vpop.xlane.xlu2 %2500  ;;  %v2710_v52 = vperm.slane %v2288_v39, %v6519_v10  ;;  %v2671_v39 = vperm.slane %v6858_v12, %v6519_v10 }
 0x222   : > { %v2839_v5 = vsel %vm2801_vm6, %v2710_v52, %v2838_v19  ;;  %v2804_v0 = vsel %vm2803_vm7, %v2671_v39, %v2802_v17  ;;  %v2745_v52 = vperm.slane %v2393_v20, %v6519_v10  ;;  %v2780_v39 = vperm.slane %v6906_v42, %v6519_v10 }
 0x223   : > { %v2291_v59 = vpop.xlane.xlu1 %2290  ;;  %v2806_v21 = vsel %vm2805_vm8, %v2672_v27, %v2804_v0 }
 0x224   : > { %v2711_v49 = vperm.slane %v2291_v59, %v6519_v10 }
 0x226   : > { %v2840_v37 = vsel %vm2803_vm7, %v2711_v49, %v2839_v5  ;;  %v2778_v49 = vperm.slane %v6878_v26, %v6519_v10  ;;  %v2781_v26 = vperm.slane %v2501_v11, %v6519_v10 }
 0x227   : > { %v2396_v40 = vpop.xlane.xlu0 %2395 }
 0x228   : > { %v6918_v13 = vpop.xlane.xlu2 %2185  ;;  %v2746_v53 = vperm.slane %v2396_v40, %v6519_v10 }
 0x22a   : > { %v2870_v58 = vsel %vm2793_vm2, %v2746_v53, %v2745_v52  ;;  %v2675_v52 = vperm.slane %v6914_v25, %v6519_v10 }
 0x22b   : > { %v2399_v47 = vpop.xlane.xlu1 %2398 }
 0x22c   : > { %v2747_v4 = vperm.slane %v2399_v47, %v6519_v10  ;;  %v2777_v47 = vperm.slane %v6853_v51, %v6519_v10 }
 0x22e   : > { %v2871_v40 = vsel %vm2795_vm3, %v2747_v4, %v2870_v58  ;;  %v2674_v4 = vperm.slane %v6909_v50, %v6519_v10  ;;  %v2676_v58 = vperm.slane %v6918_v13, %v6519_v10 }
 0x22f   : > { %v2504_v24 = vpop.xlane.xlu0 %2503 }
 0x230   : > { %v2294_v33 = vpop.xlane.xlu2 %2293  ;;  %v2782_v55 = vperm.slane %v2504_v24, %v6519_v10 }
 0x231   : > { %v2712_v59 = vperm.slane %v2294_v33, %v6519_v10  ;;  %v2898_v33 = vsel %vm2793_vm2, %v2778_v49, %v2777_v47  ;;  %v2673_v49 = vperm.slane %v6892_v41, %v6519_v10 }
 0x232   : > { %v2899_v27 = vsel %vm2795_vm3, %v2779_v30, %v2898_v33 }
 0x233   : > { %v2507_v1 = vpop.xlane.xlu1 %2506  ;;  %v6960_v12 = vsel %vm2805_vm8, %v2712_v59, %v2840_v37  ;;  %v2900_v51 = vsel %vm2797_vm4, %v2780_v39, %v2899_v27  ;;  %v2807_v30 = vsel %vm2793_vm2, %v2674_v4, %v2673_v49 }
 0x234   : > { %v2783_v44 = vperm.slane %v2507_v1, %v6519_v10  ;;  %v2901_v5 = vsel %vm2799_vm5, %v2781_v26, %v2900_v51  ;;  %v2808_v50 = vsel %vm2795_vm3, %v2675_v52, %v2807_v30 }
 0x235   : > { %v2902_v37 = vsel %vm2801_vm6, %v2782_v55, %v2901_v5  ;;  %v2809_v39 = vsel %vm2797_vm4, %v2676_v58, %v2808_v50 }
 0x236   : > { %2928 = vxpose.xlu2.b32.start [1/16] (narrow) %v2806_v21, 8  ;;  %v2903_v11 = vsel %vm2803_vm7, %v2783_v44, %v2902_v37 }
 0x237   : > { %v2189_v3 = vpop.xlane.xlu0 %2188 }
 0x238   : > { %v2402_v54 = vpop.xlane.xlu2 %2401 }
 0x239   : > { %v2748_v23 = vperm.slane %v2402_v54, %v6519_v10 }
 0x23b   : > { %v2872_v20 = vsel %vm2797_vm4, %v2748_v23, %v2871_v40  ;;  %v2192_v19 = vpop.xlane.xlu1 %2191  ;;  %v2677_v23 = vperm.slane %v2189_v3, %v6519_v10 }
 0x23c   : > { %v2678_v40 = vperm.slane %v2192_v19, %v6519_v10 }
 0x23d   : > { %v2810_v41 = vsel %vm2799_vm5, %v2677_v23, %v2809_v39 }
 0x23e   : > { %v2811_v55 = vsel %vm2801_vm6, %v2678_v40, %v2810_v41 }
 0x23f   : > { %v6984_v59 = vpop.xlane.xlu0 %2296 }
 0x240   : > { %v2510_v42 = vpop.xlane.xlu2 %2509 }
 0x241   : > { %v2784_v16 = vperm.slane %v2510_v42, %v6519_v10 }
 0x243   : > { %v6991_v17 = vpop.xlane.xlu1 %2299  ;;  %v6994_v24 = vsel %vm2805_vm8, %v2784_v16, %v2903_v11 }
 0x247   : > { %v2405_v0 = vpop.xlane.xlu0 %2404 }
 0x248   : > { %v2195_v1 = vpop.xlane.xlu2 %2194  ;;  %v2749_v26 = vperm.slane %v2405_v0, %v6519_v10 }
 0x249   : > { %v2679_v25 = vperm.slane %v2195_v1, %v6519_v10 }
 0x24a   : > { %v2873_v44 = vsel %vm2799_vm5, %v2749_v26, %v2872_v20  ;;  %v2685_v26 = vperm.slane %v6477_v62, %v6519_v10 }
 0x24b   : > { %v2408_v53 = vpop.xlane.xlu1 %2407  ;;  %v2812_v27 = vsel %vm2803_vm7, %v2679_v25, %v2811_v55 }
 0x24c   : > { %v2750_v13 = vperm.slane %v2408_v53, %v6519_v10 }
 0x24e   : > { %v2874_v42 = vsel %vm2801_vm6, %v2750_v13, %v2873_v44  ;;  %v2686_v13 = vperm.slane %v6494_v48, %v6519_v10  ;;  %v2696_v48 = vperm.slane %v6608_v45, %v6519_v10 }
 0x24f   : > { %v6996_v21 = vpop.xlane.xlu0 %2512 }
 0x250   : > { %v7002_v54 = vpop.xlane.xlu2 %2302  ;;  %v2827_v45 = vsel %vm2805_vm8, %v2696_v48, %v6606_v61  ;;  %v2734_v48 = vperm.slane %v6703_v43, %v6519_v10  ;;  %v2739_v43 = vperm.slane %v6788_v31, %v6519_v10 }
 0x253   : > { %v7011_v47 = vpop.xlane.xlu1 %2515 }
 0x257   : > { %v2198_v33 = vpop.xlane.xlu0 %2197 }
 0x258   : > { %v2680_v3 = vperm.slane %v2198_v33, %v6519_v10  ;;  %v2411_v19 = vpop.xlane.xlu2 %2410 }
 0x259   : > { %v2751_v51 = vperm.slane %v2411_v19, %v6519_v10  ;;  %v2688_v19 = vperm.slane %v6505_v46, %v6519_v10  ;;  %v2697_v46 = vperm.slane %v6648_v35, %v6519_v10  ;;  %v2703_v35 = vperm.slane %v6767_v6, %v6519_v10 }
 0x25a   : > { %v2813_v5 = vsel %vm2805_vm8, %v2680_v3, %v2812_v27  ;;  %v2687_v3 = vperm.slane %v6503_v57, %v6519_v10  ;;  %v2698_v57 = vperm.slane %v6688_v8, %v6519_v10  ;;  %v2715_v6 = vperm.slane %v7002_v54, %v6519_v10 }
 0x25b   : > { %2929 = vxpose.xlu2.b32.cont [2/16] (narrow) %v2813_v5, 8  ;;  %v2201_v16 = vpop.xlane.xlu1 %2200  ;;  %v7027_v37 = vsel %vm2803_vm7, %v2751_v51, %v2874_v42  ;;  %v2699_v51 = vperm.slane %v6698_v34, %v6519_v10  ;;  %v2700_v5 = vperm.slane %v6723_v15, %v6519_v10  ;;  %v2701_v42 = vperm.slane %v6748_v18, %v6519_v10 }
 0x25c   : > { %v2681_v40 = vperm.slane %v2201_v16, %v6519_v10  ;;  %v2828_v16 = vsel %vm2793_vm2, %v2698_v57, %v2697_v46  ;;  %v2702_v15 = vperm.slane %v6742_v7, %v6519_v10  ;;  %v2704_v18 = vperm.slane %v6813_v56, %v6519_v10  ;;  %v8111_v46 = vld [vmem:[#allocation24_spill] sm:$0xff] }
 0x25d   : > { %v2714_v7 = vperm.slane %v6991_v17, %v6519_v10 }
 0x25f   : > { %v7029_v11 = vpop.xlane.xlu0 %2305 }
 0x260   : > { %v7035_v53 = vpop.xlane.xlu2 %2518 }
 0x263   : > { %v7031_v0 = vpop.xlane.xlu1 %2308 }
 0x267   : > { %v7033_v1 = vpop.xlane.xlu0 %2413 }
 0x268   : > { %v2204_v49 = vpop.xlane.xlu2 %2203 }
 0x269   : > { %v2682_v23 = vperm.slane %v2204_v49, %v6519_v10  ;;  %v2829_v49 = vsel %vm2795_vm3, %v2699_v51, %v2828_v16  ;;  %v8113_v16 = vld [vmem:[#allocation29_spill] sm:$0xff] }
 0x26a   : > { %v2830_v8 = vsel %vm2797_vm4, %v2700_v5, %v2829_v49  ;;  %v8112_v5 = vld [vmem:[#allocation28_spill] sm:$0xff]  ;;  %v8114_v49 = vld [vmem:[#allocation31_spill] sm:$0xff] }
 0x26b   : > { %v7037_v20 = vpop.xlane.xlu1 %2416  ;;  %v2814_v25 = vsel %vm2793_vm2, %v2682_v23, %v2681_v40  ;;  %v2831_v34 = vsel %vm2799_vm5, %v2701_v42, %v2830_v8  ;;  %v2716_v40 = vperm.slane %v7029_v11, %v6519_v10  ;;  %v2740_v42 = vperm.slane %v8112_v5, %v6519_v10 }
 0x26c   : > { %v2832_v61 = vsel %vm2801_vm6, %v2702_v15, %v2831_v34  ;;  %v2742_v8 = vperm.slane %v8114_v49, %v6519_v10  ;;  %v2743_v34 = vperm.slane %v6887_v36, %v6519_v10  ;;  %v2753_v36 = vperm.slane %v7037_v20, %v6519_v10  ;;  %v8128_v49 = vld [vmem:[#allocation21_spill] sm:$0xff] }
 0x26f   : > { %v7039_v4 = vpop.xlane.xlu0 %2521 }
 0x270   : > { %v2312_v56 = vpop.xlane.xlu2 %2311 }
 0x271   : > { %v2718_v17 = vperm.slane %v2312_v56, %v6519_v10 }
 0x273   : > { %v7041_v52 = vpop.xlane.xlu1 %2524 }
 0x277   : > { %v2207_v58 = vpop.xlane.xlu0 %2206 }
 0x278   : > { %v2683_v30 = vperm.slane %v2207_v58, %v6519_v10  ;;  %v2833_v58 = vsel %vm2803_vm7, %v2703_v35, %v2832_v61  ;;  %v2420_v35 = vpop.xlane.xlu2 %2419 }
 0x279   : > { %v2834_v23 = vsel %vm2805_vm8, %v2704_v18, %v2833_v58  ;;  %v2744_v18 = vperm.slane %v6896_v9, %v6519_v10 }
 0x27a   : > { %v2815_v41 = vsel %vm2795_vm3, %v2683_v30, %v2814_v25  ;;  %v2713_v30 = vperm.slane %v6984_v59, %v6519_v10  ;;  %v2717_v25 = vperm.slane %v7031_v0, %v6519_v10 }
 0x27b   : > { %v2210_v50 = vpop.xlane.xlu1 %2209 }
 0x27c   : > { %v2684_v39 = vperm.slane %v2210_v50, %v6519_v10 }
 0x27e   : > { %v2816_v33 = vsel %vm2797_vm4, %v2684_v39, %v2815_v41 }
 0x27f   : > { %v2817_v55 = vsel %vm2799_vm5, %v2685_v26, %v2816_v33  ;;  %v2315_v50 = vpop.xlane.xlu0 %2314  ;;  %v2842_v26 = vsel %vm2793_vm2, %v2714_v7, %v2713_v30  ;;  %v2754_v7 = vperm.slane %v2420_v35, %v6519_v10 }
 0x280   : > { %v2818_v27 = vsel %vm2801_vm6, %v2686_v13, %v2817_v55  ;;  %v2843_v54 = vsel %vm2795_vm3, %v2715_v6, %v2842_v26  ;;  %v2719_v41 = vperm.slane %v2315_v50, %v6519_v10  ;;  %v2731_v55 = vperm.slane %v6613_v22, %v6519_v10 }
 0x281   : > { %v2819_v62 = vsel %vm2803_vm7, %v2687_v3, %v2818_v27  ;;  %v2844_v59 = vsel %vm2797_vm4, %v2716_v40, %v2843_v54  ;;  %v2730_v3 = vperm.slane %v6598_v32, %v6519_v10  ;;  %v2732_v27 = vperm.slane %v6637_v29, %v6519_v10 }
 0x282   : > { %v2820_v44 = vsel %vm2805_vm8, %v2688_v19, %v2819_v62  ;;  %v2845_v11 = vsel %vm2799_vm5, %v2717_v25, %v2844_v59  ;;  %v2729_v19 = vperm.slane %v6586_v2, %v6519_v10  ;;  %v2733_v62 = vperm.slane %v6693_v14, %v6519_v10  ;;  %v8117_v59 = vld [vmem:[#allocation15_spill] sm:$0xff] }
 0x283   : > { %2930 = vxpose.xlu2.b32.cont [3/16] (narrow) %v2820_v44, 8  ;;  %v2318_v39 = vpop.xlane.xlu1 %2317  ;;  %v2846_v33 = vsel %vm2801_vm6, %v2718_v17, %v2845_v11  ;;  %v2735_v22 = vperm.slane %v6713_v28, %v6519_v10  ;;  %v2736_v29 = vperm.slane %v6737_v60, %v6519_v10  ;;  %v2738_v28 = vperm.slane %v8111_v46, %v6519_v10  ;;  %v8115_v17 = vld [vmem:[#allocation8_spill] sm:$0xff] }
 0x284   : > { %v2720_v13 = vperm.slane %v2318_v39, %v6519_v10  ;;  %v2847_v0 = vsel %vm2803_vm7, %v2719_v41, %v2846_v33  ;;  %v2856_v44 = vsel %vm2793_vm2, %v2730_v3, %v2729_v19  ;;  %v2877_v9 = vsel %vm2793_vm2, %v2754_v7, %v2753_v36  ;;  %v8116_v41 = vld [vmem:[#allocation13_spill] sm:$0xff]  ;;  %v8118_v33 = vld [vmem:[#allocation10_spill] sm:$0xff] }
 0x285   : > { %v2857_v32 = vsel %vm2795_vm3, %v2731_v55, %v2856_v44  ;;  %v2752_v39 = vperm.slane %v7033_v1, %v6519_v10  ;;  %v2757_v54 = vperm.slane %v8115_v17, %v6519_v10  ;;  %v2762_v20 = vperm.slane %v8116_v41, %v6519_v10 }
 0x286   : > { %v2858_v2 = vsel %vm2797_vm4, %v2732_v27, %v2857_v32  ;;  %v8120_v27 = vld [vmem:[#allocation9_spill] sm:$0xff] }
 0x287   : > { %v2859_v57 = vsel %vm2799_vm5, %v2733_v62, %v2858_v2  ;;  %v2423_v61 = vpop.xlane.xlu0 %2422  ;;  %v2876_v1 = vsel %vm2805_vm8, %v2752_v39, %v7027_v37  ;;  %v2759_v62 = vperm.slane %v8120_v27, %v6519_v10  ;;  %v8123_v37 = vld [vmem:[#allocation11_spill] sm:$0xff] }
 0x288   : > { %v2860_v14 = vsel %vm2801_vm6, %v2734_v48, %v2859_v57  ;;  %v2755_v56 = vperm.slane %v2423_v61, %v6519_v10  ;;  %v8121_v48 = vld [vmem:[#allocation14_spill] sm:$0xff]  ;;  %v2760_v57 = vperm.slane %v8123_v37, %v6519_v10  ;;  %v8131_v61 = vld [vmem:[#allocation23_spill] sm:$0xff] }
 0x289   : > { %v2861_v51 = vsel %vm2803_vm7, %v2735_v22, %v2860_v14  ;;  %v2764_v32 = vperm.slane %v8121_v48, %v6519_v10  ;;  %v8122_v22 = vld [vmem:[#allocation16_spill] sm:$0xff]  ;;  %v8124_v14 = vld [vmem:[#allocation18_spill] sm:$0xff] }
 0x28a   : > { %v2862_v60 = vsel %vm2805_vm8, %v2736_v29, %v2861_v51  ;;  %v2878_v25 = vsel %vm2795_vm3, %v2755_v56, %v2877_v9  ;;  %v2765_v2 = vperm.slane %v8122_v22, %v6519_v10 }
 0x28b   : > { %2931 = vxpose.xlu2.b32.cont [4/16] (narrow) %v2827_v45, 8  ;;  %v2741_v45 = vperm.slane %v8113_v16, %v6519_v10 }
 0x293   : > { %2932 = vxpose.xlu2.b32.cont [5/16] (narrow) %v2834_v23, 8  ;;  %v2426_v23 = vpop.xlane.xlu1 %2425 }
 0x294   : > { %v2756_v40 = vperm.slane %v2426_v23, %v6519_v10  ;;  %v8132_v23 = vld [vmem:[#allocation26_spill] sm:$0xff] }
 0x295   : > { %v2773_v7 = vperm.slane %v8132_v23, %v6519_v10 }
 0x296   : > { %v2879_v26 = vsel %vm2797_vm4, %v2756_v40, %v2878_v25  ;;  %v8134_v25 = vld [vmem:[#allocation25_spill] sm:$0xff] }
 0x297   : > { %v2880_v11 = vsel %vm2799_vm5, %v2757_v54, %v2879_v26  ;;  %v2774_v39 = vperm.slane %v8134_v25, %v6519_v10  ;;  %v8135_v26 = vld [vmem:[#allocation30_spill] sm:$0xff] }
 0x298   : > { %v2776_v17 = vperm.slane %v8135_v26, %v6519_v10 }
 0x29b   : > { %2933 = vxpose.xlu2.b32.cont [6/16] (narrow) %v6960_v12, 8  ;;  %v2848_v12 = vsel %vm2805_vm8, %v2720_v13, %v2847_v0  ;;  %v2763_v13 = vperm.slane %v8117_v59, %v6519_v10  ;;  %v2758_v0 = vperm.slane %v8118_v33, %v6519_v10  ;;  %v2786_v59 = vperm.slane %v7011_v47, %v6519_v10 }
 0x29c   : > { %v2785_v33 = vperm.slane %v6996_v21, %v6519_v10 }
 0x29d   : > { %v2881_v19 = vsel %vm2801_vm6, %v2758_v0, %v2880_v11  ;;  %v2528_v11 = vpop.xlane.xlu2 %2527  ;;  %v2788_v0 = vperm.slane %v7039_v4, %v6519_v10 }
 0x29e   : > { %v2882_v29 = vsel %vm2803_vm7, %v2759_v62, %v2881_v19  ;;  %v2905_v47 = vsel %vm2793_vm2, %v2786_v59, %v2785_v33 }
 0x29f   : > { %v2883_v51 = vsel %vm2805_vm8, %v2760_v57, %v2882_v29 }
 0x2a3   : > { %2934 = vxpose.xlu2.b32.cont [7/16] (narrow) %v2848_v12, 8  ;;  %v8119_v12 = vld [vmem:[#allocation12_spill] sm:$0xff] }
 0x2a4   : > { %v2761_v3 = vperm.slane %v8119_v12, %v6519_v10  ;;  %v2531_v12 = vpop.xlane.xlu0 %2530 }
 0x2a5   : > { %v2791_v19 = vperm.slane %v2531_v12, %v6519_v10 }
 0x2a6   : > { %v2884_v55 = vsel %vm2793_vm2, %v2762_v20, %v2761_v3  ;;  %v2789_v3 = vperm.slane %v7041_v52, %v6519_v10 }
 0x2a7   : > { %v2885_v44 = vsel %vm2795_vm3, %v2763_v13, %v2884_v55  ;;  %v2787_v13 = vperm.slane %v7035_v53, %v6519_v10  ;;  %v2790_v55 = vperm.slane %v2528_v11, %v6519_v10 }
 0x2a9   : > { %v2906_v53 = vsel %vm2795_vm3, %v2787_v13, %v2905_v47 }
 0x2aa   : > { %v2907_v21 = vsel %vm2797_vm4, %v2788_v0, %v2906_v53 }
 0x2ab   : > { %2935 = vxpose.xlu2.b32.cont [8/16] (narrow) %v6584_v63, 8  ;;  %v2737_v63 = vperm.slane %v6763_v38, %v6519_v10  ;;  %v2908_v27 = vsel %vm2799_vm5, %v2789_v3, %v2907_v21 }
 0x2ac   : > { %v2909_v62 = vsel %vm2801_vm6, %v2790_v55, %v2908_v27 }
 0x2ad   : > { %v2863_v38 = vsel %vm2793_vm2, %v2738_v28, %v2737_v63  ;;  %v2886_v63 = vsel %vm2797_vm4, %v2764_v32, %v2885_v44  ;;  %v8125_v28 = vlaneseq  ;;  %v2910_v52 = vsel %vm2803_vm7, %v2791_v19, %v2909_v62  ;;  %v5601_v44 = vld [vmem:[%s313_s22] ss:$0 sm:$0xff]  ;;  %s5750_s22 = sshra.s32 %s5264_s18, 4  ;;  %s5751_s22 = int_to_ptr.hbm [resolvable:$true] %s5750_s22 }
 0x2ae   : > { %v2864_v31 = vsel %vm2795_vm3, %v2739_v43, %v2863_v38  ;;  %v2766_v43 = vperm.slane %v8124_v14, %v6519_v10  ;;  %v2887_v46 = vsel %vm2799_vm5, %v2765_v2, %v2886_v63  ;;  %s5752_s23 = scalar_lea.hbm %s5751_s22, 8  ;;  %p5757_p2 = scmp.lt.s32.totalorder %s5751_s22, %s8081_s7 }
 0x2af   : > { %v2865_v15 = vsel %vm2797_vm4, %v2740_v42, %v2864_v31  ;;  %v7206_v5 = vshrl.u32 %v8125_v28, 7  ;;  %v8129_v31 = vld [vmem:[#allocation22_spill] sm:$0xff]  ;;  %p5753_p13 = scmp.ne.s32.totalorder %s5751_s22, %s5752_s23 }
 0x2b0   : > { %v2866_v58 = vsel %vm2799_vm5, %v2741_v45, %v2865_v15  ;;  %v2888_v42 = vsel %vm2801_vm6, %v2766_v43, %v2887_v46  ;;  %v8127_v45 = vld [vmem:[#allocation19_spill] sm:$0xff]  ;;  %v8130_v15 = vld [vmem:[#allocation20_spill] sm:$0xff] }
 0x2b1   : > { %v2867_v6 = vsel %vm2801_vm6, %v2742_v8, %v2866_v58  ;;  %5597 = vset.pattern.permute.xlu1 %v7206_v5  ;;  %v2768_v38 = vperm.slane %v8127_v45, %v6519_v10  ;;  %v2770_v8 = vperm.slane %v8128_v49, %v6519_v10  ;;  %v2772_v58 = vperm.slane %v8131_v61, %v6519_v10  ;;  %p5754_p0 = pnand %p5753_p13, %p5913_p5 }
 0x2b2   : > { %v2868_v30 = vsel %vm2803_vm7, %v2743_v34, %v2867_v6  ;;  %v2771_v34 = vperm.slane %v8129_v31, %v6519_v10  ;;  %vm2963_vm9 = vcmp.lt.s32.totalorder %v7206_v5, %v5601_v44 }
 0x2b3   : > { %2936 = vxpose.xlu2.b32.cont [9/16] (narrow) %v2862_v60, 8  ;;  %v2869_v50 = vsel %vm2805_vm8, %v2744_v18, %v2868_v30  ;;  %v8126_v60 = vld [vmem:[#allocation17_spill] sm:$0xff]  ;;  %v2769_v18 = vperm.slane %v8130_v15, %v6519_v10  ;;  %p5755_p1 = pneg %p5754_p0 }
 0x2b4   : > { %v2767_v16 = vperm.slane %v8126_v60, %v6519_v10 }
 0x2b5   : > { %v2891_v6 = vsel %vm2793_vm2, %v2770_v8, %v2769_v18 }
 0x2b6   : > { %v2889_v35 = vsel %vm2803_vm7, %v2767_v16, %v2888_v42  ;;  %v2892_v30 = vsel %vm2795_vm3, %v2771_v34, %v2891_v6 }
 0x2b7   : > { %v2890_v56 = vsel %vm2805_vm8, %v2768_v38, %v2889_v35  ;;  %v2893_v36 = vsel %vm2797_vm4, %v2772_v58, %v2892_v30 }
 0x2b8   : > { %v2894_v40 = vsel %vm2799_vm5, %v2773_v7, %v2893_v36 }
 0x2b9   : > { %v2895_v54 = vsel %vm2801_vm6, %v2774_v39, %v2894_v40 }
 0x2bb   : > { %2937 = vxpose.xlu2.b32.cont [10/16] (narrow) %v2869_v50, 8  ;;  %v8133_v50 = vld [vmem:[#allocation27_spill] sm:$0xff] }
 0x2bc   : > { %v2775_v9 = vperm.slane %v8133_v50, %v6519_v10 }
 0x2be   : > { %v2896_v41 = vsel %vm2803_vm7, %v2775_v9, %v2895_v54 }
 0x2bf   : > { %v2897_v20 = vsel %vm2805_vm8, %v2776_v17, %v2896_v41 }
 0x2c3   : > { %2938 = vxpose.xlu2.b32.cont [11/16] (narrow) %v2876_v1, 8  ;;  %v2534_v1 = vpop.xlane.xlu1 %2533 }
 0x2c4   : > { %v2792_v4 = vperm.slane %v2534_v1, %v6519_v10 }
 0x2cb   : > { %2939 = vxpose.xlu2.b32.cont [12/16] (narrow) %v2883_v51, 8 }
 0x2d3   : > { %2940 = vxpose.xlu2.b32.cont [13/16] (narrow) %v2890_v56, 8 }
 0x2db   : > { %2941 = vxpose.xlu2.b32.cont [14/16] (narrow) %v2897_v20, 8 }
 0x2e3   : > { %2942 = vxpose.xlu2.b32.cont [15/16] (narrow) %v6994_v24, 8  ;;  %v2911_v24 = vsel %vm2805_vm8, %v2792_v4, %v2910_v52 }
 0x2eb   : > { %2943 = vxpose.xlu2.b32.end [16/16] (narrow) %v2911_v24, 8 }
 0x30c   : > { %v2944_v48 = vpop.trf.xlu2 }
 0x30d   : > { %v2964_v32 = vsel %vm2963_vm9, %v2944_v48, -1e+09 }
 0x30e   : > { %v2965_v22 = vrot.slane %v2964_v32, 4 }
 0x310   : > { %v2966_v10 = vmax.f32 %v2964_v32, %v2965_v22 }
 0x312   : > { %v2967_v2 = vrot.slane %v2966_v10, 2 }
 0x314   : > { %v2968_v29 = vmax.f32 %v2966_v10, %v2967_v2 }
 0x316   : > { %v2969_v37 = vrot.slane %v2968_v29, 1 }
 0x318   : > { %v2970_v57 = vmax.f32 %v2968_v29, %v2969_v37 }
 0x31a   : > { %v2971_v63 = vsub.f32 %v2964_v32, %v2970_v57 }
 0x31c   : > { %v2972_v14 = vmul.f32 1.442695, %v2971_v63 }
 0x31e   : > { %5602 = vpow2.f32 %v2972_v14 }
 0x324   : > { %v5603_v43 = vpop.eup %5602 }
 0x325   : > { %v2974_v51 = vrot.slane %v5603_v43, 4 }
 0x327   : > { %v2975_v46 = vadd.f32 %v5603_v43, %v2974_v51 }
 0x329   : > { %v2976_v28 = vrot.slane %v2975_v46, 2 }
 0x32b   : > { %v2977_v42 = vadd.f32 %v2976_v28, %v2975_v46 }
 0x32d   : > { %v2978_v60 = vrot.slane %v2977_v42, 1 }
 0x32f   : > { %v2979_v16 = vadd.f32 %v2978_v60, %v2977_v42 }
 0x331   : > { %5604 = vrcp.f32 %v2979_v16 }
 0x337   : > { %v5605_v45 = vpop.eup %5604 }
 0x338   : > { %v2981_v38 = vmul.f32 %v5605_v45, %v5603_v43 }
 0x33a   : > { %2983 = vxpose.xlu0.b32.start.end [1/1] (short) %v2981_v38, 128  ;;  %2982 = vst [vmem:[%s7270_s20] sm:$0xff] %v2981_v38  ;;  %s5756_s20 = scalar_lea.hbm %s8081_s7, 16 }
 0x33b   : > { %p5758_p3 = scmp.lt.s32.totalorder %s5756_s20, %s5752_s23 }
 0x33d   : > { %p5759_p4 = por %p5758_p3, %p5757_p2 }
 0x33f   : > { %p5760_p7 = pnand %p5759_p4, %p5755_p1 }
 0x34d   : > { %5599 = vset.pattern.permute.xlu2 %v7206_v5 }
 0x3a1   : > { %5598 = vset.pattern.permute.xlu0 %v7206_v5 }
 0x3de   : > { %v2999_v49 = vpop.trf.xlu0 }
 0x3df   : > { %v3015_v8 = vperm.slane %v2999_v49, 0  ;;  %v3022_v34 = vperm.slane %v2999_v49, 1  ;;  %v3029_v15 = vperm.slane %v2999_v49, 2  ;;  %v3043_v58 = vperm.slane %v2999_v49, 4 }
 0x3e0   : > { %v3050_v5 = vperm.slane %v2999_v49, 5  ;;  %v3057_v56 = vperm.slane %v2999_v49, 6  ;;  %v3064_v36 = vperm.slane %v2999_v49, 7  ;;  %v3036_v39 = vperm.slane %v2999_v49, 3 }
 0x3e1   : > { %3020 = vperm.xlu1 %5597, %v3015_v8  }
 0x3e6   : > { %v7275_v31 = vpop.trf.xlu0 }
 0x3e7   : > { %v3071_v50 = vperm.slane %v7275_v31, 0  ;;  %v3078_v26 = vperm.slane %v7275_v31, 1  ;;  %v3085_v41 = vperm.slane %v7275_v31, 2  ;;  %v3092_v11 = vperm.slane %v7275_v31, 3 }
 0x3e8   : > { %v3099_v12 = vperm.slane %v7275_v31, 4  ;;  %v3106_v55 = vperm.slane %v7275_v31, 5  ;;  %v3113_v21 = vperm.slane %v7275_v31, 6  ;;  %v3120_v62 = vperm.slane %v7275_v31, 7 }
 0x3e9   : > { %3027 = vperm.xlu1 %5597, %v3022_v34  }
 0x3ee   : > { %v7277_v35 = vpop.trf.xlu0 }
 0x3ef   : > { %v3148_v18 = vperm.slane %v7277_v35, 3  ;;  %v3127_v48 = vperm.slane %v7277_v35, 0  ;;  %v3134_v29 = vperm.slane %v7277_v35, 1  ;;  %v3141_v14 = vperm.slane %v7277_v35, 2 }
 0x3f0   : > { %v3155_v42 = vperm.slane %v7277_v35, 4  ;;  %v3162_v38 = vperm.slane %v7277_v35, 5 }
 0x3f1   : > { %3034 = vperm.xlu1 %5597, %v3029_v15   ;;  %3153 = vperm.xlu2 %5599, %v3148_v18   ;;  %v3169_v15 = vperm.slane %v7277_v35, 6 }
 0x3f6   : > { %v7280_v61 = vpop.trf.xlu0 }
 0x3f9   : > { %3048 = vperm.xlu1 %5597, %v3043_v58  }
 0x3fe   : > { %v7282_v23 = vpop.trf.xlu0 }
 0x3ff   : > { %v3246_v7 = vperm.slane %v7282_v23, 1  ;;  %v3260_v6 = vperm.slane %v7282_v23, 3  ;;  %v3281_v30 = vperm.slane %v7282_v23, 6  ;;  %v3267_v17 = vperm.slane %v7282_v23, 4 }
 0x400   : > { %v3288_v59 = vperm.slane %v7282_v23, 7 }
 0x401   : > { %3055 = vperm.xlu1 %5597, %v3050_v5   ;;  %3251 = vperm.xlu2 %5599, %v3246_v7   ;;  %v3176_v7 = vperm.slane %v7277_v35, 7 }
 0x406   : > { %v7287_v40 = vpop.trf.xlu0 }
 0x407   : > { %v3302_v9 = vperm.slane %v7287_v40, 1  ;;  %v3323_v25 = vperm.slane %v7287_v40, 4  ;;  %v3344_v54 = vperm.slane %v7287_v40, 7  ;;  %v3309_v33 = vperm.slane %v7287_v40, 2 }
 0x408   : > { %v3330_v1 = vperm.slane %v7287_v40, 5 }
 0x409   : > { %3062 = vperm.xlu1 %5597, %v3057_v56   ;;  %3265 = vperm.xlu2 %5599, %v3260_v6  }
 0x40e   : > { %v7296_v20 = vpop.trf.xlu0 }
 0x40f   : > { %v3365_v13 = vperm.slane %v7296_v20, 2  ;;  %v3386_v0 = vperm.slane %v7296_v20, 5  ;;  %v3351_v53 = vperm.slane %v7296_v20, 0  ;;  %v3372_v4 = vperm.slane %v7296_v20, 3 }
 0x410   : > { %v3393_v44 = vperm.slane %v7296_v20, 6 }
 0x411   : > { %3069 = vperm.xlu1 %5597, %v3064_v36   ;;  %3286 = vperm.xlu2 %5599, %v3281_v30   ;;  %v3183_v30 = vperm.slane %v7280_v61, 0 }
 0x416   : > { %v7304_v3 = vpop.trf.xlu0 }
 0x417   : > { %v3407_v47 = vperm.slane %v7304_v3, 0  ;;  %v3428_v19 = vperm.slane %v7304_v3, 3  ;;  %v3449_v27 = vperm.slane %v7304_v3, 6  ;;  %v3414_v10 = vperm.slane %v7304_v3, 1 }
 0x418   : > { %v3435_v57 = vperm.slane %v7304_v3, 4  ;;  %v3456_v51 = vperm.slane %v7304_v3, 7 }
 0x419   : > { %3076 = vperm.xlu1 %5597, %v3071_v50   ;;  %3307 = vperm.xlu2 %5599, %v3302_v9  }
 0x41e   : > { %v7317_v24 = vpop.trf.xlu0 }
 0x41f   : > { %v3470_v32 = vperm.slane %v7317_v24, 1  ;;  %v3491_v2 = vperm.slane %v7317_v24, 4  ;;  %v3512_v63 = vperm.slane %v7317_v24, 7  ;;  %v3477_v16 = vperm.slane %v7317_v24, 2 }
 0x420   : > { %3041 = vperm.xlu0 %5598, %v3036_v39   ;;  %v3498_v8 = vperm.slane %v7317_v24, 5  ;;  %v3190_v39 = vperm.slane %v7280_v61, 1 }
 0x421   : > { %3083 = vperm.xlu1 %5597, %v3078_v26   ;;  %3328 = vperm.xlu2 %5599, %v3323_v25  }
 0x426   : > { %v7335_v46 = vpop.trf.xlu0 }
 0x427   : > { %v3533_v28 = vperm.slane %v7335_v46, 2  ;;  %v3554_v45 = vperm.slane %v7335_v46, 5  ;;  %v3519_v58 = vperm.slane %v7335_v46, 0  ;;  %v3540_v56 = vperm.slane %v7335_v46, 3 }
 0x428   : > { %3272 = vperm.xlu0 %5598, %v3267_v17   ;;  %v3561_v9 = vperm.slane %v7335_v46, 6 }
 0x429   : > { %3090 = vperm.xlu1 %5597, %v3085_v41   ;;  %3349 = vperm.xlu2 %5599, %v3344_v54   ;;  %v3197_v41 = vperm.slane %v7280_v61, 2 }
 0x42e   : > { %v7347_v31 = vpop.trf.xlu0 }
 0x42f   : > { %v3575_v34 = vperm.slane %v7347_v31, 0  ;;  %v3596_v5 = vperm.slane %v7347_v31, 3  ;;  %v3617_v36 = vperm.slane %v7347_v31, 6  ;;  %v3582_v17 = vperm.slane %v7347_v31, 1 }
 0x430   : > { %3293 = vperm.xlu0 %5598, %v3288_v59  }
 0x431   : > { %3097 = vperm.xlu1 %5597, %v3092_v11   ;;  %3370 = vperm.xlu2 %5599, %v3365_v13   ;;  %v3603_v13 = vperm.slane %v7347_v31, 4 }
 0x436   : > { %v7364_v25 = vpop.trf.xlu0 }
 0x437   : > { %v3638_v35 = vperm.slane %v7364_v25, 1  ;;  %v3659_v54 = vperm.slane %v7364_v25, 4  ;;  %v3680_v11 = vperm.slane %v7364_v25, 7 }
 0x438   : > { %3314 = vperm.xlu0 %5598, %v3309_v33   ;;  %v3204_v33 = vperm.slane %v7280_v61, 3 }
 0x439   : > { %3104 = vperm.xlu1 %5597, %v3099_v12   ;;  %3391 = vperm.xlu2 %5599, %v3386_v0   ;;  %v3624_v12 = vperm.slane %v7347_v31, 7 }
 0x440   : > { %3335 = vperm.xlu0 %5598, %v3330_v1   ;;  %v7381_v1 = vpop.trf.xlu0 }
 0x441   : > { %3111 = vperm.xlu1 %5597, %v3106_v55   ;;  %3412 = vperm.xlu2 %5599, %v3407_v47   ;;  %v3701_v47 = vperm.slane %v7381_v1, 2  ;;  %v3211_v55 = vperm.slane %v7280_v61, 4 }
 0x448   : > { %3356 = vperm.xlu0 %5598, %v3351_v53  }
 0x449   : > { %3118 = vperm.xlu1 %5597, %v3113_v21   ;;  %3433 = vperm.xlu2 %5599, %v3428_v19   ;;  %v3645_v19 = vperm.slane %v7364_v25, 2  ;;  %v3722_v21 = vperm.slane %v7381_v1, 5 }
 0x450   : > { %3377 = vperm.xlu0 %5598, %v3372_v4   ;;  %v3218_v4 = vperm.slane %v7280_v61, 5 }
 0x451   : > { %3125 = vperm.xlu1 %5597, %v3120_v62   ;;  %3454 = vperm.xlu2 %5599, %v3449_v27   ;;  %v3666_v62 = vperm.slane %v7364_v25, 5 }
 0x453   : > { %v7315_v52 = vpop.permute.xlu1 %3020 }
 0x458   : > { %3398 = vperm.xlu0 %5598, %v3393_v44   ;;  %v7393_v44 = vpop.trf.xlu0 }
 0x459   : > { %3132 = vperm.xlu1 %5597, %v3127_v48   ;;  %3475 = vperm.xlu2 %5599, %v3470_v32   ;;  %v3743_v48 = vperm.slane %v7393_v44, 0  ;;  %v3225_v32 = vperm.slane %v7280_v61, 6 }
 0x45b   : > { %v7322_v22 = vpop.permute.xlu1 %3027 }
 0x460   : > { %3419 = vperm.xlu0 %5598, %v3414_v10  }
 0x461   : > { %3139 = vperm.xlu1 %5597, %v3134_v29   ;;  %3496 = vperm.xlu2 %5599, %v3491_v2   ;;  %v3687_v2 = vperm.slane %v7381_v1, 0  ;;  %v3764_v29 = vperm.slane %v7393_v44, 3 }
 0x463   : > { %v7327_v37 = vpop.permute.xlu1 %3034 }
 0x468   : > { %3440 = vperm.xlu0 %5598, %v3435_v57   ;;  %v3232_v57 = vperm.slane %v7280_v61, 7 }
 0x469   : > { %3146 = vperm.xlu1 %5597, %v3141_v14   ;;  %3517 = vperm.xlu2 %5599, %v3512_v63   ;;  %v5608_v14 = vld [vmem:[%s5958_s9 + $0x80] sm:$0xff] }
 0x46b   : > { %v7332_v43 = vpop.permute.xlu1 %3048 }
 0x470   : > { %3461 = vperm.xlu0 %5598, %v3456_v51  }
 0x471   : > { %3160 = vperm.xlu1 %5597, %v3155_v42   ;;  %3538 = vperm.xlu2 %5599, %v3533_v28   ;;  %v3708_v28 = vperm.slane %v7381_v1, 3 }
 0x473   : > { %v7339_v60 = vpop.permute.xlu1 %3055 }
 0x478   : > { %3482 = vperm.xlu0 %5598, %v3477_v16   ;;  %v3785_v16 = vperm.slane %v7393_v44, 6 }
 0x479   : > { %3167 = vperm.xlu1 %5597, %v3162_v38   ;;  %3559 = vperm.xlu2 %5599, %v3554_v45   ;;  %v3239_v38 = vperm.slane %v7282_v23, 0 }
 0x47b   : > { %v7344_v49 = vpop.permute.xlu1 %3062 }
 0x480   : > { %3503 = vperm.xlu0 %5598, %v3498_v8  }
 0x481   : > { %3174 = vperm.xlu1 %5597, %v3169_v15   ;;  %3580 = vperm.xlu2 %5599, %v3575_v34   ;;  %v5609_v34 = vld [vmem:[%s5958_s9 + $0x88] sm:$0xff] }
 0x483   : > { %v7351_v18 = vpop.permute.xlu1 %3069 }
 0x488   : > { %3524 = vperm.xlu0 %5598, %v3519_v58   ;;  %v3729_v58 = vperm.slane %v7381_v1, 6 }
 0x489   : > { %3181 = vperm.xlu1 %5597, %v3176_v7   ;;  %3601 = vperm.xlu2 %5599, %v3596_v5   ;;  %v7409_v5 = vpop.trf.xlu0 }
 0x48b   : > { %v7356_v6 = vpop.permute.xlu1 %3076 }
 0x490   : > { %3545 = vperm.xlu0 %5598, %v3540_v56  }
 0x491   : > { %3188 = vperm.xlu1 %5597, %v3183_v30   ;;  %3622 = vperm.xlu2 %5599, %v3617_v36   ;;  %v3806_v30 = vperm.slane %v7409_v5, 1 }
 0x493   : > { %v7361_v50 = vpop.permute.xlu1 %3083 }
 0x498   : > { %3566 = vperm.xlu0 %5598, %v3561_v9   ;;  %v3253_v9 = vperm.slane %v7282_v23, 2 }
 0x499   : > { %3195 = vperm.xlu1 %5597, %v3190_v39   ;;  %3643 = vperm.xlu2 %5599, %v3638_v35  }
 0x49b   : > { %v7368_v26 = vpop.permute.xlu1 %3090 }
 0x4a0   : > { %3587 = vperm.xlu0 %5598, %v3582_v17  }
 0x4a1   : > { %3202 = vperm.xlu1 %5597, %v3197_v41   ;;  %3664 = vperm.xlu2 %5599, %v3659_v54   ;;  %v3750_v41 = vperm.slane %v7393_v44, 1 }
 0x4a3   : > { %v7373_v59 = vpop.permute.xlu1 %3097 }
 0x4a8   : > { %3608 = vperm.xlu0 %5598, %v3603_v13  }
 0x4a9   : > { %3209 = vperm.xlu1 %5597, %v3204_v33   ;;  %3685 = vperm.xlu2 %5599, %v3680_v11   ;;  %v3827_v33 = vperm.slane %v7409_v5, 4 }
 0x4ab   : > { %v7378_v0 = vpop.permute.xlu1 %3104 }
 0x4b0   : > { %3629 = vperm.xlu0 %5598, %v3624_v12  }
 0x4b1   : > { %3216 = vperm.xlu1 %5597, %v3211_v55   ;;  %3706 = vperm.xlu2 %5599, %v3701_v47   ;;  %v3274_v47 = vperm.slane %v7282_v23, 5  ;;  %v3848_v23 = vperm.slane %v7409_v5, 7 }
 0x4b3   : > { %v7385_v53 = vpop.permute.xlu1 %3111 }
 0x4b8   : > { %3650 = vperm.xlu0 %5598, %v3645_v19  }
 0x4b9   : > { %3223 = vperm.xlu1 %5597, %v3218_v4   ;;  %3727 = vperm.xlu2 %5599, %v3722_v21  }
 0x4bb   : > { %v7390_v27 = vpop.permute.xlu1 %3118 }
 0x4c0   : > { %3671 = vperm.xlu0 %5598, %v3666_v62   ;;  %v3771_v62 = vperm.slane %v7393_v44, 4 }
 0x4c1   : > { %3230 = vperm.xlu1 %5597, %v3225_v32   ;;  %3748 = vperm.xlu2 %5599, %v3743_v48   ;;  %v5610_v48 = vld [vmem:[%s5958_s9 + $0x8] sm:$0xff] }
 0x4c2   : > { %v3912_v32 = vmul.f32 %v5610_v48, %v7322_v22 }
 0x4c3   : > { %v7397_v10 = vpop.permute.xlu1 %3125 }
 0x4c8   : > { %3692 = vperm.xlu0 %5598, %v3687_v2   ;;  %v7427_v2 = vpop.trf.xlu0 }
 0x4c9   : > { %3237 = vperm.xlu1 %5597, %v3232_v57   ;;  %3769 = vperm.xlu2 %5599, %v3764_v29   ;;  %8136 = vst [vmem:[#allocation24_spill] sm:$0xff] %v7427_v2  ;;  %v5611_v29 = vld [vmem:[%s5958_s9] sm:$0xff]  ;;  %v3890_v48 = vperm.slane %v7427_v2, 5 }
 0x4ca   : > { %v3911_v57 = vmul.f32 %v5611_v29, %v7315_v52  ;;  %v5617_v29 = vld [vmem:[%s5958_s9 + $0x98] sm:$0xff] }
 0x4cb   : > { %v3133_v63 = vpop.permute.xlu1 %3132 }
 0x4cc   : > { %v3927_v51 = vmul.f32 %v5608_v14, %v3133_v63  ;;  %v3295_v63 = vperm.slane %v7287_v40, 0  ;;  %v4046_v14 = vsel %vm480_vm0, %v3912_v32, 0.0  ;;  %v4039_v22 = vsel %vm480_vm0, %v3911_v57, 0.0 }
 0x4ce   : > { %v4151_v42 = vsel %vm480_vm0, %v3927_v51, 0.0  ;;  %v5612_v51 = vld [vmem:[%s5958_s9 + $0x10] sm:$0xff] }
 0x4cf   : > { %v4152_v45 = vrot.slane %v4151_v42, 4 }
 0x4d0   : > { %3713 = vperm.xlu0 %5598, %v3708_v28   ;;  %v3913_v28 = vmul.f32 %v5612_v51, %v7327_v37  ;;  %v3869_v37 = vperm.slane %v7427_v2, 2 }
 0x4d1   : > { %v4153_v8 = vadd.f32 %v4152_v45, %v4151_v42  ;;  %3244 = vperm.xlu1 %5597, %v3239_v38   ;;  %3790 = vperm.xlu2 %5599, %v3785_v16   ;;  %v4047_v16 = vrot.slane %v4046_v14, 4  ;;  %v3792_v45 = vperm.slane %v7393_v44, 7  ;;  %v4040_v38 = vrot.slane %v4039_v22, 4 }
 0x4d2   : > { %v4053_v52 = vsel %vm480_vm0, %v3913_v28, 0.0 }
 0x4d3   : > { %v3140_v61 = vpop.permute.xlu1 %3139  ;;  %v4154_v7 = vrot.slane %v4153_v8, 2 }
 0x4d4   : > { %v3928_v15 = vmul.f32 %v5609_v34, %v3140_v61  ;;  %v5613_v61 = vld [vmem:[%s5958_s9 + $0x20] sm:$0xff] }
 0x4d5   : > { %v4155_v35 = vadd.f32 %v4154_v7, %v4153_v8  ;;  %v3154_v8 = vpop.permute.xlu2 %3153  ;;  %v3915_v34 = vmul.f32 %v5613_v61, %v7332_v43  ;;  %v3042_v7 = vpop.permute.xlu0 %3041 }
 0x4d6   : > { %v4158_v56 = vsel %vm480_vm0, %v3928_v15, 0.0  ;;  %v5614_v15 = vld [vmem:[%s5958_s9 + $0x28] sm:$0xff] }
 0x4d7   : > { %v4159_v36 = vrot.slane %v4158_v56, 4  ;;  %v4156_v13 = vrot.slane %v4155_v35, 1 }
 0x4d8   : > { %3734 = vperm.xlu0 %5598, %v3729_v58   ;;  %v3916_v58 = vmul.f32 %v5614_v15, %v7339_v60 }
 0x4d9   : > { %v4160_v39 = vadd.f32 %v4159_v36, %v4158_v56  ;;  %3258 = vperm.xlu1 %5597, %v3253_v9   ;;  %3811 = vperm.xlu2 %5599, %v3806_v30   ;;  %v4157_v55 = vadd.f32 %v4156_v13, %v4155_v35  ;;  %v3316_v56 = vperm.slane %v7287_v40, 3  ;;  %v4048_v30 = vadd.f32 %v4047_v16, %v4046_v14 }
 0x4da   : > { %v4054_v36 = vrot.slane %v4053_v52, 4  ;;  %v4041_v9 = vadd.f32 %v4040_v38, %v4039_v22  ;;  %v4067_v35 = vsel %vm480_vm0, %v3915_v34, 0.0  ;;  %v4074_v43 = vsel %vm480_vm0, %v3916_v58, 0.0  ;;  %v5619_v58 = vld [vmem:[%s5958_s9 + $0x40] sm:$0xff] }
 0x4db   : > { %v4161_v17 = vrot.slane %v4160_v39, 2  ;;  %v7414_v54 = vpop.permute.xlu1 %3146 }
 0x4dd   : > { %v4162_v11 = vadd.f32 %v4161_v17, %v4160_v39  ;;  %v5615_v39 = vld [vmem:[%s5958_s9 + $0x18] sm:$0xff] }
 0x4de   : > { %v3914_v17 = vmul.f32 %v5615_v39, %v3042_v7  ;;  %v3919_v7 = vmul.f32 %v5619_v58, %v7356_v6  ;;  %v3358_v39 = vperm.slane %v7296_v20, 1 }
 0x4df   : > { %v4163_v12 = vrot.slane %v4162_v11, 1 }
 0x4e0   : > { %3755 = vperm.xlu0 %5598, %v3750_v41   ;;  %v5616_v41 = vld [vmem:[%s5958_s9 + $0x30] sm:$0xff] }
 0x4e1   : > { %v4164_v19 = vadd.f32 %v4163_v12, %v4162_v11  ;;  %3279 = vperm.xlu1 %5597, %v3274_v47   ;;  %3832 = vperm.xlu2 %5599, %v3827_v33   ;;  %v3917_v13 = vmul.f32 %v5616_v41, %v7344_v49  ;;  %v4049_v11 = vrot.slane %v4048_v30, 2  ;;  %v4055_v33 = vadd.f32 %v4054_v36, %v4053_v52  ;;  %v5618_v52 = vld [vmem:[%s5958_s9 + $0x38] sm:$0xff] }
 0x4e2   : > { %v3813_v12 = vperm.slane %v7409_v5, 2  ;;  %v4068_v47 = vrot.slane %v4067_v35, 4  ;;  %v3930_v49 = vmul.f32 %v5617_v29, %v3154_v8  ;;  %v3918_v38 = vmul.f32 %v5618_v52, %v7351_v18  ;;  %v5622_v29 = vld [vmem:[%s5958_s9 + $0x58] sm:$0xff] }
 0x4e3   : > { %v7420_v21 = vsel %vm2793_vm2, %v4164_v19, %v4157_v55  ;;  %v7422_v4 = vpop.permute.xlu1 %3160  ;;  %v4042_v55 = vrot.slane %v4041_v9, 2  ;;  %v4075_v19 = vrot.slane %v4074_v43, 4  ;;  %v4081_v32 = vsel %vm480_vm0, %v3917_v13, 0.0 }
 0x4e4   : > { %v4050_v57 = vadd.f32 %v4049_v11, %v4048_v30  ;;  %v4056_v14 = vrot.slane %v4055_v33, 2  ;;  %v4069_v51 = vadd.f32 %v4068_v47, %v4067_v35  ;;  %v4088_v18 = vsel %vm480_vm0, %v3918_v38, 0.0 }
 0x4e5   : > { %v4043_v22 = vadd.f32 %v4042_v55, %v4041_v9  ;;  %v4076_v16 = vadd.f32 %v4075_v19, %v4074_v43  ;;  %v4095_v13 = vsel %vm480_vm0, %v3919_v7, 0.0  ;;  %v5625_v7 = vld [vmem:[%s5958_s9 + $0x70] sm:$0xff] }
 0x4e6   : > { %v4051_v8 = vrot.slane %v4050_v57, 1  ;;  %v4057_v34 = vadd.f32 %v4056_v14, %v4055_v33  ;;  %v4070_v15 = vrot.slane %v4069_v51, 2  ;;  %v5620_v33 = vld [vmem:[%s5958_s9 + $0x48] sm:$0xff]  ;;  %v4096_v14 = vrot.slane %v4095_v13, 4 }
 0x4e7   : > { %v4044_v30 = vrot.slane %v4043_v22, 1  ;;  %v4077_v36 = vrot.slane %v4076_v16, 2  ;;  %v3920_v6 = vmul.f32 %v5620_v33, %v7361_v50 }
 0x4e8   : > { %3776 = vperm.xlu0 %5598, %v3771_v62   ;;  %v4060_v62 = vsel %vm480_vm0, %v3914_v17, 0.0  ;;  %v4052_v17 = vadd.f32 %v4051_v8, %v4050_v57  ;;  %v4058_v43 = vrot.slane %v4057_v34, 1  ;;  %v4071_v41 = vadd.f32 %v4070_v15, %v4069_v51  ;;  %v5623_v51 = vld [vmem:[%s5958_s9 + $0x60] sm:$0xff]  ;;  %v7490_v8 = vpop.permute.xlu0 %3272 }
 0x4e9   : > { %3300 = vperm.xlu1 %5597, %v3295_v63   ;;  %3853 = vperm.xlu2 %5599, %v3848_v23   ;;  %v3337_v23 = vperm.slane %v7287_v40, 6  ;;  %v7460_v63 = vpop.permute.xlu2 %3251  ;;  %v4061_v28 = vrot.slane %v4060_v62, 4  ;;  %v4172_v40 = vsel %vm480_vm0, %v3930_v49, 0.0  ;;  %v4078_v55 = vadd.f32 %v4077_v36, %v4076_v16 }
 0x4ea   : > { %v4173_v35 = vrot.slane %v4172_v40, 4  ;;  %v3922_v49 = vmul.f32 %v5622_v29, %v7373_v59  ;;  %v4059_v16 = vadd.f32 %v4058_v43, %v4057_v34  ;;  %v3925_v34 = vmul.f32 %v5625_v7, %v7390_v27  ;;  %v5627_v43 = vld [vmem:[%s5958_s9 + $0x90] sm:$0xff] }
 0x4eb   : > { %v7437_v42 = vpop.permute.xlu1 %3167  ;;  %v4079_v38 = vrot.slane %v4078_v55, 1  ;;  %v3876_v29 = vperm.slane %v7427_v2, 3  ;;  %v5630_v7 = vld [vmem:[%s5958_s9 + $0xb0] sm:$0xff] }
 0x4ed   : > { %v7507_v27 = vadd.f32 %v4079_v38, %v4078_v55  ;;  %v5629_v38 = vld [vmem:[%s5958_s9 + $0xa8] sm:$0xff] }
 0x4f0   : > { %3797 = vperm.xlu0 %5598, %v3792_v45   ;;  %v4082_v45 = vrot.slane %v4081_v32, 4 }
 0x4f1   : > { %3321 = vperm.xlu1 %5597, %v3316_v56   ;;  %3874 = vperm.xlu2 %5599, %v3869_v37   ;;  %v3834_v37 = vperm.slane %v7409_v5, 5  ;;  %v4062_v56 = vadd.f32 %v4061_v28, %v4060_v62  ;;  %v7475_v47 = vpop.permute.xlu2 %3265  ;;  %v4089_v62 = vrot.slane %v4088_v18, 4  ;;  %v3923_v28 = vmul.f32 %v5623_v51, %v7378_v0  ;;  %v5628_v51 = vld [vmem:[%s5958_s9 + $0xa0] sm:$0xff] }
 0x4f2   : > { %v4083_v9 = vadd.f32 %v4082_v45, %v4081_v32  ;;  %v5621_v32 = vld [vmem:[%s5958_s9 + $0x50] sm:$0xff]  ;;  %v4072_v45 = vrot.slane %v4071_v41, 1  ;;  %v4116_v0 = vsel %vm480_vm0, %v3922_v49, 0.0 }
 0x4f3   : > { %v7452_v60 = vpop.permute.xlu1 %3174  ;;  %v4063_v11 = vrot.slane %v4062_v56, 2  ;;  %v4090_v59 = vadd.f32 %v4089_v62, %v4088_v18  ;;  %v4137_v62 = vsel %vm480_vm0, %v3925_v34, 0.0 }
 0x4f4   : > { %v4084_v19 = vrot.slane %v4083_v9, 2  ;;  %v3933_v34 = vmul.f32 %v5630_v7, %v7452_v60 }
 0x4f5   : > { %v4064_v52 = vadd.f32 %v4063_v11, %v4062_v56  ;;  %v3379_v56 = vperm.slane %v7296_v20, 4  ;;  %v3929_v11 = vmul.f32 %v5627_v43, %v7414_v54 }
 0x4f8   : > { %3818 = vperm.xlu0 %5598, %v3813_v12   ;;  %v4045_v12 = vadd.f32 %v4044_v30, %v4043_v22  ;;  %v3855_v22 = vperm.slane %v7427_v2, 0  ;;  %v4097_v30 = vadd.f32 %v4096_v14, %v4095_v13  ;;  %v4117_v13 = vrot.slane %v4116_v0, 4 }
 0x4f9   : > { %3342 = vperm.xlu1 %5597, %v3337_v23   ;;  %3895 = vperm.xlu2 %5599, %v3890_v48   ;;  %v7477_v48 = vadd.f32 %v4173_v35, %v4172_v40  ;;  %v3921_v23 = vmul.f32 %v5621_v32, %v7368_v26  ;;  %v4102_v26 = vsel %vm480_vm0, %v3920_v6, 0.0  ;;  %v4085_v40 = vadd.f32 %v4084_v19, %v4083_v9  ;;  %v5626_v35 = vld [vmem:[%s5958_s9 + $0x78] sm:$0xff]  ;;  %v7513_v32 = vpop.permute.xlu2 %3286 }
 0x4fa   : > { %v5063_v50 = vsel %vm2793_vm2, %v4052_v17, %v4045_v12  ;;  %v4103_v36 = vrot.slane %v4102_v26, 4  ;;  %v4123_v9 = vsel %vm480_vm0, %v3923_v28, 0.0  ;;  %v3926_v18 = vmul.f32 %v5626_v35, %v7397_v10  ;;  %v7525_v35 = vpop.permute.xlu0 %3293 }
 0x4fb   : > { %v7464_v61 = vpop.permute.xlu1 %3181  ;;  %v4109_v58 = vsel %vm480_vm0, %v3921_v23, 0.0  ;;  %v4065_v17 = vrot.slane %v4064_v52, 1  ;;  %v4086_v12 = vrot.slane %v4085_v40, 1  ;;  %v4091_v19 = vrot.slane %v4090_v59, 2 }
 0x4fc   : > { %v4110_v33 = vrot.slane %v4109_v58, 4  ;;  %v4124_v10 = vrot.slane %v4123_v9, 4  ;;  %v4098_v23 = vrot.slane %v4097_v30, 2  ;;  %v4104_v54 = vadd.f32 %v4103_v36, %v4102_v26 }
 0x4fd   : > { %v4144_v55 = vsel %vm480_vm0, %v3926_v18, 0.0  ;;  %v4066_v49 = vadd.f32 %v4065_v17, %v4064_v52  ;;  %v4165_v14 = vsel %vm480_vm0, %v3929_v11, 0.0  ;;  %v3931_v28 = vmul.f32 %v5628_v51, %v7422_v4  ;;  %v5631_v17 = vld [vmem:[%s5958_s9 + $0xb8] sm:$0xff] }
 0x4fe   : > { %v4145_v26 = vrot.slane %v4144_v55, 4  ;;  %v3400_v52 = vperm.slane %v7296_v20, 7  ;;  %v4092_v36 = vadd.f32 %v4091_v19, %v4090_v59  ;;  %v4166_v18 = vrot.slane %v4165_v14, 4 }
 0x4ff   : > { %v3934_v4 = vmul.f32 %v5631_v17, %v7464_v61  ;;  %v3897_v19 = vperm.slane %v7427_v2, 6 }
 0x500   : > { %3839 = vperm.xlu0 %5598, %v3834_v37   ;;  %v5624_v37 = vld [vmem:[%s5958_s9 + $0x68] sm:$0xff]  ;;  %v4167_v61 = vadd.f32 %v4166_v18, %v4165_v14 }
 0x501   : > { %3363 = vperm.xlu1 %5597, %v3358_v39   ;;  %v3924_v15 = vmul.f32 %v5624_v37, %v7385_v53  ;;  %v5064_v39 = vsel %vm2795_vm3, %v4059_v16, %v5063_v50  ;;  %v7503_v53 = vadd.f32 %v4072_v45, %v4071_v41  ;;  %v4118_v16 = vadd.f32 %v4117_v13, %v4116_v0 }
 0x502   : > { %v4138_v45 = vrot.slane %v4137_v62, 4  ;;  %v3932_v37 = vmul.f32 %v5629_v38, %v7437_v42  ;;  %v4105_v0 = vrot.slane %v4104_v54, 2  ;;  %v4179_v42 = vsel %vm480_vm0, %v3931_v28, 0.0 }
 0x503   : > { %v7483_v57 = vpop.permute.xlu1 %3188  ;;  %v4130_v6 = vsel %vm480_vm0, %v3924_v15, 0.0  ;;  %v4125_v15 = vadd.f32 %v4124_v10, %v4123_v9  ;;  %v5065_v9 = vsel %vm2797_vm4, %v4066_v49, %v5064_v39  ;;  %v4193_v13 = vsel %vm480_vm0, %v3933_v34, 0.0 }
 0x504   : > { %v4131_v50 = vrot.slane %v4130_v6, 4  ;;  %v4139_v11 = vadd.f32 %v4138_v45, %v4137_v62  ;;  %v4186_v20 = vsel %vm480_vm0, %v3932_v37, 0.0  ;;  %v4106_v10 = vadd.f32 %v4105_v0, %v4104_v54 }
 0x505   : > { %v4126_v59 = vrot.slane %v4125_v15, 2  ;;  %v4187_v39 = vrot.slane %v4186_v20, 4  ;;  %v5066_v62 = vsel %vm2799_vm5, %v7503_v53, %v5065_v9  ;;  %v4093_v49 = vrot.slane %v4092_v36, 1 }
 0x506   : > { %v4132_v43 = vadd.f32 %v4131_v50, %v4130_v6  ;;  %v4200_v6 = vsel %vm480_vm0, %v3934_v4, 0.0  ;;  %v4140_v50 = vrot.slane %v4139_v11, 2  ;;  %v4194_v51 = vrot.slane %v4193_v13, 4 }
 0x507   : > { %v4201_v14 = vrot.slane %v4200_v6, 4  ;;  %v3421_v38 = vperm.slane %v7304_v3, 2  ;;  %v4127_v37 = vadd.f32 %v4126_v59, %v4125_v15  ;;  %v5067_v54 = vsel %vm2801_vm6, %v7507_v27, %v5066_v62 }
 0x508   : > { %3860 = vperm.xlu0 %5598, %v3855_v22   ;;  %v4111_v22 = vadd.f32 %v4110_v33, %v4109_v58  ;;  %v4099_v58 = vadd.f32 %v4098_v23, %v4097_v30  ;;  %v4146_v33 = vadd.f32 %v4145_v26, %v4144_v55  ;;  %v4180_v30 = vrot.slane %v4179_v42, 4 }
 0x509   : > { %3384 = vperm.xlu1 %5597, %v3379_v56   ;;  %v4087_v56 = vadd.f32 %v4086_v12, %v4085_v40  ;;  %v4119_v40 = vrot.slane %v4118_v16, 2  ;;  %v4133_v23 = vrot.slane %v4132_v43, 2  ;;  %v4168_v26 = vrot.slane %v4167_v61, 2 }
 0x50a   : > { %v4112_v60 = vrot.slane %v4111_v22, 2  ;;  %v4147_v45 = vrot.slane %v4146_v33, 2  ;;  %v4181_v7 = vadd.f32 %v4180_v30, %v4179_v42  ;;  %v4100_v34 = vrot.slane %v4099_v58, 1 }
 0x50b   : > { %v7511_v41 = vpop.permute.xlu1 %3195  ;;  %v4120_v28 = vadd.f32 %v4119_v40, %v4118_v16  ;;  %v4107_v53 = vrot.slane %v4106_v10, 1  ;;  %v4188_v18 = vadd.f32 %v4187_v39, %v4186_v20  ;;  %v7545_v16 = vpop.permute.xlu0 %3314  ;;  %v4141_v4 = vadd.f32 %v4140_v50, %v4139_v11 }
 0x50c   : > { %v4113_v55 = vadd.f32 %v4112_v60, %v4111_v22  ;;  %v4175_v22 = vrot.slane %v7477_v48, 2  ;;  %v4195_v0 = vadd.f32 %v4194_v51, %v4193_v13  ;;  %v4148_v15 = vadd.f32 %v4147_v45, %v4146_v33 }
 0x50d   : > { %v4121_v9 = vrot.slane %v4120_v28, 1  ;;  %v4202_v60 = vadd.f32 %v4201_v14, %v4200_v6  ;;  %v5068_v40 = vsel %vm2803_vm7, %v4087_v56, %v5067_v54  ;;  %v4094_v59 = vadd.f32 %v4093_v49, %v4092_v36 }
 0x50e   : > { %v4114_v17 = vrot.slane %v4113_v55, 1  ;;  %v4128_v27 = vrot.slane %v4127_v37, 1  ;;  %v4169_v30 = vadd.f32 %v4168_v26, %v4167_v61  ;;  %v4108_v20 = vadd.f32 %v4107_v53, %v4106_v10 }
 0x50f   : > { %v4189_v39 = vrot.slane %v4188_v18, 2  ;;  %v4196_v2 = vrot.slane %v4195_v0, 2  ;;  %v5069_v11 = vsel %vm2805_vm8, %v4094_v59, %v5068_v40  ;;  %v4122_v13 = vadd.f32 %v4121_v9, %v4120_v28 }
 0x510   : > { %3881 = vperm.xlu0 %5598, %v3876_v29   ;;  %v7539_v29 = vpop.permute.xlu2 %3307  ;;  %v4115_v62 = vadd.f32 %v4114_v17, %v4113_v55  ;;  %v4149_v50 = vrot.slane %v4148_v15, 1  ;;  %v4203_v33 = vrot.slane %v4202_v60, 2  ;;  %v3442_v6 = vperm.slane %v7304_v3, 5 }
 0x511   : > { %3405 = vperm.xlu1 %5597, %v3400_v52   ;;  %v4134_v52 = vadd.f32 %v4133_v23, %v4132_v43  ;;  %v4101_v43 = vadd.f32 %v4100_v34, %v4099_v58  ;;  %v4129_v56 = vadd.f32 %v4128_v27, %v4127_v37  ;;  %v4170_v36 = vrot.slane %v4169_v30, 1 }
 0x512   : > { %v4176_v58 = vadd.f32 %v4175_v22, %v7477_v48  ;;  %v4190_v55 = vadd.f32 %v4189_v39, %v4188_v18  ;;  %v4197_v14 = vadd.f32 %v4196_v2, %v4195_v0  ;;  %v4150_v26 = vadd.f32 %v4149_v50, %v4148_v15  ;;  %v5632_v2 = vld [vmem:[%s5958_s9 + $0xc8] sm:$0xff]  ;;  %v5633_v15 = vld [vmem:[%s5958_s9 + $0xd0] sm:$0xff] }
 0x513   : > { %v7533_v12 = vpop.permute.xlu1 %3202  ;;  %v4135_v23 = vrot.slane %v4134_v52, 1  ;;  %v5070_v10 = vsel %vm2793_vm2, %v4108_v20, %v4101_v43  ;;  %v4204_v37 = vadd.f32 %v4203_v33, %v4202_v60  ;;  %v4171_v34 = vadd.f32 %v4170_v36, %v4169_v30  ;;  %v5635_v20 = vld [vmem:[%s5958_s9 + $0xd8] sm:$0xff]  ;;  %v5637_v36 = vld [vmem:[%s5958_s9 + $0xe8] sm:$0xff] }
 0x514   : > { %v5071_v28 = vsel %vm2795_vm3, %v4115_v62, %v5070_v10  ;;  %v4191_v18 = vrot.slane %v4190_v55, 1  ;;  %v4198_v17 = vrot.slane %v4197_v14, 1  ;;  %v3937_v60 = vmul.f32 %v5633_v15, %v7533_v12  ;;  %v5636_v62 = vld [vmem:[%s5958_s9 + $0xe0] sm:$0xff] }
 0x515   : > { %v4136_v49 = vadd.f32 %v4135_v23, %v4134_v52  ;;  %v5072_v3 = vsel %vm2797_vm4, %v4122_v13, %v5071_v28  ;;  %v4177_v52 = vrot.slane %v4176_v58, 1  ;;  %v4205_v9 = vrot.slane %v4204_v37, 1 }
 0x516   : > { %v5073_v53 = vsel %vm2799_vm5, %v4129_v56, %v5072_v3  ;;  %v3463_v59 = vperm.slane %v7317_v24, 0  ;;  %v5078_v27 = vsel %vm2795_vm3, %v4171_v34, %v7420_v21  ;;  %v4192_v39 = vadd.f32 %v4191_v18, %v4190_v55 }
 0x517   : > { %v5074_v22 = vsel %vm2801_vm6, %v4136_v49, %v5073_v53  ;;  %v4178_v23 = vadd.f32 %v4177_v52, %v4176_v58  ;;  %v4206_v50 = vadd.f32 %v4205_v9, %v4204_v37  ;;  %v4221_v33 = vsel %vm480_vm0, %v3937_v60, 0.0 }
 0x518   : > { %3902 = vperm.xlu0 %5598, %v3897_v19   ;;  %v4182_v19 = vrot.slane %v4181_v7, 2  ;;  %v7550_v51 = vpop.permute.xlu2 %3328  ;;  %v4222_v28 = vrot.slane %v4221_v33, 4 }
 0x519   : > { %3426 = vperm.xlu1 %5597, %v3421_v38   ;;  %v4142_v38 = vrot.slane %v4141_v4, 1  ;;  %v5079_v21 = vsel %vm2797_vm4, %v4178_v23, %v5078_v27 }
 0x51a   : > { %v4183_v61 = vadd.f32 %v4182_v19, %v4181_v7  ;;  %v7556_v7 = vpop.permute.xlu0 %3335  ;;  %v5634_v19 = vld [vmem:[%s5958_s9 + $0xc0] sm:$0xff]  ;;  %v4223_v52 = vadd.f32 %v4222_v28, %v4221_v33  ;;  %v5639_v33 = vld [vmem:[%s5958_s9 + $0x108] sm:$0xff] }
 0x51b   : > { %v3210_v42 = vpop.permute.xlu1 %3209  ;;  %v4143_v45 = vadd.f32 %v4142_v38, %v4141_v4  ;;  %v3936_v4 = vmul.f32 %v5632_v2, %v7511_v41  ;;  %v3935_v43 = vmul.f32 %v5634_v19, %v7483_v57 }
 0x51c   : > { %v4184_v48 = vrot.slane %v4183_v61, 1  ;;  %v3938_v41 = vmul.f32 %v5635_v20, %v3210_v42 }
 0x51d   : > { %v5075_v0 = vsel %vm2803_vm7, %v4143_v45, %v5074_v22  ;;  %v4214_v13 = vsel %vm480_vm0, %v3936_v4, 0.0 }
 0x51e   : > { %v5076_v40 = vsel %vm2805_vm8, %v4150_v26, %v5075_v0  ;;  %v4185_v30 = vadd.f32 %v4184_v48, %v4183_v61  ;;  %v4228_v56 = vsel %vm480_vm0, %v3938_v41, 0.0  ;;  %v4215_v58 = vrot.slane %v4214_v13, 4  ;;  %v5638_v0 = vld [vmem:[%s5958_s9 + $0xf0] sm:$0xff] }
 0x51f   : > { %5191 = vxpose.xlu2.b32.start [1/16] (narrow) %v5069_v11, 32  ;;  %v4199_v11 = vadd.f32 %v4198_v17, %v4197_v14  ;;  %v4229_v26 = vrot.slane %v4228_v56, 4 }
 0x520   : > { %v7573_v12 = vpop.permute.xlu2 %3349  ;;  %v5080_v42 = vsel %vm2799_vm5, %v4185_v30, %v5079_v21  ;;  %v4216_v48 = vadd.f32 %v4215_v58, %v4214_v13 }
 0x521   : > { %3447 = vperm.xlu1 %5597, %v3442_v6   ;;  %v4207_v6 = vsel %vm480_vm0, %v3935_v43, 0.0  ;;  %v5081_v49 = vsel %vm2801_vm6, %v4192_v39, %v5080_v42  ;;  %v4230_v22 = vadd.f32 %v4229_v26, %v4228_v56  ;;  %v3505_v43 = vperm.slane %v7317_v24, 6 }
 0x522   : > { %v7584_v55 = vpop.permute.xlu0 %3356  ;;  %v5082_v14 = vsel %vm2803_vm7, %v4199_v11, %v5081_v49  ;;  %v4208_v3 = vrot.slane %v4207_v6, 4  ;;  %v4217_v15 = vrot.slane %v4216_v48, 2 }
 0x523   : > { %v3217_v54 = vpop.permute.xlu1 %3216  ;;  %v5083_v37 = vsel %vm2805_vm8, %v4206_v50, %v5082_v14  ;;  %v4231_v30 = vrot.slane %v4230_v22, 2 }
 0x524   : > { %v3939_v38 = vmul.f32 %v5636_v62, %v3217_v54  ;;  %v3484_v54 = vperm.slane %v7317_v24, 3  ;;  %v4209_v18 = vadd.f32 %v4208_v3, %v4207_v6  ;;  %v4218_v23 = vadd.f32 %v4217_v15, %v4216_v48  ;;  %v5640_v6 = vld [vmem:[%s5958_s9 + $0xf8] sm:$0xff] }
 0x525   : > { %v4232_v13 = vadd.f32 %v4231_v30, %v4230_v22  ;;  %v3526_v3 = vperm.slane %v7335_v46, 1 }
 0x526   : > { %v4235_v10 = vsel %vm480_vm0, %v3939_v38, 0.0  ;;  %v4210_v27 = vrot.slane %v4209_v18, 2  ;;  %v4219_v24 = vrot.slane %v4218_v23, 1 }
 0x527   : > { %5192 = vxpose.xlu2.b32.cont [2/16] (narrow) %v5076_v40, 32  ;;  %v4236_v34 = vrot.slane %v4235_v10, 4  ;;  %v4224_v40 = vrot.slane %v4223_v52, 2 }
 0x528   : > { %v7590_v2 = vpop.permute.xlu2 %3370  ;;  %v4211_v11 = vadd.f32 %v4210_v27, %v4209_v18  ;;  %v5643_v27 = vld [vmem:[%s5958_s9 + $0x100] sm:$0xff] }
 0x529   : > { %3468 = vperm.xlu1 %5597, %v3463_v59   ;;  %v4237_v4 = vadd.f32 %v4236_v34, %v4235_v10  ;;  %v4225_v38 = vadd.f32 %v4224_v40, %v4223_v52  ;;  %v4220_v34 = vadd.f32 %v4219_v24, %v4218_v23 }
 0x52a   : > { %v7595_v20 = vpop.permute.xlu0 %3377  ;;  %v4212_v28 = vrot.slane %v4211_v11, 1 }
 0x52b   : > { %v3224_v57 = vpop.permute.xlu1 %3223  ;;  %v4238_v41 = vrot.slane %v4237_v4, 2  ;;  %v4226_v58 = vrot.slane %v4225_v38, 1 }
 0x52c   : > { %v3940_v61 = vmul.f32 %v5637_v36, %v3224_v57  ;;  %v3944_v57 = vmul.f32 %v5639_v33, %v7460_v63 }
 0x52d   : > { %v4239_v42 = vadd.f32 %v4238_v41, %v4237_v4  ;;  %v4227_v18 = vadd.f32 %v4226_v58, %v4225_v38  ;;  %v4213_v4 = vadd.f32 %v4212_v28, %v4211_v11 }
 0x52e   : > { %v4242_v45 = vsel %vm480_vm0, %v3940_v61, 0.0  ;;  %v4270_v26 = vsel %vm480_vm0, %v3944_v57, 0.0  ;;  %v3547_v57 = vperm.slane %v7335_v46, 4 }
 0x52f   : > { %5193 = vxpose.xlu2.b32.cont [3/16] (narrow) %v5083_v37, 32  ;;  %v4243_v53 = vrot.slane %v4242_v45, 4  ;;  %v5641_v37 = vld [vmem:[%s5958_s9 + $0x118] sm:$0xff]  ;;  %v5084_v41 = vsel %vm2793_vm2, %v4220_v34, %v4213_v4 }
 0x530   : > { %v7600_v61 = vpop.permute.xlu2 %3391  ;;  %v3946_v63 = vmul.f32 %v5641_v37, %v7475_v47  ;;  %v5642_v47 = vld [vmem:[%s5958_s9 + $0x130] sm:$0xff]  ;;  %v5085_v11 = vsel %vm2795_vm3, %v4227_v18, %v5084_v41  ;;  %v5647_v18 = vld [vmem:[%s5958_s9 + $0x148] sm:$0xff] }
 0x531   : > { %3489 = vperm.xlu1 %5597, %v3484_v54   ;;  %v4244_v60 = vadd.f32 %v4243_v53, %v4242_v45  ;;  %v4233_v45 = vrot.slane %v4232_v13, 1  ;;  %v4240_v54 = vrot.slane %v4239_v42, 1  ;;  %v3949_v40 = vmul.f32 %v5642_v47, %v7513_v32 }
 0x532   : > { %v7607_v52 = vpop.permute.xlu0 %3398 }
 0x533   : > { %v3231_v17 = vpop.permute.xlu1 %3230  ;;  %v4245_v39 = vrot.slane %v4244_v60, 2 }
 0x534   : > { %v3941_v9 = vmul.f32 %v5638_v0, %v3231_v17  ;;  %v4271_v17 = vrot.slane %v4270_v26, 4  ;;  %v4234_v0 = vadd.f32 %v4233_v45, %v4232_v13 }
 0x535   : > { %v4246_v36 = vadd.f32 %v4245_v39, %v4244_v60  ;;  %v4284_v60 = vsel %vm480_vm0, %v3946_v63, 0.0 }
 0x536   : > { %v4249_v59 = vsel %vm480_vm0, %v3941_v9, 0.0  ;;  %v5086_v32 = vsel %vm2797_vm4, %v4234_v0, %v5085_v11 }
 0x537   : > { %v4250_v19 = vrot.slane %v4249_v59, 4  ;;  %v4247_v48 = vrot.slane %v4246_v36, 1 }
 0x539   : > { %v4251_v62 = vadd.f32 %v4250_v19, %v4249_v59  ;;  %3510 = vperm.xlu1 %5597, %v3505_v43   ;;  %v4241_v59 = vadd.f32 %v4240_v54, %v4239_v42  ;;  %v5644_v19 = vld [vmem:[%s5958_s9 + $0x120] sm:$0xff]  ;;  %v4248_v23 = vadd.f32 %v4247_v48, %v4246_v36  ;;  %v4272_v42 = vadd.f32 %v4271_v17, %v4270_v26  ;;  %v5646_v54 = vld [vmem:[%s5958_s9 + $0x110] sm:$0xff] }
 0x53a   : > { %v3947_v43 = vmul.f32 %v5644_v19, %v7490_v8  ;;  %v4285_v8 = vrot.slane %v4284_v60, 4  ;;  %v7631_v63 = vpop.permute.xlu0 %3419 }
 0x53b   : > { %v4252_v21 = vrot.slane %v4251_v62, 2  ;;  %v3238_v50 = vpop.permute.xlu1 %3237  ;;  %v4273_v26 = vrot.slane %v4272_v42, 2 }
 0x53c   : > { %v3942_v56 = vmul.f32 %v5640_v6, %v3238_v50  ;;  %v7622_v6 = vpop.permute.xlu2 %3412  ;;  %v4286_v48 = vadd.f32 %v4285_v8, %v4284_v60 }
 0x53d   : > { %v4253_v10 = vadd.f32 %v4252_v21, %v4251_v62  ;;  %v5645_v62 = vld [vmem:[%s5958_s9 + $0x138] sm:$0xff]  ;;  %v4274_v47 = vadd.f32 %v4273_v26, %v4272_v42  ;;  %v5650_v42 = vld [vmem:[%s5958_s9 + $0x150] sm:$0xff] }
 0x53e   : > { %v4256_v49 = vsel %vm480_vm0, %v3942_v56, 0.0  ;;  %v3950_v38 = vmul.f32 %v5645_v62, %v7525_v35  ;;  %v5087_v56 = vsel %vm2799_vm5, %v4241_v59, %v5086_v32  ;;  %v4291_v35 = vsel %vm480_vm0, %v3947_v43, 0.0 }
 0x53f   : > { %v4257_v14 = vrot.slane %v4256_v49, 4  ;;  %v4254_v22 = vrot.slane %v4253_v10, 1  ;;  %v5088_v58 = vsel %vm2801_vm6, %v4248_v23, %v5087_v56  ;;  %v4292_v37 = vrot.slane %v4291_v35, 4 }
 0x540   : > { %v4312_v28 = vsel %vm480_vm0, %v3950_v38, 0.0  ;;  %v4287_v59 = vrot.slane %v4286_v48, 2  ;;  %v5648_v38 = vld [vmem:[%s5958_s9 + $0x128] sm:$0xff]  ;;  %v3953_v8 = vmul.f32 %v5650_v42, %v7545_v16 }
 0x541   : > { %v4258_v53 = vadd.f32 %v4257_v14, %v4256_v49  ;;  %3531 = vperm.xlu1 %5597, %v3526_v3   ;;  %v4255_v13 = vadd.f32 %v4254_v22, %v4253_v10  ;;  %v4305_v10 = vsel %vm480_vm0, %v3949_v40, 0.0  ;;  %v3952_v22 = vmul.f32 %v5647_v18, %v7539_v29  ;;  %v5651_v18 = vld [vmem:[%s5958_s9 + $0x178] sm:$0xff] }
 0x542   : > { %v4313_v17 = vrot.slane %v4312_v28, 4  ;;  %v4293_v40 = vadd.f32 %v4292_v37, %v4291_v35  ;;  %v4288_v11 = vadd.f32 %v4287_v59, %v4286_v48  ;;  %v7646_v56 = vpop.permute.xlu0 %3440  ;;  %v4333_v16 = vsel %vm480_vm0, %v3953_v8, 0.0  ;;  %v5653_v59 = vld [vmem:[%s5958_s9 + $0x168] sm:$0xff] }
 0x543   : > { %v4259_v9 = vrot.slane %v4258_v53, 2  ;;  %v3245_v15 = vpop.permute.xlu1 %3244  ;;  %v5089_v49 = vsel %vm2803_vm7, %v4255_v13, %v5088_v58  ;;  %v4326_v60 = vsel %vm480_vm0, %v3952_v22, 0.0  ;;  %v3958_v22 = vmul.f32 %v5651_v18, %v7573_v12 }
 0x544   : > { %v3943_v30 = vmul.f32 %v5643_v27, %v3245_v15  ;;  %v3568_v15 = vperm.slane %v7335_v46, 7  ;;  %v4314_v19 = vadd.f32 %v4313_v17, %v4312_v28  ;;  %v7639_v29 = vpop.permute.xlu2 %3433  ;;  %v4294_v62 = vrot.slane %v4293_v40, 2 }
 0x545   : > { %v4260_v39 = vadd.f32 %v4259_v9, %v4258_v53  ;;  %v4306_v53 = vrot.slane %v4305_v10, 4 }
 0x546   : > { %v4263_v21 = vsel %vm480_vm0, %v3943_v30, 0.0 }
 0x547   : > { %v4261_v50 = vrot.slane %v4260_v39, 1  ;;  %v4264_v33 = vrot.slane %v4263_v21, 4  ;;  %v4307_v27 = vadd.f32 %v4306_v53, %v4305_v10  ;;  %v3589_v10 = vperm.slane %v7347_v31, 2 }
 0x549   : > { %v4262_v24 = vadd.f32 %v4261_v50, %v4260_v39  ;;  %v4265_v36 = vadd.f32 %v4264_v33, %v4263_v21  ;;  %3552 = vperm.xlu1 %5597, %v3547_v57   ;;  %v4275_v39 = vrot.slane %v4274_v47, 1  ;;  %v4308_v13 = vrot.slane %v4307_v27, 2  ;;  %v5649_v50 = vld [vmem:[%s5958_s9 + $0x160] sm:$0xff] }
 0x54a   : > { %v4327_v21 = vrot.slane %v4326_v60, 4  ;;  %v3955_v33 = vmul.f32 %v5649_v50, %v7550_v51  ;;  %v4315_v57 = vrot.slane %v4314_v19, 2 }
 0x54b   : > { %v4266_v45 = vrot.slane %v4265_v36, 2  ;;  %v3259_v14 = vpop.permute.xlu1 %3258  ;;  %v5090_v3 = vsel %vm2805_vm8, %v4262_v24, %v5089_v49  ;;  %v4295_v49 = vadd.f32 %v4294_v62, %v4293_v40  ;;  %v4276_v28 = vadd.f32 %v4275_v39, %v4274_v47 }
 0x54c   : > { %v3945_v34 = vmul.f32 %v5646_v54, %v3259_v14  ;;  %5194 = vxpose.xlu2.b32.cont [4/16] (narrow) %v5090_v3, 32  ;;  %v4309_v3 = vadd.f32 %v4308_v13, %v4307_v27  ;;  %v4316_v26 = vadd.f32 %v4315_v57, %v4314_v19  ;;  %v4328_v37 = vadd.f32 %v4327_v21, %v4326_v60  ;;  %v7665_v13 = vpop.permute.xlu0 %3461 }
 0x54d   : > { %v4267_v0 = vadd.f32 %v4266_v45, %v4265_v36  ;;  %v4289_v45 = vrot.slane %v4288_v11, 1  ;;  %v4347_v54 = vsel %vm480_vm0, %v3955_v33, 0.0  ;;  %v4296_v17 = vrot.slane %v4295_v49, 1 }
 0x54e   : > { %v4277_v4 = vsel %vm480_vm0, %v3945_v34, 0.0  ;;  %v4334_v40 = vrot.slane %v4333_v16, 4  ;;  %v3956_v27 = vmul.f32 %v5653_v59, %v7556_v7  ;;  %v4310_v60 = vrot.slane %v4309_v3, 1 }
 0x54f   : > { %v4278_v9 = vrot.slane %v4277_v4, 4  ;;  %v4268_v43 = vrot.slane %v4267_v0, 1  ;;  %v4290_v47 = vadd.f32 %v4289_v45, %v4288_v11  ;;  %v4348_v19 = vrot.slane %v4347_v54, 4 }
 0x550   : > { %v3610_v62 = vperm.slane %v7347_v31, 5  ;;  %v4297_v11 = vadd.f32 %v4296_v17, %v4295_v49  ;;  %v4335_v7 = vadd.f32 %v4334_v40, %v4333_v16  ;;  %v4354_v21 = vsel %vm480_vm0, %v3956_v27, 0.0 }
 0x551   : > { %v4279_v30 = vadd.f32 %v4278_v9, %v4277_v4  ;;  %3573 = vperm.xlu1 %5597, %v3568_v15   ;;  %v4269_v24 = vadd.f32 %v4268_v43, %v4267_v0  ;;  %v7655_v4 = vpop.permute.xlu2 %3454  ;;  %v5652_v9 = vld [vmem:[%s5958_s9 + $0x140] sm:$0xff]  ;;  %v4317_v43 = vrot.slane %v4316_v26, 1  ;;  %v4311_v33 = vadd.f32 %v4310_v60, %v4309_v3 }
 0x552   : > { %v4349_v57 = vadd.f32 %v4348_v19, %v4347_v54  ;;  %v3631_v17 = vperm.slane %v7364_v25, 0 }
 0x553   : > { %v4280_v41 = vrot.slane %v4279_v30, 2  ;;  %v3280_v23 = vpop.permute.xlu1 %3279  ;;  %v5091_v34 = vsel %vm2793_vm2, %v4276_v28, %v4269_v24  ;;  %v4318_v8 = vadd.f32 %v4317_v43, %v4316_v26 }
 0x554   : > { %v3948_v46 = vmul.f32 %v5648_v38, %v3280_v23  ;;  %v4329_v38 = vrot.slane %v4328_v37, 2  ;;  %v4350_v16 = vrot.slane %v4349_v57, 2  ;;  %v7681_v59 = vpop.permute.xlu0 %3482 }
 0x555   : > { %v4281_v32 = vadd.f32 %v4280_v41, %v4279_v30 }
 0x556   : > { %v4298_v35 = vsel %vm480_vm0, %v3948_v46, 0.0  ;;  %v4368_v46 = vsel %vm480_vm0, %v3958_v22, 0.0  ;;  %v4330_v45 = vadd.f32 %v4329_v38, %v4328_v37  ;;  %v4351_v27 = vadd.f32 %v4350_v16, %v4349_v57 }
 0x557   : > { %v4282_v36 = vrot.slane %v4281_v32, 1  ;;  %v4299_v58 = vrot.slane %v4298_v35, 4 }
 0x559   : > { %v4283_v14 = vadd.f32 %v4282_v36, %v4281_v32  ;;  %v4300_v51 = vadd.f32 %v4299_v58, %v4298_v35  ;;  %3594 = vperm.xlu1 %5597, %v3589_v10   ;;  %v4369_v36 = vrot.slane %v4368_v46, 4  ;;  %v4355_v58 = vrot.slane %v4354_v21, 4  ;;  %v5654_v10 = vld [vmem:[%s5958_s9 + $0x158] sm:$0xff]  ;;  %v7673_v54 = vpop.permute.xlu2 %3475 }
 0x55b   : > { %v4301_v48 = vrot.slane %v4300_v51, 2  ;;  %v3301_v53 = vpop.permute.xlu1 %3300  ;;  %v5092_v0 = vsel %vm2795_vm3, %v4283_v14, %v5091_v34  ;;  %v4336_v14 = vrot.slane %v4335_v7, 2  ;;  %v5655_v34 = vld [vmem:[%s5958_s9 + $0x190] sm:$0xff]  ;;  %v4370_v37 = vadd.f32 %v4369_v36, %v4368_v46  ;;  %v5659_v36 = vld [vmem:[%s5958_s9 + $0x1a8] sm:$0xff] }
 0x55c   : > { %v3951_v15 = vmul.f32 %v5652_v9, %v3301_v53  ;;  %v5093_v12 = vsel %vm2797_vm4, %v4290_v47, %v5092_v0  ;;  %v5656_v53 = vld [vmem:[%s5958_s9 + $0x180] sm:$0xff]  ;;  %v4356_v0 = vadd.f32 %v4355_v58, %v4354_v21  ;;  %v3964_v58 = vmul.f32 %v5659_v36, %v7600_v61 }
 0x55d   : > { %v4302_v30 = vadd.f32 %v4301_v48, %v4300_v51  ;;  %v5094_v42 = vsel %vm2799_vm5, %v4297_v11, %v5093_v12  ;;  %v3961_v48 = vmul.f32 %v5655_v34, %v7590_v2  ;;  %v3959_v18 = vmul.f32 %v5656_v53, %v7584_v55  ;;  %v5657_v12 = vld [vmem:[%s5958_s9 + $0x170] sm:$0xff]  ;;  %v7697_v53 = vpop.permute.xlu0 %3503 }
 0x55e   : > { %v4319_v41 = vsel %vm480_vm0, %v3951_v15, 0.0  ;;  %v4331_v15 = vrot.slane %v4330_v45, 1  ;;  %v4337_v47 = vadd.f32 %v4336_v14, %v4335_v7  ;;  %v4371_v19 = vrot.slane %v4370_v37, 2  ;;  %v5658_v7 = vld [vmem:[%s5958_s9 + $0x198] sm:$0xff] }
 0x55f   : > { %v4303_v23 = vrot.slane %v4302_v30, 1  ;;  %v4320_v39 = vrot.slane %v4319_v41, 4  ;;  %v4389_v2 = vsel %vm480_vm0, %v3961_v48, 0.0  ;;  %v4357_v43 = vrot.slane %v4356_v0, 2 }
 0x560   : > { %v4390_v46 = vrot.slane %v4389_v2, 4  ;;  %v3962_v21 = vmul.f32 %v5658_v7, %v7595_v20 }
 0x561   : > { %v4304_v32 = vadd.f32 %v4303_v23, %v4302_v30  ;;  %v4321_v50 = vadd.f32 %v4320_v39, %v4319_v41  ;;  %3615 = vperm.xlu1 %5597, %v3610_v62   ;;  %v4375_v30 = vsel %vm480_vm0, %v3959_v18, 0.0  ;;  %v4332_v39 = vadd.f32 %v4331_v15, %v4330_v45  ;;  %v5660_v18 = vld [vmem:[%s5958_s9 + $0x188] sm:$0xff] }
 0x562   : > { %v4338_v62 = vrot.slane %v4337_v47, 1  ;;  %v4376_v11 = vrot.slane %v4375_v30, 4  ;;  %v4396_v14 = vsel %vm480_vm0, %v3962_v21, 0.0  ;;  %v5663_v21 = vld [vmem:[%s5958_s9 + $0x1c8] sm:$0xff] }
 0x563   : > { %v4322_v35 = vrot.slane %v4321_v50, 2  ;;  %v3322_v31 = vpop.permute.xlu1 %3321  ;;  %v5095_v24 = vsel %vm2801_vm6, %v4304_v32, %v5094_v42  ;;  %v3652_v42 = vperm.slane %v7364_v25, 3 }
 0x564   : > { %v3954_v49 = vmul.f32 %v5654_v10, %v3322_v31  ;;  %v5096_v28 = vsel %vm2803_vm7, %v4311_v33, %v5095_v24  ;;  %v7690_v31 = vpop.permute.xlu2 %3496  ;;  %v4339_v10 = vadd.f32 %v4338_v62, %v4337_v47  ;;  %v4377_v45 = vadd.f32 %v4376_v11, %v4375_v30 }
 0x565   : > { %v4323_v51 = vadd.f32 %v4322_v35, %v4321_v50  ;;  %v5097_v3 = vsel %vm2805_vm8, %v4318_v8, %v5096_v28  ;;  %v4352_v50 = vrot.slane %v4351_v27, 1  ;;  %v4372_v8 = vadd.f32 %v4371_v19, %v4370_v37 }
 0x566   : > { %v4340_v26 = vsel %vm480_vm0, %v3954_v49, 0.0  ;;  %5195 = vxpose.xlu2.b32.cont [5/16] (narrow) %v5097_v3, 32  ;;  %v4358_v35 = vadd.f32 %v4357_v43, %v4356_v0  ;;  %v4391_v28 = vadd.f32 %v4390_v46, %v4389_v2  ;;  %v4397_v37 = vrot.slane %v4396_v14, 4  ;;  %v5661_v0 = vld [vmem:[%s5958_s9 + $0x1b0] sm:$0xff] }
 0x567   : > { %v4341_v22 = vrot.slane %v4340_v26, 4  ;;  %v4324_v9 = vrot.slane %v4323_v51, 1  ;;  %v4373_v34 = vrot.slane %v4372_v8, 1  ;;  %v4378_v2 = vrot.slane %v4377_v45, 2 }
 0x568   : > { %v4359_v48 = vrot.slane %v4358_v35, 1  ;;  %v4392_v47 = vrot.slane %v4391_v28, 2  ;;  %v3673_v19 = vperm.slane %v7364_v25, 6 }
 0x569   : > { %v4342_v40 = vadd.f32 %v4341_v22, %v4340_v26  ;;  %3636 = vperm.xlu1 %5597, %v3631_v17   ;;  %v4325_v41 = vadd.f32 %v4324_v9, %v4323_v51  ;;  %v4353_v51 = vadd.f32 %v4352_v50, %v4351_v27  ;;  %v4410_v17 = vsel %vm480_vm0, %v3964_v58, 0.0  ;;  %v5665_v58 = vld [vmem:[%s5958_s9 + $0x1d8] sm:$0xff] }
 0x56a   : > { %v3965_v9 = vmul.f32 %v5661_v0, %v7607_v52  ;;  %v4379_v46 = vadd.f32 %v4378_v2, %v4377_v45 }
 0x56b   : > { %v4343_v55 = vrot.slane %v4342_v40, 2  ;;  %v3343_v60 = vpop.permute.xlu1 %3342  ;;  %v5098_v24 = vsel %vm2793_vm2, %v4332_v39, %v4325_v41  ;;  %v4411_v41 = vrot.slane %v4410_v17, 4 }
 0x56c   : > { %v3957_v23 = vmul.f32 %v5657_v12, %v3343_v60  ;;  %v5099_v3 = vsel %vm2795_vm3, %v4339_v10, %v5098_v24  ;;  %v4360_v12 = vadd.f32 %v4359_v48, %v4358_v35  ;;  %v4417_v52 = vsel %vm480_vm0, %v3965_v9, 0.0  ;;  %v7710_v11 = vpop.permute.xlu2 %3517  ;;  %v5664_v24 = vld [vmem:[%s5958_s9 + $0x1a0] sm:$0xff] }
 0x56d   : > { %v4344_v38 = vadd.f32 %v4343_v55, %v4342_v40  ;;  %v5662_v40 = vld [vmem:[%s5958_s9 + $0x1c0] sm:$0xff]  ;;  %v4418_v35 = vrot.slane %v4417_v52, 4  ;;  %v3970_v10 = vmul.f32 %v5665_v58, %v7639_v29 }
 0x56e   : > { %v4361_v32 = vsel %vm480_vm0, %v3957_v23, 0.0  ;;  %v3967_v27 = vmul.f32 %v5662_v40, %v7622_v6  ;;  %v4398_v23 = vadd.f32 %v4397_v37, %v4396_v14  ;;  %v4374_v6 = vadd.f32 %v4373_v34, %v4372_v8 }
 0x56f   : > { %v4345_v33 = vrot.slane %v4344_v38, 1  ;;  %v4362_v57 = vrot.slane %v4361_v32, 4  ;;  %v4380_v14 = vrot.slane %v4379_v46, 1  ;;  %v3694_v34 = vperm.slane %v7381_v1, 1 }
 0x570   : > { %v4431_v25 = vsel %vm480_vm0, %v3967_v27, 0.0  ;;  %v4452_v29 = vsel %vm480_vm0, %v3970_v10, 0.0 }
 0x571   : > { %v4346_v49 = vadd.f32 %v4345_v33, %v4344_v38  ;;  %v4363_v20 = vadd.f32 %v4362_v57, %v4361_v32  ;;  %3657 = vperm.xlu1 %5597, %v3652_v42   ;;  %v4393_v38 = vadd.f32 %v4392_v47, %v4391_v28  ;;  %v3968_v32 = vmul.f32 %v5663_v21, %v7631_v63  ;;  %v7721_v63 = vpop.permute.xlu0 %3524 }
 0x572   : > { %v4412_v42 = vadd.f32 %v4411_v41, %v4410_v17  ;;  %v4432_v45 = vrot.slane %v4431_v25, 4  ;;  %v4453_v2 = vrot.slane %v4452_v29, 4  ;;  %v5667_v41 = vld [vmem:[%s5958_s9 + $0x1e0] sm:$0xff] }
 0x573   : > { %v4364_v16 = vrot.slane %v4363_v20, 2  ;;  %v3364_v26 = vpop.permute.xlu1 %3363  ;;  %v5100_v61 = vsel %vm2797_vm4, %v4346_v49, %v5099_v3  ;;  %v4399_v49 = vrot.slane %v4398_v23, 2  ;;  %v4394_v28 = vrot.slane %v4393_v38, 1 }
 0x574   : > { %v3960_v22 = vmul.f32 %v5660_v18, %v3364_v26  ;;  %v5101_v43 = vsel %vm2799_vm5, %v4353_v51, %v5100_v61  ;;  %v4438_v3 = vsel %vm480_vm0, %v3968_v32, 0.0  ;;  %v4413_v48 = vrot.slane %v4412_v42, 2 }
 0x575   : > { %v4365_v15 = vadd.f32 %v4364_v16, %v4363_v20  ;;  %v5102_v7 = vsel %vm2801_vm6, %v4360_v12, %v5101_v43  ;;  %v4419_v61 = vadd.f32 %v4418_v35, %v4417_v52  ;;  %v4400_v18 = vadd.f32 %v4399_v49, %v4398_v23 }
 0x576   : > { %v4382_v30 = vsel %vm480_vm0, %v3960_v22, 0.0  ;;  %v4433_v37 = vadd.f32 %v4432_v45, %v4431_v25  ;;  %v4439_v0 = vrot.slane %v4438_v3, 4  ;;  %v4395_v9 = vadd.f32 %v4394_v28, %v4393_v38 }
 0x577   : > { %v4366_v55 = vrot.slane %v4365_v15, 1  ;;  %v4383_v60 = vrot.slane %v4382_v30, 4  ;;  %v4414_v27 = vadd.f32 %v4413_v48, %v4412_v42  ;;  %v4401_v43 = vrot.slane %v4400_v18, 1 }
 0x578   : > { %v3971_v12 = vmul.f32 %v5667_v41, %v7646_v56  ;;  %v4440_v38 = vadd.f32 %v4439_v0, %v4438_v3 }
 0x579   : > { %v4367_v39 = vadd.f32 %v4366_v55, %v4365_v15  ;;  %v4384_v62 = vadd.f32 %v4383_v60, %v4382_v30  ;;  %3678 = vperm.xlu1 %5597, %v3673_v19   ;;  %v4381_v15 = vadd.f32 %v4380_v14, %v4379_v46  ;;  %v4420_v30 = vrot.slane %v4419_v61, 2  ;;  %v7727_v55 = vpop.permute.xlu2 %3538  ;;  %v5666_v60 = vld [vmem:[%s5958_s9 + $0x1b8] sm:$0xff]  ;;  %v7739_v42 = vpop.permute.xlu0 %3545 }
 0x57a   : > { %v4441_v58 = vrot.slane %v4440_v38, 2 }
 0x57b   : > { %v4385_v50 = vrot.slane %v4384_v62, 2  ;;  %v3385_v33 = vpop.permute.xlu1 %3384  ;;  %v5103_v57 = vsel %vm2803_vm7, %v4367_v39, %v5102_v7  ;;  %v4434_v39 = vrot.slane %v4433_v37, 2  ;;  %v5669_v7 = vld [vmem:[%s5958_s9 + $0x1f8] sm:$0xff]  ;;  %v4421_v56 = vadd.f32 %v4420_v30, %v4419_v61 }
 0x57c   : > { %v3963_v8 = vmul.f32 %v5664_v24, %v3385_v33  ;;  %v5104_v36 = vsel %vm2805_vm8, %v4374_v6, %v5103_v57  ;;  %v3974_v25 = vmul.f32 %v5669_v7, %v7665_v13  ;;  %v4415_v33 = vrot.slane %v4414_v27, 1  ;;  %v5672_v7 = vld [vmem:[%s5958_s9 + $0x1e8] sm:$0xff] }
 0x57d   : > { %v4386_v20 = vadd.f32 %v4385_v50, %v4384_v62  ;;  %5196 = vxpose.xlu2.b32.cont [6/16] (narrow) %v5104_v36, 32  ;;  %v5668_v62 = vld [vmem:[%s5958_s9 + $0x1f0] sm:$0xff]  ;;  %v3715_v50 = vperm.slane %v7381_v1, 4  ;;  %v4454_v57 = vadd.f32 %v4453_v2, %v4452_v29  ;;  %v4402_v24 = vadd.f32 %v4401_v43, %v4400_v18  ;;  %v5671_v18 = vld [vmem:[%s5958_s9 + $0x208] sm:$0xff] }
 0x57e   : > { %v4403_v51 = vsel %vm480_vm0, %v3963_v8, 0.0  ;;  %v3973_v6 = vmul.f32 %v5668_v62, %v7655_v4  ;;  %v4459_v4 = vsel %vm480_vm0, %v3971_v12, 0.0  ;;  %v4435_v10 = vadd.f32 %v4434_v39, %v4433_v37 }
 0x57f   : > { %v4387_v16 = vrot.slane %v4386_v20, 1  ;;  %v4404_v26 = vrot.slane %v4403_v51, 4  ;;  %v4480_v49 = vsel %vm480_vm0, %v3974_v25, 0.0  ;;  %v4422_v14 = vrot.slane %v4421_v56, 1 }
 0x580   : > { %v4473_v13 = vsel %vm480_vm0, %v3973_v6, 0.0  ;;  %v4455_v48 = vrot.slane %v4454_v57, 2  ;;  %v4481_v0 = vrot.slane %v4480_v49, 4  ;;  %v4436_v30 = vrot.slane %v4435_v10, 1 }
 0x581   : > { %v4388_v22 = vadd.f32 %v4387_v16, %v4386_v20  ;;  %v4405_v17 = vadd.f32 %v4404_v26, %v4403_v51  ;;  %3699 = vperm.xlu1 %5597, %v3694_v34   ;;  %v4460_v51 = vrot.slane %v4459_v4, 4  ;;  %v5670_v16 = vld [vmem:[%s5958_s9 + $0x1d0] sm:$0xff]  ;;  %v4416_v34 = vadd.f32 %v4415_v33, %v4414_v27  ;;  %v7750_v37 = vpop.permute.xlu2 %3559 }
 0x582   : > { %v4474_v61 = vrot.slane %v4473_v13, 4  ;;  %v4423_v27 = vadd.f32 %v4422_v14, %v4421_v56  ;;  %v4482_v12 = vadd.f32 %v4481_v0, %v4480_v49  ;;  %v5676_v0 = vld [vmem:[%s5958_s9 + $0x200] sm:$0xff] }
 0x583   : > { %v4406_v47 = vrot.slane %v4405_v17, 2  ;;  %v3406_v40 = vpop.permute.xlu1 %3405  ;;  %v5105_v23 = vsel %vm2793_vm2, %v4388_v22, %v4381_v15  ;;  %v3976_v22 = vmul.f32 %v5671_v18, %v7673_v54 }
 0x584   : > { %v3966_v19 = vmul.f32 %v5666_v60, %v3406_v40  ;;  %v5106_v35 = vsel %vm2795_vm3, %v4395_v9, %v5105_v23  ;;  %v3736_v40 = vperm.slane %v7381_v1, 7  ;;  %v4461_v60 = vadd.f32 %v4460_v51, %v4459_v4  ;;  %v7755_v23 = vpop.permute.xlu0 %3566 }
 0x585   : > { %v4407_v52 = vadd.f32 %v4406_v47, %v4405_v17  ;;  %v5107_v20 = vsel %vm2797_vm4, %v4402_v24, %v5106_v35  ;;  %v4442_v17 = vadd.f32 %v4441_v58, %v4440_v38  ;;  %v4475_v43 = vadd.f32 %v4474_v61, %v4473_v13  ;;  %v5673_v35 = vld [vmem:[%s5958_s9 + $0x210] sm:$0xff] }
 0x586   : > { %v4424_v46 = vsel %vm480_vm0, %v3966_v19, 0.0  ;;  %v4456_v19 = vadd.f32 %v4455_v48, %v4454_v57  ;;  %v4494_v39 = vsel %vm480_vm0, %v3976_v22, 0.0  ;;  %v4483_v56 = vrot.slane %v4482_v12, 2 }
 0x587   : > { %v4408_v21 = vrot.slane %v4407_v52, 1  ;;  %v4425_v32 = vrot.slane %v4424_v46, 4  ;;  %v4443_v1 = vrot.slane %v4442_v17, 1  ;;  %v4495_v57 = vrot.slane %v4494_v39, 4 }
 0x588   : > { %v3977_v24 = vmul.f32 %v5673_v35, %v7681_v59  ;;  %v3757_v58 = vperm.slane %v7393_v44, 2  ;;  %v5678_v35 = vld [vmem:[%s5958_s9 + $0x218] sm:$0xff] }
 0x589   : > { %v4409_v8 = vadd.f32 %v4408_v21, %v4407_v52  ;;  %v4426_v36 = vadd.f32 %v4425_v32, %v4424_v46  ;;  %3720 = vperm.xlu1 %5597, %v3715_v50   ;;  %v4462_v46 = vrot.slane %v4461_v60, 2  ;;  %v4437_v21 = vadd.f32 %v4436_v30, %v4435_v10  ;;  %v5674_v10 = vld [vmem:[%s5958_s9 + $0x220] sm:$0xff] }
 0x58a   : > { %v4457_v32 = vrot.slane %v4456_v19, 1  ;;  %v4476_v50 = vrot.slane %v4475_v43, 2  ;;  %v4496_v59 = vadd.f32 %v4495_v57, %v4494_v39 }
 0x58b   : > { %v4427_v28 = vrot.slane %v4426_v36, 2  ;;  %v3427_v45 = vpop.permute.xlu1 %3426  ;;  %v5108_v3 = vsel %vm2799_vm5, %v4409_v8, %v5107_v20  ;;  %v4444_v8 = vadd.f32 %v4443_v1, %v4442_v17  ;;  %v4463_v49 = vadd.f32 %v4462_v46, %v4461_v60  ;;  %v7765_v20 = vpop.permute.xlu2 %3580 }
 0x58c   : > { %v3969_v26 = vmul.f32 %v5670_v16, %v3427_v45  ;;  %v5109_v2 = vsel %vm2801_vm6, %v4416_v34, %v5108_v3  ;;  %v4477_v51 = vadd.f32 %v4476_v50, %v4475_v43  ;;  %v4484_v3 = vadd.f32 %v4483_v56, %v4482_v12 }
 0x58d   : > { %v4428_v29 = vadd.f32 %v4427_v28, %v4426_v36  ;;  %v5110_v52 = vsel %vm2803_vm7, %v4423_v27, %v5109_v2  ;;  %v3979_v28 = vmul.f32 %v5674_v10, %v7690_v31  ;;  %v4501_v16 = vsel %vm480_vm0, %v3977_v24, 0.0  ;;  %v7773_v31 = vpop.permute.xlu0 %3587 }
 0x58e   : > { %v4445_v9 = vsel %vm480_vm0, %v3969_v26, 0.0  ;;  %v4458_v26 = vadd.f32 %v4457_v32, %v4456_v19  ;;  %v5112_v34 = vsel %vm2793_vm2, %v4444_v8, %v4437_v21  ;;  %v4464_v22 = vrot.slane %v4463_v49, 1 }
 0x58f   : > { %v4429_v15 = vrot.slane %v4428_v29, 1  ;;  %v4446_v47 = vrot.slane %v4445_v9, 4  ;;  %v4478_v27 = vrot.slane %v4477_v51, 1  ;;  %v4497_v60 = vrot.slane %v4496_v59, 2 }
 0x590   : > { %v4485_v19 = vrot.slane %v4484_v3, 1  ;;  %v3778_v12 = vperm.slane %v7393_v44, 5  ;;  %v4465_v1 = vadd.f32 %v4464_v22, %v4463_v49 }
 0x591   : > { %v4430_v41 = vadd.f32 %v4429_v15, %v4428_v29  ;;  %v4447_v54 = vadd.f32 %v4446_v47, %v4445_v9  ;;  %3741 = vperm.xlu1 %5597, %v3736_v40   ;;  %v5675_v29 = vld [vmem:[%s5958_s9 + $0x238] sm:$0xff]  ;;  %v4515_v15 = vsel %vm480_vm0, %v3979_v28, 0.0  ;;  %v4502_v47 = vrot.slane %v4501_v16, 4  ;;  %v5677_v40 = vld [vmem:[%s5958_s9 + $0x228] sm:$0xff]  ;;  %v5679_v28 = vld [vmem:[%s5958_s9 + $0x250] sm:$0xff] }
 0x592   : > { %v3982_v18 = vmul.f32 %v5675_v29, %v7710_v11  ;;  %v3980_v2 = vmul.f32 %v5677_v40, %v7697_v53  ;;  %v4479_v46 = vadd.f32 %v4478_v27, %v4477_v51  ;;  %v4498_v21 = vadd.f32 %v4497_v60, %v4496_v59  ;;  %v5681_v40 = vld [vmem:[%s5958_s9 + $0x230] sm:$0xff] }
 0x593   : > { %v4448_v62 = vrot.slane %v4447_v54, 2  ;;  %v3448_v6 = vpop.permute.xlu1 %3447  ;;  %v5111_v38 = vsel %vm2805_vm8, %v4430_v41, %v5110_v52  ;;  %v4516_v52 = vrot.slane %v4515_v15, 4  ;;  %v4486_v32 = vadd.f32 %v4485_v19, %v4484_v3 }
 0x594   : > { %v3972_v25 = vmul.f32 %v5672_v7, %v3448_v6  ;;  %5197 = vxpose.xlu2.b32.cont [7/16] (narrow) %v5111_v38, 32  ;;  %v4536_v39 = vsel %vm480_vm0, %v3982_v18, 0.0  ;;  %v4522_v53 = vsel %vm480_vm0, %v3980_v2, 0.0  ;;  %v7785_v7 = vpop.permute.xlu2 %3601  ;;  %v3799_v3 = vperm.slane %v7409_v5, 0 }
 0x595   : > { %v4449_v33 = vadd.f32 %v4448_v62, %v4447_v54  ;;  %v4503_v62 = vadd.f32 %v4502_v47, %v4501_v16  ;;  %v4537_v57 = vrot.slane %v4536_v39, 4  ;;  %v4523_v56 = vrot.slane %v4522_v53, 4  ;;  %v7792_v49 = vpop.permute.xlu0 %3608 }
 0x596   : > { %v4466_v4 = vsel %vm480_vm0, %v3972_v25, 0.0  ;;  %v4517_v8 = vadd.f32 %v4516_v52, %v4515_v15  ;;  %v5683_v52 = vld [vmem:[%s5958_s9 + $0x268] sm:$0xff] }
 0x597   : > { %v4450_v36 = vrot.slane %v4449_v33, 1  ;;  %v4467_v13 = vrot.slane %v4466_v4, 4  ;;  %v4538_v16 = vadd.f32 %v4537_v57, %v4536_v39  ;;  %v3988_v39 = vmul.f32 %v5683_v52, %v7750_v37 }
 0x599   : > { %v4451_v45 = vadd.f32 %v4450_v36, %v4449_v33  ;;  %v4468_v14 = vadd.f32 %v4467_v13, %v4466_v4  ;;  %3762 = vperm.xlu1 %5597, %v3757_v58   ;;  %v4504_v36 = vrot.slane %v4503_v62, 2  ;;  %v4578_v57 = vsel %vm480_vm0, %v3988_v39, 0.0 }
 0x59b   : > { %v4469_v48 = vrot.slane %v4468_v14, 2  ;;  %v3469_v61 = vpop.permute.xlu1 %3468  ;;  %v5113_v17 = vsel %vm2795_vm3, %v4451_v45, %v5112_v34  ;;  %v3985_v45 = vmul.f32 %v5679_v28, %v7727_v55  ;;  %v4505_v29 = vadd.f32 %v4504_v36, %v4503_v62 }
 0x59c   : > { %v3975_v9 = vmul.f32 %v5676_v0, %v3469_v61  ;;  %v5114_v11 = vsel %vm2797_vm4, %v4458_v26, %v5113_v17  ;;  %v4524_v26 = vadd.f32 %v4523_v56, %v4522_v53  ;;  %v4518_v61 = vrot.slane %v4517_v8, 2 }
 0x59d   : > { %v4470_v30 = vadd.f32 %v4469_v48, %v4468_v14  ;;  %v5115_v25 = vsel %vm2799_vm5, %v4465_v1, %v5114_v11  ;;  %v5680_v14 = vld [vmem:[%s5958_s9 + $0x240] sm:$0xff]  ;;  %v4499_v48 = vrot.slane %v4498_v21, 1  ;;  %v4557_v22 = vsel %vm480_vm0, %v3985_v45, 0.0  ;;  %v5685_v45 = vld [vmem:[%s5958_s9 + $0x270] sm:$0xff] }
 0x59e   : > { %v4487_v43 = vsel %vm480_vm0, %v3975_v9, 0.0  ;;  %v3983_v51 = vmul.f32 %v5680_v14, %v7721_v63  ;;  %v4539_v63 = vrot.slane %v4538_v16, 2  ;;  %v7802_v9 = vpop.permute.xlu2 %3622  ;;  %v4525_v15 = vrot.slane %v4524_v26, 2 }
 0x59f   : > { %v4471_v41 = vrot.slane %v4470_v30, 1  ;;  %v4488_v54 = vrot.slane %v4487_v43, 4  ;;  %v4519_v27 = vadd.f32 %v4518_v61, %v4517_v8  ;;  %v4506_v60 = vrot.slane %v4505_v29, 1 }
 0x5a0   : > { %v4543_v55 = vsel %vm480_vm0, %v3983_v51, 0.0  ;;  %v3820_v53 = vperm.slane %v7409_v5, 3  ;;  %v3989_v14 = vmul.f32 %v5685_v45, %v7755_v23 }
 0x5a1   : > { %v4472_v6 = vadd.f32 %v4471_v41, %v4470_v30  ;;  %v4489_v38 = vadd.f32 %v4488_v54, %v4487_v43  ;;  %3783 = vperm.xlu1 %5597, %v3778_v12   ;;  %v4500_v30 = vadd.f32 %v4499_v48, %v4498_v21  ;;  %v4558_v43 = vrot.slane %v4557_v22, 4  ;;  %v5682_v41 = vld [vmem:[%s5958_s9 + $0x258] sm:$0xff] }
 0x5a2   : > { %v4544_v11 = vrot.slane %v4543_v55, 4  ;;  %v3986_v54 = vmul.f32 %v5682_v41, %v7739_v42  ;;  %v4520_v21 = vrot.slane %v4519_v27, 1  ;;  %v4585_v23 = vsel %vm480_vm0, %v3989_v14, 0.0 }
 0x5a3   : > { %v4490_v44 = vrot.slane %v4489_v38, 2  ;;  %v3490_v50 = vpop.permute.xlu1 %3489  ;;  %v5116_v33 = vsel %vm2801_vm6, %v4472_v6, %v5115_v25  ;;  %v4540_v6 = vadd.f32 %v4539_v63, %v4538_v16 }
 0x5a4   : > { %v3978_v24 = vmul.f32 %v5678_v35, %v3490_v50  ;;  %v5117_v4 = vsel %vm2803_vm7, %v4479_v46, %v5116_v33  ;;  %v7811_v46 = vpop.permute.xlu0 %3629  ;;  %v4559_v50 = vadd.f32 %v4558_v43, %v4557_v22  ;;  %v4545_v33 = vadd.f32 %v4544_v11, %v4543_v55  ;;  %v5687_v11 = vld [vmem:[%s5958_s9 + $0x280] sm:$0xff] }
 0x5a5   : > { %v4491_v13 = vadd.f32 %v4490_v44, %v4489_v38  ;;  %v5118_v58 = vsel %vm2805_vm8, %v4486_v32, %v5117_v4  ;;  %v4526_v38 = vadd.f32 %v4525_v15, %v4524_v26  ;;  %v4507_v32 = vadd.f32 %v4506_v60, %v4505_v29 }
 0x5a6   : > { %v4508_v10 = vsel %vm480_vm0, %v3978_v24, 0.0  ;;  %5198 = vxpose.xlu2.b32.cont [8/16] (narrow) %v5118_v58, 32  ;;  %v4564_v37 = vsel %vm480_vm0, %v3986_v54, 0.0  ;;  %v4541_v4 = vrot.slane %v4540_v6, 1  ;;  %v7821_v16 = vpop.permute.xlu2 %3643  ;;  %v4546_v26 = vrot.slane %v4545_v33, 2 }
 0x5a7   : > { %v4509_v59 = vrot.slane %v4508_v10, 4  ;;  %v4492_v34 = vrot.slane %v4491_v13, 1  ;;  %v4527_v8 = vrot.slane %v4526_v38, 1  ;;  %v4565_v28 = vrot.slane %v4564_v37, 4 }
 0x5a8   : > { %v3841_v29 = vperm.slane %v7409_v5, 6  ;;  %v4542_v22 = vadd.f32 %v4541_v4, %v4540_v6  ;;  %v3991_v41 = vmul.f32 %v5687_v11, %v7765_v20  ;;  %v4586_v54 = vrot.slane %v4585_v23, 4 }
 0x5a9   : > { %v4510_v18 = vadd.f32 %v4509_v59, %v4508_v10  ;;  %3804 = vperm.xlu1 %5597, %v3799_v3   ;;  %v4493_v47 = vadd.f32 %v4492_v34, %v4491_v13  ;;  %v5684_v13 = vld [vmem:[%s5958_s9 + $0x248] sm:$0xff]  ;;  %v4521_v10 = vadd.f32 %v4520_v21, %v4519_v27  ;;  %v4560_v59 = vrot.slane %v4559_v50, 2 }
 0x5aa   : > { %v4579_v3 = vrot.slane %v4578_v57, 4  ;;  %v4528_v55 = vadd.f32 %v4527_v8, %v4526_v38 }
 0x5ab   : > { %v4511_v17 = vrot.slane %v4510_v18, 2  ;;  %v3511_v0 = vpop.permute.xlu1 %3510  ;;  %v5119_v25 = vsel %vm2793_vm2, %v4500_v30, %v4493_v47  ;;  %v4561_v15 = vadd.f32 %v4560_v59, %v4559_v50  ;;  %v5686_v30 = vld [vmem:[%s5958_s9 + $0x288] sm:$0xff]  ;;  %v5690_v59 = vld [vmem:[%s5958_s9 + $0x278] sm:$0xff] }
 0x5ac   : > { %v3981_v2 = vmul.f32 %v5681_v40, %v3511_v0  ;;  %v5120_v56 = vsel %vm2795_vm3, %v4507_v32, %v5119_v25  ;;  %v4580_v47 = vadd.f32 %v4579_v3, %v4578_v57  ;;  %v4547_v40 = vadd.f32 %v4546_v26, %v4545_v33 }
 0x5ad   : > { %v4512_v19 = vadd.f32 %v4511_v17, %v4510_v18  ;;  %v4566_v17 = vadd.f32 %v4565_v28, %v4564_v37  ;;  %v3992_v27 = vmul.f32 %v5686_v30, %v7773_v31  ;;  %v4562_v38 = vrot.slane %v4561_v15, 1 }
 0x5ae   : > { %v4529_v12 = vsel %vm480_vm0, %v3981_v2, 0.0  ;;  %v7827_v2 = vpop.permute.xlu0 %3650  ;;  %v4581_v31 = vrot.slane %v4580_v47, 2  ;;  %v4548_v25 = vrot.slane %v4547_v40, 1  ;;  %v4599_v33 = vsel %vm480_vm0, %v3991_v41, 0.0  ;;  %v7843_v37 = vpop.permute.xlu2 %3664 }
 0x5af   : > { %v4513_v1 = vrot.slane %v4512_v19, 1  ;;  %v4530_v62 = vrot.slane %v4529_v12, 4  ;;  %v4606_v32 = vsel %vm480_vm0, %v3992_v27, 0.0  ;;  %v4587_v57 = vadd.f32 %v4586_v54, %v4585_v23 }
 0x5b0   : > { %v4582_v4 = vadd.f32 %v4581_v31, %v4580_v47  ;;  %v4607_v8 = vrot.slane %v4606_v32, 4  ;;  %v4600_v28 = vrot.slane %v4599_v33, 4 }
 0x5b1   : > { %v4514_v44 = vadd.f32 %v4513_v1, %v4512_v19  ;;  %v4531_v42 = vadd.f32 %v4530_v62, %v4529_v12  ;;  %3825 = vperm.xlu1 %5597, %v3820_v53   ;;  %v5688_v12 = vld [vmem:[%s5958_s9 + $0x260] sm:$0xff]  ;;  %v5689_v1 = vld [vmem:[%s5958_s9 + $0x298] sm:$0xff]  ;;  %v4567_v53 = vrot.slane %v4566_v17, 2  ;;  %v4588_v14 = vrot.slane %v4587_v57, 2 }
 0x5b2   : > { %v3994_v62 = vmul.f32 %v5689_v1, %v7785_v7 }
 0x5b3   : > { %v4532_v35 = vrot.slane %v4531_v42, 2  ;;  %v3532_v24 = vpop.permute.xlu1 %3531  ;;  %v5121_v36 = vsel %vm2797_vm4, %v4514_v44, %v5120_v56  ;;  %v4568_v56 = vadd.f32 %v4567_v53, %v4566_v17  ;;  %v4608_v17 = vadd.f32 %v4607_v8, %v4606_v32 }
 0x5b4   : > { %v3984_v58 = vmul.f32 %v5684_v13, %v3532_v24  ;;  %v5122_v18 = vsel %vm2799_vm5, %v4521_v10, %v5121_v36  ;;  %v4620_v7 = vsel %vm480_vm0, %v3994_v62, 0.0  ;;  %v4563_v36 = vadd.f32 %v4562_v38, %v4561_v15 }
 0x5b5   : > { %v4533_v51 = vadd.f32 %v4532_v35, %v4531_v42  ;;  %v5123_v5 = vsel %vm2801_vm6, %v4528_v55, %v5122_v18  ;;  %v8137_v42 = vld [vmem:[#allocation24_spill] sm:$0xff]  ;;  %v4549_v13 = vadd.f32 %v4548_v25, %v4547_v40  ;;  %v4621_v45 = vrot.slane %v4620_v7, 4 }
 0x5b6   : > { %v4550_v34 = vsel %vm480_vm0, %v3984_v58, 0.0  ;;  %v3862_v50 = vperm.slane %v8137_v42, 1  ;;  %v4569_v26 = vrot.slane %v4568_v56, 1  ;;  %v4583_v18 = vrot.slane %v4582_v4, 1  ;;  %v7860_v11 = vpop.permute.xlu2 %3685 }
 0x5b7   : > { %v4534_v48 = vrot.slane %v4533_v51, 1  ;;  %v4551_v61 = vrot.slane %v4550_v34, 4  ;;  %v3883_v40 = vperm.slane %v8137_v42, 4  ;;  %v4622_v30 = vadd.f32 %v4621_v45, %v4620_v7 }
 0x5b8   : > { %v4609_v41 = vrot.slane %v4608_v17, 2  ;;  %v4584_v31 = vadd.f32 %v4583_v18, %v4582_v4  ;;  %v5696_v18 = vld [vmem:[%s5958_s9 + $0x2a8] sm:$0xff] }
 0x5b9   : > { %v4535_v0 = vadd.f32 %v4534_v48, %v4533_v51  ;;  %v4552_v63 = vadd.f32 %v4551_v61, %v4550_v34  ;;  %3846 = vperm.xlu1 %5597, %v3841_v29   ;;  %v7846_v51 = vpop.permute.xlu0 %3671  ;;  %v5691_v34 = vld [vmem:[%s5958_s9 + $0x2a0] sm:$0xff] }
 0x5ba   : > { %v3995_v48 = vmul.f32 %v5691_v34, %v7792_v49  ;;  %v4589_v49 = vadd.f32 %v4588_v14, %v4587_v57 }
 0x5bb   : > { %v4553_v60 = vrot.slane %v4552_v63, 2  ;;  %v3553_v19 = vpop.permute.xlu1 %3552  ;;  %v5124_v43 = vsel %vm2803_vm7, %v4535_v0, %v5123_v5  ;;  %v5693_v0 = vld [vmem:[%s5958_s9 + $0x2b8] sm:$0xff]  ;;  %v4601_v5 = vadd.f32 %v4600_v28, %v4599_v33 }
 0x5bc   : > { %v3987_v52 = vmul.f32 %v5688_v12, %v3553_v19  ;;  %v5125_v39 = vsel %vm2805_vm8, %v4542_v22, %v5124_v43  ;;  %v5692_v22 = vld [vmem:[%s5958_s9 + $0x2b0] sm:$0xff]  ;;  %v4627_v19 = vsel %vm480_vm0, %v3995_v48, 0.0  ;;  %v4590_v1 = vrot.slane %v4589_v49, 1 }
 0x5bd   : > { %v4554_v6 = vadd.f32 %v4553_v60, %v4552_v63  ;;  %5199 = vxpose.xlu2.b32.cont [9/16] (narrow) %v5125_v39, 32  ;;  %v3997_v55 = vmul.f32 %v5692_v22, %v7802_v9  ;;  %v3998_v63 = vmul.f32 %v5693_v0, %v7811_v46  ;;  %v4570_v60 = vadd.f32 %v4569_v26, %v4568_v56 }
 0x5be   : > { %v4571_v21 = vsel %vm480_vm0, %v3987_v52, 0.0  ;;  %v4628_v62 = vrot.slane %v4627_v19, 4  ;;  %v4602_v25 = vrot.slane %v4601_v5, 2  ;;  %v4591_v8 = vadd.f32 %v4590_v1, %v4589_v49 }
 0x5bf   : > { %v4555_v44 = vrot.slane %v4554_v6, 1  ;;  %v4572_v20 = vrot.slane %v4571_v21, 4  ;;  %v4641_v46 = vsel %vm480_vm0, %v3997_v55, 0.0  ;;  %v4648_v54 = vsel %vm480_vm0, %v3998_v63, 0.0  ;;  %v5697_v63 = vld [vmem:[%s5958_s9 + $0x2d0] sm:$0xff] }
 0x5c0   : > { %v4603_v4 = vadd.f32 %v4602_v25, %v4601_v5  ;;  %v5699_v25 = vld [vmem:[%s5958_s9 + $0x2c0] sm:$0xff] }
 0x5c1   : > { %v4556_v35 = vadd.f32 %v4555_v44, %v4554_v6  ;;  %v4573_v24 = vadd.f32 %v4572_v20, %v4571_v21  ;;  %3867 = vperm.xlu1 %5597, %v3862_v50   ;;  %v5694_v6 = vld [vmem:[%s5958_s9 + $0x290] sm:$0xff]  ;;  %v4623_v21 = vrot.slane %v4622_v30, 2  ;;  %v4642_v44 = vrot.slane %v4641_v46, 4  ;;  %v7867_v33 = vpop.permute.xlu0 %3692 }
 0x5c2   : > { %v4610_v20 = vadd.f32 %v4609_v41, %v4608_v17  ;;  %v4649_v50 = vrot.slane %v4648_v54, 4 }
 0x5c3   : > { %v4574_v58 = vrot.slane %v4573_v24, 2  ;;  %v3574_v10 = vpop.permute.xlu1 %3573  ;;  %v5126_v61 = vsel %vm2793_vm2, %v4556_v35, %v4549_v13  ;;  %v3904_v35 = vperm.slane %v8137_v42, 7  ;;  %v5695_v13 = vld [vmem:[%s5958_s9 + $0x2c8] sm:$0xff]  ;;  %v4624_v45 = vadd.f32 %v4623_v21, %v4622_v30 }
 0x5c4   : > { %v3990_v3 = vmul.f32 %v5690_v59, %v3574_v10  ;;  %v5127_v27 = vsel %vm2795_vm3, %v4563_v36, %v5126_v61  ;;  %v4629_v36 = vadd.f32 %v4628_v62, %v4627_v19  ;;  %v4643_v14 = vadd.f32 %v4642_v44, %v4641_v46  ;;  %v7876_v61 = vpop.permute.xlu2 %3706  ;;  %v5700_v44 = vld [vmem:[%s5958_s9 + $0x2e8] sm:$0xff] }
 0x5c5   : > { %v4575_v29 = vadd.f32 %v4574_v58, %v4573_v24  ;;  %v5128_v12 = vsel %vm2797_vm4, %v4570_v60, %v5127_v27  ;;  %v4000_v58 = vmul.f32 %v5695_v13, %v7821_v16  ;;  %v4650_v26 = vadd.f32 %v4649_v50, %v4648_v54 }
 0x5c6   : > { %v4592_v23 = vsel %vm480_vm0, %v3990_v3, 0.0  ;;  %v4611_v3 = vrot.slane %v4610_v20, 1  ;;  %v4604_v16 = vrot.slane %v4603_v4, 1  ;;  %v4644_v0 = vrot.slane %v4643_v14, 2 }
 0x5c7   : > { %v4576_v15 = vrot.slane %v4575_v29, 1  ;;  %v4593_v47 = vrot.slane %v4592_v23, 4  ;;  %v4662_v55 = vsel %vm480_vm0, %v4000_v58, 0.0  ;;  %v4651_v5 = vrot.slane %v4650_v26, 2 }
 0x5c8   : > { %v4663_v27 = vrot.slane %v4662_v55, 4 }
 0x5c9   : > { %v4577_v9 = vadd.f32 %v4576_v15, %v4575_v29  ;;  %v4594_v43 = vadd.f32 %v4593_v47, %v4592_v23  ;;  %3888 = vperm.xlu1 %5597, %v3883_v40   ;;  %v4630_v29 = vrot.slane %v4629_v36, 2  ;;  %v4625_v23 = vrot.slane %v4624_v45, 1  ;;  %v7883_v19 = vpop.permute.xlu0 %3713 }
 0x5ca   : > { %v4001_v15 = vmul.f32 %v5697_v63, %v7827_v2  ;;  %v4612_v40 = vadd.f32 %v4611_v3, %v4610_v20  ;;  %v4652_v1 = vadd.f32 %v4651_v5, %v4650_v26  ;;  %v4004_v20 = vmul.f32 %v5700_v44, %v7846_v51 }
 0x5cb   : > { %v4595_v52 = vrot.slane %v4594_v43, 2  ;;  %v3595_v39 = vpop.permute.xlu1 %3594  ;;  %v5129_v53 = vsel %vm2799_vm5, %v4577_v9, %v5128_v12  ;;  %v4631_v60 = vadd.f32 %v4630_v29, %v4629_v36  ;;  %v4605_v9 = vadd.f32 %v4604_v16, %v4603_v4 }
 0x5cc   : > { %v3993_v38 = vmul.f32 %v5694_v6, %v3595_v39  ;;  %v5130_v24 = vsel %vm2801_vm6, %v4584_v31, %v5129_v53  ;;  %v4645_v12 = vadd.f32 %v4644_v0, %v4643_v14  ;;  %v4669_v2 = vsel %vm480_vm0, %v4001_v15, 0.0 }
 0x5cd   : > { %v4596_v32 = vadd.f32 %v4595_v52, %v4594_v43  ;;  %v5131_v59 = vsel %vm2803_vm7, %v4591_v8, %v5130_v24  ;;  %v5698_v43 = vld [vmem:[%s5958_s9 + $0x2e0] sm:$0xff]  ;;  %v4626_v52 = vadd.f32 %v4625_v23, %v4624_v45  ;;  %v5133_v39 = vsel %vm2793_vm2, %v4612_v40, %v4605_v9 }
 0x5ce   : > { %v4613_v57 = vsel %vm480_vm0, %v3993_v38, 0.0  ;;  %v4003_v41 = vmul.f32 %v5698_v43, %v7843_v37  ;;  %v4664_v6 = vadd.f32 %v4663_v27, %v4662_v55  ;;  %v4632_v38 = vrot.slane %v4631_v60, 1  ;;  %v5702_v55 = vld [vmem:[%s5958_s9 + $0x2d8] sm:$0xff] }
 0x5cf   : > { %v4597_v7 = vrot.slane %v4596_v32, 1  ;;  %v4614_v56 = vrot.slane %v4613_v57, 4  ;;  %v4653_v8 = vrot.slane %v4652_v1, 1  ;;  %v4690_v51 = vsel %vm480_vm0, %v4004_v20, 0.0 }
 0x5d0   : > { %v4683_v37 = vsel %vm480_vm0, %v4003_v41, 0.0  ;;  %v4665_v58 = vrot.slane %v4664_v6, 2  ;;  %v4691_v16 = vrot.slane %v4690_v51, 4 }
 0x5d1   : > { %v4598_v10 = vadd.f32 %v4597_v7, %v4596_v32  ;;  %v4615_v28 = vadd.f32 %v4614_v56, %v4613_v57  ;;  %3909 = vperm.xlu1 %5597, %v3904_v35   ;;  %v4670_v32 = vrot.slane %v4669_v2, 4  ;;  %v4646_v57 = vrot.slane %v4645_v12, 1  ;;  %v5701_v7 = vld [vmem:[%s5958_s9 + $0x2f8] sm:$0xff]  ;;  %v7896_v35 = vpop.permute.xlu2 %3727 }
 0x5d2   : > { %v4006_v56 = vmul.f32 %v5701_v7, %v7860_v11  ;;  %v7901_v11 = vpop.permute.xlu0 %3734  ;;  %v4666_v0 = vadd.f32 %v4665_v58, %v4664_v6  ;;  %v4692_v43 = vadd.f32 %v4691_v16, %v4690_v51  ;;  %v5707_v58 = vld [vmem:[%s5958_s9 + $0x328] sm:$0xff] }
 0x5d3   : > { %v4616_v42 = vrot.slane %v4615_v28, 2  ;;  %v3616_v34 = vpop.permute.xlu1 %3615  ;;  %v5132_v48 = vsel %vm2805_vm8, %v4598_v10, %v5131_v59  ;;  %v4684_v10 = vrot.slane %v4683_v37, 4  ;;  %v4671_v45 = vadd.f32 %v4670_v32, %v4669_v2  ;;  %v5709_v16 = vld [vmem:[%s5958_s9 + $0x308] sm:$0xff] }
 0x5d4   : > { %v3996_v22 = vmul.f32 %v5696_v18, %v3616_v34  ;;  %5200 = vxpose.xlu2.b32.cont [10/16] (narrow) %v5132_v48, 32  ;;  %v4647_v3 = vadd.f32 %v4646_v57, %v4645_v12  ;;  %v4654_v34 = vadd.f32 %v4653_v8, %v4652_v1  ;;  %v4693_v6 = vrot.slane %v4692_v43, 2  ;;  %v5706_v57 = vld [vmem:[%s5958_s9 + $0x318] sm:$0xff] }
 0x5d5   : > { %v4617_v17 = vadd.f32 %v4616_v42, %v4615_v28  ;;  %v4633_v28 = vadd.f32 %v4632_v38, %v4631_v60  ;;  %v4704_v42 = vsel %vm480_vm0, %v4006_v56, 0.0  ;;  %v4672_v63 = vrot.slane %v4671_v45, 2 }
 0x5d6   : > { %v4634_v47 = vsel %vm480_vm0, %v3996_v22, 0.0  ;;  %v4685_v22 = vadd.f32 %v4684_v10, %v4683_v37  ;;  %v4705_v40 = vrot.slane %v4704_v42, 4  ;;  %v4010_v7 = vmul.f32 %v5706_v57, %v7883_v19 }
 0x5d7   : > { %v4618_v30 = vrot.slane %v4617_v17, 1  ;;  %v4635_v49 = vrot.slane %v4634_v47, 4  ;;  %v4012_v10 = vmul.f32 %v5707_v58, %v7896_v35 }
 0x5d8   : > { %v4686_v60 = vrot.slane %v4685_v22, 2  ;;  %v4706_v2 = vadd.f32 %v4705_v40, %v4704_v42 }
 0x5d9   : > { %v4619_v46 = vadd.f32 %v4618_v30, %v4617_v17  ;;  %v4636_v54 = vadd.f32 %v4635_v49, %v4634_v47  ;;  %v5703_v30 = vld [vmem:[%s5958_s9 + $0x300] sm:$0xff]  ;;  %v7912_v9 = vpop.permute.xlu2 %3748 }
 0x5da   : > { %v4007_v49 = vmul.f32 %v5703_v30, %v7867_v33  ;;  %v4687_v33 = vadd.f32 %v4686_v60, %v4685_v22  ;;  %v3756_v38 = vpop.permute.xlu0 %3755  ;;  %v4707_v20 = vrot.slane %v4706_v2, 2 }
 0x5db   : > { %v4637_v62 = vrot.slane %v4636_v54, 2  ;;  %v3637_v53 = vpop.permute.xlu1 %3636  ;;  %v5134_v31 = vsel %vm2795_vm3, %v4619_v46, %v5133_v39  ;;  %v4667_v46 = vrot.slane %v4666_v0, 1 }
 0x5dc   : > { %v3999_v21 = vmul.f32 %v5699_v25, %v3637_v53  ;;  %v5135_v36 = vsel %vm2797_vm4, %v4626_v52, %v5134_v31  ;;  %v5704_v52 = vld [vmem:[%s5958_s9 + $0x310] sm:$0xff]  ;;  %v4711_v1 = vsel %vm480_vm0, %v4007_v49, 0.0 }
 0x5dd   : > { %v4638_v50 = vadd.f32 %v4637_v62, %v4636_v54  ;;  %v5136_v26 = vsel %vm2799_vm5, %v4633_v28, %v5135_v36  ;;  %v4673_v54 = vadd.f32 %v4672_v63, %v4671_v45  ;;  %v4009_v39 = vmul.f32 %v5704_v52, %v7876_v61  ;;  %v5705_v25 = vld [vmem:[%s5958_s9 + $0x2f0] sm:$0xff] }
 0x5de   : > { %v4655_v24 = vsel %vm480_vm0, %v3999_v21, 0.0  ;;  %v4668_v37 = vadd.f32 %v4667_v46, %v4666_v0  ;;  %v4688_v36 = vrot.slane %v4687_v33, 1 }
 0x5df   : > { %v4639_v4 = vrot.slane %v4638_v50, 1  ;;  %v4656_v13 = vrot.slane %v4655_v24, 4  ;;  %v4674_v32 = vrot.slane %v4673_v54, 1  ;;  %v4725_v56 = vsel %vm480_vm0, %v4009_v39, 0.0 }
 0x5e0   : > { %v4726_v19 = vrot.slane %v4725_v56, 4 }
 0x5e1   : > { %v4640_v14 = vadd.f32 %v4639_v4, %v4638_v50  ;;  %v4657_v59 = vadd.f32 %v4656_v13, %v4655_v24  ;;  %v4712_v50 = vrot.slane %v4711_v1, 4  ;;  %v4694_v4 = vadd.f32 %v4693_v6, %v4692_v43 }
 0x5e2   : > { %v4675_v28 = vadd.f32 %v4674_v32, %v4673_v54  ;;  %v5711_v32 = vld [vmem:[%s5958_s9 + $0x320] sm:$0xff] }
 0x5e3   : > { %v4658_v48 = vrot.slane %v4657_v59, 2  ;;  %v3658_v29 = vpop.permute.xlu1 %3657  ;;  %v5137_v18 = vsel %vm2801_vm6, %v4640_v14, %v5136_v26  ;;  %v4708_v14 = vadd.f32 %v4707_v20, %v4706_v2  ;;  %v4732_v26 = vsel %vm480_vm0, %v4010_v7, 0.0 }
 0x5e4   : > { %v4002_v17 = vmul.f32 %v5702_v55, %v3658_v29  ;;  %v5138_v23 = vsel %vm2803_vm7, %v4647_v3, %v5137_v18  ;;  %v4713_v3 = vadd.f32 %v4712_v50, %v4711_v1  ;;  %v4695_v29 = vrot.slane %v4694_v4, 1  ;;  %v5708_v18 = vld [vmem:[%s5958_s9 + $0x330] sm:$0xff]  ;;  %v5712_v50 = vld [vmem:[%s5958_s9 + $0x340] sm:$0xff] }
 0x5e5   : > { %v4659_v15 = vadd.f32 %v4658_v48, %v4657_v59  ;;  %v5139_v47 = vsel %vm2805_vm8, %v4654_v34, %v5138_v23  ;;  %v3770_v59 = vpop.permute.xlu2 %3769  ;;  %v4013_v22 = vmul.f32 %v5708_v18, %v7901_v11  ;;  %v4746_v23 = vsel %vm480_vm0, %v4012_v10, 0.0  ;;  %v5713_v10 = vld [vmem:[%s5958_s9 + $0x358] sm:$0xff] }
 0x5e6   : > { %v4676_v5 = vsel %vm480_vm0, %v4002_v17, 0.0  ;;  %5201 = vxpose.xlu2.b32.cont [11/16] (narrow) %v5139_v47, 32  ;;  %v4689_v17 = vadd.f32 %v4688_v36, %v4687_v33  ;;  %v4733_v0 = vrot.slane %v4732_v26, 4  ;;  %v4727_v47 = vadd.f32 %v4726_v19, %v4725_v56 }
 0x5e7   : > { %v4677_v27 = vrot.slane %v4676_v5, 4  ;;  %v4660_v41 = vrot.slane %v4659_v15, 1  ;;  %v4714_v40 = vrot.slane %v4713_v3, 2  ;;  %v4747_v60 = vrot.slane %v4746_v23, 4 }
 0x5e8   : > { %v4696_v43 = vadd.f32 %v4695_v29, %v4694_v4  ;;  %v4734_v46 = vadd.f32 %v4733_v0, %v4732_v26  ;;  %v4728_v52 = vrot.slane %v4727_v47, 2  ;;  %v4015_v57 = vmul.f32 %v5712_v50, %v7912_v9 }
 0x5e9   : > { %v4678_v12 = vadd.f32 %v4677_v27, %v4676_v5  ;;  %v4661_v31 = vadd.f32 %v4660_v41, %v4659_v15  ;;  %v4709_v15 = vrot.slane %v4708_v14, 1  ;;  %v3777_v5 = vpop.permute.xlu0 %3776  ;;  %v4753_v41 = vsel %vm480_vm0, %v4013_v22, 0.0 }
 0x5ea   : > { %v4715_v39 = vadd.f32 %v4714_v40, %v4713_v3  ;;  %v4735_v7 = vrot.slane %v4734_v46, 2  ;;  %v4729_v56 = vadd.f32 %v4728_v52, %v4727_v47  ;;  %v5716_v47 = vld [vmem:[%s5958_s9 + $0x370] sm:$0xff] }
 0x5eb   : > { %v4679_v62 = vrot.slane %v4678_v12, 2  ;;  %v3679_v53 = vpop.permute.xlu1 %3678  ;;  %v5140_v13 = vsel %vm2793_vm2, %v4668_v37, %v4661_v31  ;;  %v4710_v2 = vadd.f32 %v4709_v15, %v4708_v14 }
 0x5ec   : > { %v4005_v21 = vmul.f32 %v5705_v25, %v3679_v53  ;;  %v5141_v42 = vsel %vm2795_vm3, %v4675_v28, %v5140_v13  ;;  %v5710_v53 = vld [vmem:[%s5958_s9 + $0x348] sm:$0xff]  ;;  %v4018_v28 = vmul.f32 %v5713_v10, %v3770_v59  ;;  %v4736_v9 = vadd.f32 %v4735_v7, %v4734_v46 }
 0x5ed   : > { %v4680_v44 = vadd.f32 %v4679_v62, %v4678_v12  ;;  %v4754_v62 = vrot.slane %v4753_v41, 4  ;;  %v4016_v33 = vmul.f32 %v5710_v53, %v3756_v38  ;;  %v3791_v37 = vpop.permute.xlu2 %3790  ;;  %v4730_v3 = vrot.slane %v4729_v56, 1 }
 0x5ee   : > { %v4697_v61 = vsel %vm480_vm0, %v4005_v21, 0.0  ;;  %v4748_v21 = vadd.f32 %v4747_v60, %v4746_v23  ;;  %v4021_v40 = vmul.f32 %v5716_v47, %v3791_v37 }
 0x5ef   : > { %v4681_v24 = vrot.slane %v4680_v44, 1  ;;  %v4698_v8 = vrot.slane %v4697_v61, 4  ;;  %v4774_v36 = vsel %vm480_vm0, %v4016_v33, 0.0  ;;  %v4731_v15 = vadd.f32 %v4730_v3, %v4729_v56 }
 0x5f0   : > { %v4749_v58 = vrot.slane %v4748_v21, 2  ;;  %v4775_v26 = vrot.slane %v4774_v36, 4  ;;  %v4809_v53 = vsel %vm480_vm0, %v4021_v40, 0.0 }
 0x5f1   : > { %v4682_v45 = vadd.f32 %v4681_v24, %v4680_v44  ;;  %v4699_v51 = vadd.f32 %v4698_v8, %v4697_v61  ;;  %v4716_v24 = vrot.slane %v4715_v39, 1  ;;  %v4755_v8 = vadd.f32 %v4754_v62, %v4753_v41 }
 0x5f2   : > { %v4750_v18 = vadd.f32 %v4749_v58, %v4748_v21 }
 0x5f3   : > { %v4700_v34 = vrot.slane %v4699_v51, 2  ;;  %v3700_v48 = vpop.permute.xlu1 %3699  ;;  %v5142_v35 = vsel %vm2797_vm4, %v4682_v45, %v5141_v42  ;;  %v3798_v45 = vpop.permute.xlu0 %3797  ;;  %v4717_v42 = vadd.f32 %v4716_v24, %v4715_v39  ;;  %v4810_v24 = vrot.slane %v4809_v53, 4 }
 0x5f4   : > { %v4008_v55 = vmul.f32 %v5709_v16, %v3700_v48  ;;  %v5143_v11 = vsel %vm2799_vm5, %v4689_v17, %v5142_v35  ;;  %v4788_v35 = vsel %vm480_vm0, %v4018_v28, 0.0  ;;  %v5714_v16 = vld [vmem:[%s5958_s9 + $0x338] sm:$0xff]  ;;  %v5715_v17 = vld [vmem:[%s5958_s9 + $0x360] sm:$0xff]  ;;  %v4751_v46 = vrot.slane %v4750_v18, 1 }
 0x5f5   : > { %v4701_v63 = vadd.f32 %v4700_v34, %v4699_v51  ;;  %v5144_v1 = vsel %vm2801_vm6, %v4696_v43, %v5143_v11  ;;  %v4767_v51 = vsel %vm480_vm0, %v4015_v57, 0.0  ;;  %v4756_v34 = vrot.slane %v4755_v8, 2  ;;  %v5718_v57 = vld [vmem:[%s5958_s9 + $0x350] sm:$0xff] }
 0x5f6   : > { %v4718_v30 = vsel %vm480_vm0, %v4008_v55, 0.0  ;;  %v4768_v22 = vrot.slane %v4767_v51, 4  ;;  %v4737_v55 = vrot.slane %v4736_v9, 1  ;;  %v4019_v23 = vmul.f32 %v5715_v17, %v3777_v5 }
 0x5f7   : > { %v4702_v49 = vrot.slane %v4701_v63, 1  ;;  %v4719_v27 = vrot.slane %v4718_v30, 4  ;;  %v4789_v11 = vrot.slane %v4788_v35, 4  ;;  %v4757_v60 = vadd.f32 %v4756_v34, %v4755_v8 }
 0x5f8   : > { %v4738_v52 = vadd.f32 %v4737_v55, %v4736_v9  ;;  %v4795_v39 = vsel %vm480_vm0, %v4019_v23, 0.0  ;;  %v5720_v23 = vld [vmem:[%s5958_s9 + $0x368] sm:$0xff] }
 0x5f9   : > { %v4703_v54 = vadd.f32 %v4702_v49, %v4701_v63  ;;  %v4720_v12 = vadd.f32 %v4719_v27, %v4718_v30  ;;  %v3812_v30 = vpop.permute.xlu2 %3811  ;;  %v4776_v49 = vadd.f32 %v4775_v26, %v4774_v36 }
 0x5fb   : > { %v4721_v6 = vrot.slane %v4720_v12, 2  ;;  %v3721_v31 = vpop.permute.xlu1 %3720  ;;  %v5145_v25 = vsel %vm2803_vm7, %v4703_v54, %v5144_v1  ;;  %v4769_v54 = vadd.f32 %v4768_v22, %v4767_v51  ;;  %v4777_v33 = vrot.slane %v4776_v49, 2 }
 0x5fc   : > { %v4011_v44 = vmul.f32 %v5711_v32, %v3721_v31  ;;  %v5146_v20 = vsel %vm2805_vm8, %v4710_v2, %v5145_v25  ;;  %v4790_v31 = vadd.f32 %v4789_v11, %v4788_v35  ;;  %v4758_v25 = vrot.slane %v4757_v60, 1 }
 0x5fd   : > { %v4722_v61 = vadd.f32 %v4721_v6, %v4720_v12  ;;  %5202 = vxpose.xlu2.b32.cont [12/16] (narrow) %v5146_v20, 32  ;;  %v5717_v12 = vld [vmem:[%s5958_s9 + $0x378] sm:$0xff]  ;;  %v7956_v6 = vpop.permute.xlu0 %3818  ;;  %v4770_v56 = vrot.slane %v4769_v54, 2  ;;  %v4778_v8 = vadd.f32 %v4777_v33, %v4776_v49 }
 0x5fe   : > { %v4739_v38 = vsel %vm480_vm0, %v4011_v44, 0.0  ;;  %v4022_v2 = vmul.f32 %v5717_v12, %v3798_v45  ;;  %v4796_v44 = vrot.slane %v4795_v39, 4  ;;  %v4791_v28 = vrot.slane %v4790_v31, 2 }
 0x5ff   : > { %v4723_v4 = vrot.slane %v4722_v61, 1  ;;  %v4740_v13 = vrot.slane %v4739_v38, 4  ;;  %v4759_v51 = vadd.f32 %v4758_v25, %v4757_v60 }
 0x600   : > { %v4816_v20 = vsel %vm480_vm0, %v4022_v2, 0.0  ;;  %v4797_v9 = vadd.f32 %v4796_v44, %v4795_v39 }
 0x601   : > { %v4724_v14 = vadd.f32 %v4723_v4, %v4722_v61  ;;  %v4741_v19 = vadd.f32 %v4740_v13, %v4739_v38  ;;  %v4752_v61 = vadd.f32 %v4751_v46, %v4750_v18  ;;  %v4817_v4 = vrot.slane %v4816_v20, 4  ;;  %v3833_v45 = vpop.permute.xlu2 %3832 }
 0x602   : > { %v4798_v55 = vrot.slane %v4797_v9, 2 }
 0x603   : > { %v4742_v48 = vrot.slane %v4741_v19, 2  ;;  %v3742_v29 = vpop.permute.xlu1 %3741  ;;  %v5147_v0 = vsel %vm2793_vm2, %v4724_v14, %v4717_v42  ;;  %v4771_v14 = vadd.f32 %v4770_v56, %v4769_v54  ;;  %v5719_v42 = vld [vmem:[%s5958_s9 + $0x388] sm:$0xff]  ;;  %v4818_v18 = vadd.f32 %v4817_v4, %v4816_v20 }
 0x604   : > { %v4014_v59 = vmul.f32 %v5714_v16, %v3742_v29  ;;  %v5148_v5 = vsel %vm2795_vm3, %v4731_v15, %v5147_v0  ;;  %v4024_v34 = vmul.f32 %v5719_v42, %v3812_v30  ;;  %v4779_v29 = vrot.slane %v4778_v8, 1 }
 0x605   : > { %v4743_v63 = vadd.f32 %v4742_v48, %v4741_v19  ;;  %v5149_v21 = vsel %vm2797_vm4, %v4738_v52, %v5148_v5  ;;  %v4811_v19 = vadd.f32 %v4810_v24, %v4809_v53  ;;  %v3840_v17 = vpop.permute.xlu0 %3839 }
 0x606   : > { %v4760_v27 = vsel %vm480_vm0, %v4014_v59, 0.0  ;;  %v4792_v59 = vadd.f32 %v4791_v28, %v4790_v31 }
 0x607   : > { %v4744_v43 = vrot.slane %v4743_v63, 1  ;;  %v4761_v41 = vrot.slane %v4760_v27, 4  ;;  %v4812_v15 = vrot.slane %v4811_v19, 2 }
 0x609   : > { %v4745_v1 = vadd.f32 %v4744_v43, %v4743_v63  ;;  %v4762_v62 = vadd.f32 %v4761_v41, %v4760_v27  ;;  %v4772_v63 = vrot.slane %v4771_v14, 1 }
 0x60b   : > { %v4763_v37 = vrot.slane %v4762_v62, 2  ;;  %v3763_v32 = vpop.permute.xlu1 %3762  ;;  %v5150_v50 = vsel %vm2799_vm5, %v4745_v1, %v5149_v21 }
 0x60c   : > { %v4017_v7 = vmul.f32 %v5718_v57, %v3763_v32  ;;  %v5151_v10 = vsel %vm2801_vm6, %v4752_v61, %v5150_v50 }
 0x60d   : > { %v4764_v38 = vadd.f32 %v4763_v37, %v4762_v62  ;;  %v5152_v48 = vsel %vm2803_vm7, %v4759_v51, %v5151_v10 }
 0x60e   : > { %v4781_v36 = vsel %vm480_vm0, %v4017_v7, 0.0 }
 0x60f   : > { %v4765_v13 = vrot.slane %v4764_v38, 1  ;;  %v4782_v58 = vrot.slane %v4781_v36, 4 }
 0x611   : > { %v4766_v3 = vadd.f32 %v4765_v13, %v4764_v38  ;;  %v4783_v26 = vadd.f32 %v4782_v58, %v4781_v36 }
 0x613   : > { %v4784_v22 = vrot.slane %v4783_v26, 2  ;;  %v3784_v35 = vpop.permute.xlu1 %3783  ;;  %v5153_v16 = vsel %vm2805_vm8, %v4766_v3, %v5152_v48 }
 0x614   : > { %v4020_v0 = vmul.f32 %v5720_v23, %v3784_v35  ;;  %5203 = vxpose.xlu2.b32.cont [13/16] (narrow) %v5153_v16, 32 }
 0x615   : > { %v4785_v47 = vadd.f32 %v4784_v22, %v4783_v26 }
 0x616   : > { %5763 = shalt.err (!%p5760_p7)
}
 0x617   : > { %5550 = dma.vmem_to_hbm [thread:$0]  (%p5913_p5), %s5262_s17, 128, %s5264_s18, %s5233_s21   ;;  %v4830_v40 = vsel %vm480_vm0, %v4024_v34, 0.0  ;;  %v5721_v30 = vld [vmem:[%s5958_s9 + $0x3a0] sm:$0xff]  ;;  %v5722_v27 = vld [vmem:[%s5958_s9 + $0x390] sm:$0xff]  ;;  %v4802_v60 = vsel %vm480_vm0, %v4020_v0, 0.0  ;;  %v4780_v43 = vadd.f32 %v4779_v29, %v4778_v8  ;;  %v4819_v41 = vrot.slane %v4818_v18, 2  ;;  %v3854_v53 = vpop.permute.xlu2 %3853  ;;  %v3861_v58 = vpop.permute.xlu0 %3860 }
 0x618   : > { %v4027_v49 = vmul.f32 %v5721_v30, %v3833_v45  ;;  %v4025_v11 = vmul.f32 %v5722_v27, %v7956_v6  ;;  %v4786_v46 = vrot.slane %v4785_v47, 1  ;;  %v4803_v54 = vrot.slane %v4802_v60, 4  ;;  %v5723_v50 = vld [vmem:[%s5958_s9 + $0x380] sm:$0xff]  ;;  %v5724_v56 = vld [vmem:[%s5958_s9 + $0x3a8] sm:$0xff]  ;;  %v5725_v4 = vld [vmem:[%s5958_s9 + $0x3b8] sm:$0xff]  ;;  %s5243_s21 = scalar_lea.hbm %s8080_s6, %s5533_s13  ;;  %s5228_s29 = scalar_lea.sflag [#allocation3], %s7267_s8 }
 0x619   : > { %v4793_v12 = vrot.slane %v4792_v59, 1  ;;  %v4799_v2 = vadd.f32 %v4798_v55, %v4797_v9  ;;  %v4773_v5 = vadd.f32 %v4772_v63, %v4771_v14  ;;  %v4813_v52 = vadd.f32 %v4812_v15, %v4811_v19  ;;  %v5726_v0 = vld [vmem:[%s5958_s9 + $0x398] sm:$0xff]  ;;  %s5246_s23 = sshll.u32 %s5243_s21, 4  ;;  %s5784_s15 = scalar_lea.hbm %s8080_s6, 64  ;;  %s5247_s23 = int_to_ptr.hbm [resolvable:$true] %s5246_s23 }
 0x61a   : > { %v4787_v39 = vadd.f32 %v4786_v46, %v4785_v47  ;;  %v4804_v1 = vadd.f32 %v4803_v54, %v4802_v60  ;;  %v4831_v62 = vrot.slane %v4830_v40, 4  ;;  %v4837_v33 = vsel %vm480_vm0, %v4025_v11, 0.0  ;;  %v5727_v46 = vld [vmem:[%s5958_s9 + $0x3c0] sm:$0xff]  ;;  %s5778_s19 = sshra.s32 %s5247_s23, 4  ;;  %s5779_s19 = int_to_ptr.hbm [resolvable:$true] %s5778_s19 }
 0x61b   : > { %v4851_v6 = vsel %vm480_vm0, %v4027_v49, 0.0  ;;  %v5154_v31 = vsel %vm2793_vm2, %v4780_v43, %v4773_v5  ;;  %v4820_v25 = vadd.f32 %v4819_v41, %v4818_v18  ;;  %v3805_v37 = vpop.permute.xlu1 %3804  ;;  %v4794_v32 = vadd.f32 %v4793_v12, %v4792_v59  ;;  %s5780_s20 = scalar_lea.hbm %s5779_s19, 32  ;;  %p5785_p11 = scmp.lt.s32.totalorder %s5779_s19, %s8080_s6 }
 0x61c   : > { %v4805_v21 = vrot.slane %v4804_v1, 2  ;;  %v4800_v44 = vrot.slane %v4799_v2, 1  ;;  %v5155_v20 = vsel %vm2795_vm3, %v4787_v39, %v5154_v31  ;;  %v4023_v57 = vmul.f32 %v5723_v50, %v3805_v37  ;;  %p5781_p8 = scmp.ne.s32.totalorder %s5779_s19, %s5780_s20  ;;  %p5786_p12 = scmp.lt.s32.totalorder %s5784_s15, %s5780_s20 }
 0x61d   : > { %v4814_v7 = vrot.slane %v4813_v52, 1  ;;  %v4838_v61 = vrot.slane %v4837_v33, 4  ;;  %v4028_v24 = vmul.f32 %v5724_v56, %v3840_v17  ;;  %v4832_v8 = vadd.f32 %v4831_v62, %v4830_v40  ;;  %v5730_v56 = vld [vmem:[%s5958_s9 + $0x3d8] sm:$0xff] }
 0x61e   : > { %v4806_v38 = vadd.f32 %v4805_v21, %v4804_v1  ;;  %v4852_v36 = vrot.slane %v4851_v6, 4  ;;  %v4030_v13 = vmul.f32 %v5725_v4, %v3854_v53  ;;  %v4823_v10 = vsel %vm480_vm0, %v4023_v57, 0.0  ;;  %v5728_v53 = vld [vmem:[%s5958_s9 + $0x3d0] sm:$0xff]  ;;  %p5782_p9 = pnand %p5781_p8, %p5913_p5  ;;  %p5787_p13 = por %p5786_p12, %p5785_p11 }
 0x61f   : > { %v4821_v28 = vrot.slane %v4820_v25, 1  ;;  %v5156_v45 = vsel %vm2797_vm4, %v4794_v32, %v5155_v20  ;;  %v4824_v9 = vrot.slane %v4823_v10, 4  ;;  %v4801_v14 = vadd.f32 %v4800_v44, %v4799_v2  ;;  %v3875_v17 = vpop.permute.xlu2 %3874  ;;  %v3882_v12 = vpop.permute.xlu0 %3881  ;;  %v5729_v32 = vld [vmem:[%s5958_s9 + $0x3b0] sm:$0xff] }
 0x620   : > { %v4807_v51 = vrot.slane %v4806_v38, 1  ;;  %v4839_v19 = vadd.f32 %v4838_v61, %v4837_v33  ;;  %v4858_v3 = vsel %vm480_vm0, %v4028_v24, 0.0  ;;  %v4815_v34 = vadd.f32 %v4814_v7, %v4813_v52  ;;  %p5783_p10 = pneg %p5782_p9 }
 0x621   : > { %v4825_v42 = vadd.f32 %v4824_v9, %v4823_v10  ;;  %v4833_v48 = vrot.slane %v4832_v8, 2  ;;  %v4853_v29 = vadd.f32 %v4852_v36, %v4851_v6  ;;  %v5157_v18 = vsel %vm2799_vm5, %v4801_v14, %v5156_v45  ;;  %v5731_v45 = vld [vmem:[%s5958_s9 + $0x3e8] sm:$0xff] }
 0x622   : > { %v4808_v26 = vadd.f32 %v4807_v51, %v4806_v38  ;;  %v4872_v22 = vsel %vm480_vm0, %v4030_v13, 0.0  ;;  %v4822_v35 = vadd.f32 %v4821_v28, %v4820_v25  ;;  %v4859_v23 = vrot.slane %v4858_v3, 4  ;;  %p5788_p0 = pnand %p5787_p13, %p5783_p10 }
 0x623   : > { %v4826_v16 = vrot.slane %v4825_v42, 2  ;;  %v3826_v59 = vpop.permute.xlu1 %3825  ;;  %v4840_v47 = vrot.slane %v4839_v19, 2  ;;  %v4834_v49 = vadd.f32 %v4833_v48, %v4832_v8  ;;  %v4873_v27 = vrot.slane %v4872_v22, 4 }
 0x624   : > { %v5158_v55 = vsel %vm2801_vm6, %v4808_v26, %v5157_v18  ;;  %v4026_v63 = vmul.f32 %v5726_v0, %v3826_v59  ;;  %v4854_v60 = vrot.slane %v4853_v29, 2  ;;  %v4860_v41 = vadd.f32 %v4859_v23, %v4858_v3 }
 0x625   : > { %v5159_v15 = vsel %vm2803_vm7, %v4815_v34, %v5158_v55  ;;  %v4827_v40 = vadd.f32 %v4826_v16, %v4825_v42  ;;  %v4031_v54 = vmul.f32 %v5727_v46, %v3861_v58  ;;  %v4841_v5 = vadd.f32 %v4840_v47, %v4839_v19  ;;  %v5732_v55 = vld [vmem:[%s5958_s9 + $0x3c8] sm:$0xff] }
 0x626   : > { %v5160_v30 = vsel %vm2805_vm8, %v4822_v35, %v5159_v15  ;;  %v4844_v11 = vsel %vm480_vm0, %v4026_v63, 0.0  ;;  %v4835_v39 = vrot.slane %v4834_v49, 1  ;;  %v4874_v1 = vadd.f32 %v4873_v27, %v4872_v22  ;;  %v5733_v63 = vld [vmem:[%s5958_s9 + $0x3f0] sm:$0xff] }
 0x627   : > { %5204 = vxpose.xlu2.b32.cont [14/16] (narrow) %v5160_v30, 32  ;;  %v4845_v43 = vrot.slane %v4844_v11, 4  ;;  %v4828_v2 = vrot.slane %v4827_v40, 1  ;;  %v4855_v62 = vadd.f32 %v4854_v60, %v4853_v29  ;;  %v4033_v33 = vmul.f32 %v5728_v53, %v3875_v17  ;;  %v3896_v61 = vpop.permute.xlu2 %3895  ;;  %v3903_v34 = vpop.permute.xlu0 %3902 }
 0x628   : > { %v4861_v25 = vrot.slane %v4860_v41, 2  ;;  %v4879_v21 = vsel %vm480_vm0, %v4031_v54, 0.0  ;;  %v4842_v20 = vrot.slane %v4841_v5, 1  ;;  %v4836_v57 = vadd.f32 %v4835_v39, %v4834_v49 }
 0x629   : > { %v4846_v52 = vadd.f32 %v4845_v43, %v4844_v11  ;;  %v4829_v37 = vadd.f32 %v4828_v2, %v4827_v40  ;;  %v4875_v7 = vrot.slane %v4874_v1, 2  ;;  %v4034_v24 = vmul.f32 %v5730_v56, %v3882_v12 }
 0x62a   : > { %v4893_v8 = vsel %vm480_vm0, %v4033_v33, 0.0  ;;  %v4880_v36 = vrot.slane %v4879_v21, 4  ;;  %v4856_v58 = vrot.slane %v4855_v62, 1  ;;  %v4862_v10 = vadd.f32 %v4861_v25, %v4860_v41  ;;  %v5734_v25 = vld [vmem:[%s5958_s9 + $0x3e0] sm:$0xff] }
 0x62b   : > { %v4847_v6 = vrot.slane %v4846_v52, 2  ;;  %v3847_v31 = vpop.permute.xlu1 %3846  ;;  %v5161_v28 = vsel %vm2793_vm2, %v4836_v57, %v4829_v37  ;;  %v4036_v51 = vmul.f32 %v5731_v45, %v3896_v61  ;;  %v4843_v9 = vadd.f32 %v4842_v20, %v4841_v5 }
 0x62c   : > { %v4029_v44 = vmul.f32 %v5729_v32, %v3847_v31  ;;  %v4876_v3 = vadd.f32 %v4875_v7, %v4874_v1  ;;  %v4894_v26 = vrot.slane %v4893_v8, 4  ;;  %v4900_v42 = vsel %vm480_vm0, %v4034_v24, 0.0 }
 0x62d   : > { %v4848_v50 = vadd.f32 %v4847_v6, %v4846_v52  ;;  %v4881_v48 = vadd.f32 %v4880_v36, %v4879_v21  ;;  %v5162_v29 = vsel %vm2795_vm3, %v4843_v9, %v5161_v28  ;;  %v4857_v35 = vadd.f32 %v4856_v58, %v4855_v62 }
 0x62e   : > { %v4865_v38 = vsel %vm480_vm0, %v4029_v44, 0.0  ;;  %v4863_v16 = vrot.slane %v4862_v10, 1  ;;  %v4914_v23 = vsel %vm480_vm0, %v4036_v51, 0.0  ;;  %v4901_v0 = vrot.slane %v4900_v42, 4  ;;  %v5735_v51 = vld [vmem:[%s5958_s9 + $0x3f8] sm:$0xff]  ;;  %s5381_s9 = sshll.u32 %s7267_s8, 5 }
 0x62f   : > { %v4849_v4 = vrot.slane %v4848_v50, 1  ;;  %v4866_v13 = vrot.slane %v4865_v38, 4  ;;  %v4037_v15 = vmul.f32 %v5733_v63, %v3903_v34  ;;  %v4877_v40 = vrot.slane %v4876_v3, 1  ;;  %s303_s16 = scalar_lea.vmem [#allocation2], %s5381_s9 }
 0x630   : > { %v4895_v30 = vadd.f32 %v4894_v26, %v4893_v8  ;;  %v4882_v27 = vrot.slane %v4881_v48, 2  ;;  %v4915_v41 = vrot.slane %v4914_v23, 4  ;;  %v4864_v46 = vadd.f32 %v4863_v16, %v4862_v10  ;;  %s5244_s22 = sshll.u32 %s303_s16, 4  ;;  %s5245_s22 = int_to_ptr.vmem [resolvable:$true] %s5244_s22 }
 0x631   : > { %v4850_v14 = vadd.f32 %v4849_v4, %v4848_v50  ;;  %v4867_v19 = vadd.f32 %v4866_v13, %v4865_v38  ;;  %v4902_v54 = vadd.f32 %v4901_v0, %v4900_v42  ;;  %v4921_v12 = vsel %vm480_vm0, %v4037_v15, 0.0 }
 0x632   : > { %v4878_v52 = vadd.f32 %v4877_v40, %v4876_v3  ;;  %v4896_v39 = vrot.slane %v4895_v30, 2  ;;  %v4883_v62 = vadd.f32 %v4882_v27, %v4881_v48  ;;  %v4922_v31 = vrot.slane %v4921_v12, 4 }
 0x633   : > { %v4868_v18 = vrot.slane %v4867_v19, 2  ;;  %v3868_v22 = vpop.permute.xlu1 %3867  ;;  %v5163_v59 = vsel %vm2797_vm4, %v4850_v14, %v5162_v29  ;;  %v4916_v32 = vadd.f32 %v4915_v41, %v4914_v23  ;;  %v4903_v44 = vrot.slane %v4902_v54, 2 }
 0x634   : > { %v4032_v17 = vmul.f32 %v5732_v55, %v3868_v22  ;;  %v5164_v43 = vsel %vm2799_vm5, %v4857_v35, %v5163_v59  ;;  %v4897_v50 = vadd.f32 %v4896_v39, %v4895_v30  ;;  %v4884_v7 = vrot.slane %v4883_v62, 1 }
 0x635   : > { %v4869_v47 = vadd.f32 %v4868_v18, %v4867_v19  ;;  %v5165_v1 = vsel %vm2801_vm6, %v4864_v46, %v5164_v43  ;;  %v4923_v24 = vadd.f32 %v4922_v31, %v4921_v12  ;;  %v4917_v38 = vrot.slane %v4916_v32, 2 }
 0x636   : > { %v4886_v49 = vsel %vm480_vm0, %v4032_v17, 0.0  ;;  %v4904_v8 = vadd.f32 %v4903_v44, %v4902_v54  ;;  %v4898_v13 = vrot.slane %v4897_v50, 1  ;;  %v4885_v58 = vadd.f32 %v4884_v7, %v4883_v62 }
 0x637   : > { %v4870_v11 = vrot.slane %v4869_v47, 1  ;;  %v4887_v60 = vrot.slane %v4886_v49, 4  ;;  %v4924_v45 = vrot.slane %v4923_v24, 2  ;;  %v4918_v14 = vadd.f32 %v4917_v38, %v4916_v32 }
 0x638   : > { %v4905_v19 = vrot.slane %v4904_v8, 1  ;;  %v4899_v42 = vadd.f32 %v4898_v13, %v4897_v50 }
 0x639   : > { %v4871_v2 = vadd.f32 %v4870_v11, %v4869_v47  ;;  %v4888_v5 = vadd.f32 %v4887_v60, %v4886_v49  ;;  %v4925_v18 = vadd.f32 %v4924_v45, %v4923_v24  ;;  %v4919_v35 = vrot.slane %v4918_v14, 1 }
 0x63a   : > { %v4906_v16 = vadd.f32 %v4905_v19, %v4904_v8 }
 0x63b   : > { %v4889_v53 = vrot.slane %v4888_v5, 2  ;;  %v3889_v33 = vpop.permute.xlu1 %3888  ;;  %v5166_v6 = vsel %vm2803_vm7, %v4871_v2, %v5165_v1  ;;  %v4926_v0 = vrot.slane %v4925_v18, 1  ;;  %v4920_v15 = vadd.f32 %v4919_v35, %v4918_v14 }
 0x63c   : > { %v4035_v21 = vmul.f32 %v5734_v25, %v3889_v33  ;;  %v5167_v37 = vsel %vm2805_vm8, %v4878_v52, %v5166_v6 }
 0x63d   : > { %v4890_v20 = vadd.f32 %v4889_v53, %v4888_v5  ;;  %5205 = vxpose.xlu2.b32.cont [15/16] (narrow) %v5167_v37, 32  ;;  %v4927_v49 = vadd.f32 %v4926_v0, %v4925_v18 }
 0x63e   : > { %v4907_v57 = vsel %vm480_vm0, %v4035_v21, 0.0 }
 0x63f   : > { %v4891_v61 = vrot.slane %v4890_v20, 1  ;;  %v4908_v56 = vrot.slane %v4907_v57, 4 }
 0x641   : > { %v4892_v36 = vadd.f32 %v4891_v61, %v4890_v20  ;;  %v4909_v4 = vadd.f32 %v4908_v56, %v4907_v57 }
 0x643   : > { %v4910_v10 = vrot.slane %v4909_v4, 2  ;;  %v3910_v28 = vpop.permute.xlu1 %3909  ;;  %v5168_v3 = vsel %vm2793_vm2, %v4892_v36, %v4885_v58 }
 0x644   : > { %v4038_v9 = vmul.f32 %v5735_v51, %v3910_v28  ;;  %v5169_v22 = vsel %vm2795_vm3, %v4899_v42, %v5168_v3 }
 0x645   : > { %v4911_v26 = vadd.f32 %v4910_v10, %v4909_v4  ;;  %v5170_v17 = vsel %vm2797_vm4, %v4906_v16, %v5169_v22 }
 0x646   : > { %v4928_v34 = vsel %vm480_vm0, %v4038_v9, 0.0 }
 0x647   : > { %v4912_v48 = vrot.slane %v4911_v26, 1  ;;  %v4929_v29 = vrot.slane %v4928_v34, 4 }
 0x649   : > { %v4913_v59 = vadd.f32 %v4912_v48, %v4911_v26  ;;  %v4930_v55 = vadd.f32 %v4929_v29, %v4928_v34 }
 0x64b   : > { %v4931_v23 = vrot.slane %v4930_v55, 2  ;;  %v5171_v63 = vsel %vm2799_vm5, %v4913_v59, %v5170_v17 }
 0x64c   : > { %v5172_v30 = vsel %vm2801_vm6, %v4920_v15, %v5171_v63 }
 0x64d   : > { %v4932_v47 = vadd.f32 %v4931_v23, %v4930_v55  ;;  %v5173_v11 = vsel %vm2803_vm7, %v4927_v49, %v5172_v30 }
 0x64f   : > { %v4933_v40 = vrot.slane %v4932_v47, 1 }
 0x651   : > { %v4934_v27 = vadd.f32 %v4933_v40, %v4932_v47 }
 0x653   : > { %v5174_v60 = vsel %vm2805_vm8, %v4934_v27, %v5173_v11 }
 0x654   : > { %5206 = vxpose.xlu2.b32.end [16/16] (narrow) %v5174_v60, 32 }
 0x675   : > { %v5207_v43 = vpop.trf.xlu2 }
 0x676   : > { %5223 = vst [vmem:[%s303_s16] sm:$0xff] %v5207_v43 }
 0x67d   : > { %v5208_v41 = vpop.trf.xlu2 }
 0x67e   : > { %5224 = vst [vmem:[%s303_s16 + $0x8] sm:$0xff] %v5208_v41 }
 0x685   : > { %v5209_v46 = vpop.trf.xlu2 }
 0x686   : > { %5225 = vst [vmem:[%s303_s16 + $0x10] sm:$0xff] %v5209_v46 }
 0x68d   : > { %v5210_v54 = vpop.trf.xlu2 }
 0x68e   : > { %5226 = vst [vmem:[%s303_s16 + $0x18] sm:$0xff] %v5210_v54 }
 0x68f   : > { %5791 = shalt.err (!%p5788_p0)
}
 0x690   : > { %s5832_s8 = smov 128   ;;  %s5833_s16 = smov 256  }
 0x691   : > { %s5834_s17 = smov 8  }
 0x692   : > { %5549 = dma.vmem_to_hbm [thread:$0]  (%p5913_p5), %s5245_s22, 512, %s5247_s23, %s5228_s29, %s5832_s8, %s5833_s16, %s5834_s17  }
 0x693 PF: > { %p5560_p1 = scmp.ge.s32.totalorder %s5830_s27, 2  ;;  %s5275_s18 = sand.u32 1, %s5818_s24  }
 0x694   : > { %s5276_s21 = scalar_lea.sflag [#allocation3], %s5275_s18 }
 0x695   : > { %p5554_p2 = pnand %p5560_p1, %p5917_p6 }
 0x697   : > { %p5555_p3 = pneg %p5554_p2 }
 0x699   : > { %5809 = dma.done.wait (%p5555_p3), %s5276_s21, 512  }
 0x69a   : > { %5811 = vsyncadd (%p5555_p3), %s5276_s21, 4294966784  ;;  %s5286_s19 = scalar_lea.sflag [#allocation5], %s5275_s18 }
 0x69b   : > { %5813 = dma.done.wait (%p5555_p3), %s5286_s19, 128  }
 0x69c   : > { %5815 = vsyncadd (%p5555_p3), %s5286_s19, 4294967168  ;;  %p21_p5 = scmp.ge.s32.totalorder %s5900_s30, 4   ;;  %s8138_s24 = smov %s5822_s25 }
 0x69d   : > { %s8139_s25 = smov %s5826_s26  ;;  %s8140_s26 = smov %s5911_s10 }
 0x69e   : > { %s8141_s27 = smov %s5900_s30  ;;  %23 = sbr.rel (!%p21_p5) target bundleno = 5 (0x5), region = 102 }
 0x6a3   :  { %5292 = vsyncpa [#allocation3], 1 }
 0x6a4   :  { %5294 = vsyncpa [#allocation3 + $0x1], 1 }
 0x6a5   :  { %5295 = vsyncpa [#allocation5], 1 }
 0x6a6   :  { %5297 = vsyncpa [#allocation5 + $0x1], 1 }

</bundles_post_ra>
